<compile_context>
chip_gen: v7x
topology: tpu7x:2x2x1
jax: 0.10.0
libtpu: 0.0.40
codegen_flags: <defaults>
</compile_context>

<pallas_src>
import functools

import jax
import jax.numpy as jnp
import numpy as np
from jax.experimental import pallas as pl
from jax.experimental.pallas import tpu as pltpu

BN_EPS = 1e-5
EMB_SIZE = 32


def _round_up(x, m):
    return (x + m - 1) // m * m


def _pick_batch_tile(n, max_tile=8):
    """Largest divisor of n that is <= max_tile while keeping >= 2 grid steps
    (so both v7x TensorCores get work); falls back to the largest divisor."""
    divisors = [d for d in range(1, min(n, max_tile) + 1) if n % d == 0]
    two_step = [d for d in divisors if n // d >= 2]
    return max(two_step) if two_step else max(divisors)


# ----------------------------- Pallas kernels -----------------------------

def _bn_stats_kernel(x_ref, o_ref, *, count, C, B):
    """Per-channel batch (sum, sum-of-squares) -> (mean, biased variance).

    Accumulated over grid=(N // B,) into a resident (1, 2C) output.  The
    reduction is a ones-dot against the lane-concatenated [x, x*x], so it
    runs on the MXU instead of a long sublane (XLU) reduce.
    """
    n = pl.program_id(0)

    @pl.when(n == 0)
    def _init():
        o_ref[...] = jnp.zeros_like(o_ref)

    x = x_ref[...]                                          # (B, HW, C) f32
    hw = x.shape[1]
    ones = jnp.ones((1, hw), jnp.float32)
    acc = jnp.zeros((1, 2 * C), jnp.float32)
    for bi in range(B):
        xb = x[bi]                                          # (HW, C)
        cat = jnp.concatenate([xb, xb * xb], axis=-1)       # (HW, 2C)
        acc = acc + jnp.dot(ones, cat, preferred_element_type=jnp.float32)
    o_ref[...] += acc

    @pl.when(n == pl.num_programs(0) - 1)
    def _finalize():
        inv = 1.0 / count
        s = o_ref[...]
        mean = s[:, :C] * inv
        var = jnp.maximum(s[:, C:] * inv - mean * mean, 0.0)   # biased variance
        o_ref[...] = jnp.concatenate([mean, var], axis=-1)


def _block_kernel(stats_ref, gamma_ref, beta_ref, w_ref, b_ref, mask_ref,
                  sel_ref, x_ref, o_ref, *, W, Cin, HW, SEG, P, L_sel,
                  pad_front, B, fuse_gap):
    """Fused BN(batch stats) + ReLU + Conv2d(3x3, pad=1) + MaxPool2d(3, s=2).

    Processes B images per grid step.  Each image occupies HW rows of a
    zero-padded, batch-segmented flat (rows, Cin) activation value; the 3x3
    conv is one (MSPAN, 9*Cin) x (9*Cin, Cout) bf16 MXU matmul over shifted
    slices of it.  If fuse_gap, AdaptiveAvgPool2d((1,1)) + flatten is folded.
    """
    MSPAN = (B - 1) * SEG + HW

    # ---- BatchNorm affine (from batch statistics), f32 ----
    mean = stats_ref[:, :Cin]                               # (1, Cin)
    var = stats_ref[:, Cin:]                                # (1, Cin)
    scale = gamma_ref[...] * jax.lax.rsqrt(var + BN_EPS)    # (1, Cin)
    shift = beta_ref[...] - mean * scale                    # (1, Cin)

    # ---- Zero-padded, batch-segmented activation built as a single value.
    # Image bi occupies rows [pad_front + bi*SEG, pad_front + bi*SEG + HW);
    # the >= W+1 zero rows before/after every image absorb vertical conv taps.
    gap = jnp.zeros((SEG - HW, Cin), jnp.bfloat16)
    parts = [jnp.zeros((pad_front, Cin), jnp.bfloat16)]
    for bi in range(B):
        act = jnp.maximum(x_ref[bi] * scale + shift, 0.0)   # (HW, Cin) f32
        parts.append(act.astype(jnp.bfloat16))              # single bf16 cast
        parts.append(gap)
    padded = jnp.concatenate(parts, axis=0)                 # (pad_front+B*SEG, Cin)

    # ---- 3x3 conv as ONE K-concatenated MXU matmul ----
    # Spatial tap (dy, dx) is the flat shift dy*W + dx of the padded value;
    # left/right image-border taps are zeroed by hoisted bf16 masks.
    m = mask_ref[...]                                       # (MSPAN, 2) bf16
    lmask, rmask = m[:, 0:1], m[:, 1:2]
    taps = []
    for k in range(9):
        ky, kx = divmod(k, 3)
        start = pad_front + (ky - 1) * W + (kx - 1)
        t = padded[start:start + MSPAN, :]                  # (MSPAN, Cin) bf16
        if kx == 0:
            t = t * lmask
        elif kx == 2:
            t = t * rmask
        taps.append(t)
    patch = jnp.concatenate(taps, axis=-1)                  # (MSPAN, 9*Cin) bf16
    conv = jnp.dot(patch, w_ref[...],
                   preferred_element_type=jnp.float32) + b_ref[...]  # (MSPAN, Cout)

    # ---- Fused MaxPool2d(3, stride=2) via shifted-window maxima.
    # Positions whose window crosses an image edge (or lies in a zero gap)
    # are garbage but provably never selected below.
    wmax = jnp.maximum(jnp.maximum(conv[0:MSPAN - 2], conv[1:MSPAN - 1]),
                       conv[2:MSPAN])
    L = MSPAN - 2 * W - 2
    hmax = jnp.maximum(jnp.maximum(wmax[0:L], wmax[W:W + L]),
                       wmax[2 * W:2 * W + L])

    for bi in range(B):
        hm = hmax[bi * SEG:bi * SEG + L_sel, :]             # (L_sel, Cout)
        if P == 1:
            pooled = hm[0:1, :]
        else:
            # Hoisted (P, L_sel) one-hot gathers the valid window starts.
            pooled = jnp.dot(sel_ref[...], hm,
                             preferred_element_type=jnp.float32)  # (P, Cout)
        if fuse_gap:
            o_ref[bi] = jnp.mean(pooled, axis=0, keepdims=True)   # (1, Cout)
        else:
            o_ref[bi] = pooled                                     # (P, Cout)


# ----------------------------- wrappers (glue) -----------------------------

def _bn_stats(x, b_tile):
    """Batch (mean | biased var) per channel of a (N, HW, C) tensor -> (1, 2C)."""
    N, HW, C = x.shape
    kernel = functools.partial(_bn_stats_kernel, count=N * HW, C=C, B=b_tile)
    return pl.pallas_call(
        kernel,
        out_shape=jax.ShapeDtypeStruct((1, 2 * C), jnp.float32),
        grid=(N // b_tile,),
        in_specs=[pl.BlockSpec((b_tile, HW, C), lambda n: (n, 0, 0))],
        out_specs=pl.BlockSpec((1, 2 * C), lambda n: (0, 0)),  # resident accumulator
        compiler_params=pltpu.CompilerParams(
            dimension_semantics=("arbitrary",)),
    )(x)


def _bnrelu_conv_maxpool(x, H, W, gamma, beta, w_oihw, bias, stats, *,
                         b_tile, fuse_gap):
    """One fused block: BN -> ReLU -> Conv2d(3x3, pad=1) -> MaxPool2d(3, s=2).

    x: (N, H*W, Cin) channels-last f32.  Returns (N, Ho*Wo, Cout) f32, or
    (N, Cout) if fuse_gap (last block, global-average-pool + flatten folded).
    """
    N, HW, Cin = x.shape
    assert HW == H * W and H >= 3 and W >= 3 and N % b_tile == 0
    Cout = w_oihw.shape[0]
    Ho, Wo = (H - 3) // 2 + 1, (W - 3) // 2 + 1
    P = Ho * Wo
    B = b_tile
    pad_front = _round_up(W + 1, 8)          # zero rows before image 0
    SEG = _round_up(HW + W + 1, 8)           # per-image segment (image + zero gap)
    MSPAN = (B - 1) * SEG + HW               # conv span per grid step
    L_sel = HW - 2 * W - 2                   # hmax rows needed per image

    # PyTorch (Cout, Cin, ky, kx) -> (ky, kx, Cin, Cout) -> (9*Cin, Cout), bf16.
    w_cat = jnp.transpose(w_oihw, (2, 3, 1, 0)).reshape(9 * Cin, Cout)
    w_cat = w_cat.astype(jnp.bfloat16)

    # Hoisted per-layer constants (resident inputs; nothing rebuilt per step).
    pos = np.arange(MSPAN)
    r = pos % SEG                            # position within own segment
    col = r % W
    interior = r < HW
    mask_np = np.stack([interior & (col >= 1),
                        interior & (col <= W - 2)], axis=1).astype(np.float32)
    mask = jnp.asarray(mask_np, dtype=jnp.bfloat16)          # (MSPAN, 2)

    sel_np = np.zeros((P, L_sel), np.float32)
    for q in range(P):
        py, px = divmod(q, Wo)
        sel_np[q, 2 * py * W + 2 * px] = 1.0
    sel = jnp.asarray(sel_np)                                 # (P, L_sel)

    out_P = 1 if fuse_gap else P
    kernel = functools.partial(_block_kernel, W=W, Cin=Cin, HW=HW, SEG=SEG,
                               P=P, L_sel=L_sel, pad_front=pad_front, B=B,
                               fuse_gap=fuse_gap)
    out = pl.pallas_call(
        kernel,
        out_shape=jax.ShapeDtypeStruct((N, out_P, Cout), jnp.float32),
        grid=(N // B,),
        in_specs=[
            pl.BlockSpec((1, 2 * Cin), lambda n: (0, 0)),        # BN batch stats
            pl.BlockSpec((1, Cin), lambda n: (0, 0)),            # gamma
            pl.BlockSpec((1, Cin), lambda n: (0, 0)),            # beta
            pl.BlockSpec((9 * Cin, Cout), lambda n: (0, 0)),     # conv weight (K-cat)
            pl.BlockSpec((1, Cout), lambda n: (0, 0)),           # conv bias
            pl.BlockSpec((MSPAN, 2), lambda n: (0, 0)),          # border masks
            pl.BlockSpec((P, L_sel), lambda n: (0, 0)),          # maxpool one-hot
            pl.BlockSpec((B, HW, Cin), lambda n: (n, 0, 0)),     # B_TILE image tiles
        ],
        out_specs=pl.BlockSpec((B, out_P, Cout), lambda n: (n, 0, 0)),
        compiler_params=pltpu.CompilerParams(
            dimension_semantics=("parallel",)),  # batch grid shards across TCs (v7x)
    )(stats, gamma.reshape(1, Cin), beta.reshape(1, Cin), w_cat,
      bias.reshape(1, Cout), mask, sel, x)

    if fuse_gap:
        return out.reshape(N, Cout)
    return out


@jax.jit
def simple_metric_embedding_forward(x_nchw, params):
    """Equivalent of SimpleMetricEmbedding.forward(x) / get_features(x)."""
    N, C, H, W = x_nchw.shape
    # NCHW -> NHWC -> flat (N, H*W, C); channels on the lane dim (glue only).
    x = jnp.transpose(x_nchw, (0, 2, 3, 1)).astype(jnp.float32)
    x = x.reshape(N, H * W, C)
    b_tile = _pick_batch_tile(N)
    h, w = H, W
    for i, (gamma, beta, wt, bias) in enumerate(params):
        stats = _bn_stats(x, b_tile)                         # (1, 2C) batch stats
        last = i == len(params) - 1
        x = _bnrelu_conv_maxpool(x, h, w, gamma, beta, wt, bias, stats,
                                 b_tile=b_tile, fuse_gap=last)
        h, w = (h - 3) // 2 + 1, (w - 3) // 2 + 1
    return x                                                 # (N, emb_size)


# ----------------------------- params & reference -----------------------------

def init_params(key, input_channels, emb_size=EMB_SIZE):
    params = []
    cins = [input_channels, emb_size, emb_size]
    for cin in cins:
        k1, k2, k3, k4, key = jax.random.split(key, 5)
        gamma = 1.0 + 0.1 * jax.random.normal(k1, (cin,), jnp.float32)
        beta = 0.1 * jax.random.normal(k2, (cin,), jnp.float32)
        w = 0.1 * jax.random.normal(k3, (emb_size, cin, 3, 3), jnp.float32)
        b = 0.05 * jax.random.normal(k4, (emb_size,), jnp.float32)
        params.append((gamma, beta, w, b))
    return params


def reference_forward(x_nchw, params):
    """Pure-JAX reference (lax.conv / reduce_window) for correctness check."""
    x = jnp.transpose(x_nchw, (0, 2, 3, 1)).astype(jnp.float32)
    for gamma, beta, w, b in params:
        mean = jnp.mean(x, axis=(0, 1, 2))
        var = jnp.mean((x - mean) ** 2, axis=(0, 1, 2))
        x = (x - mean) * jax.lax.rsqrt(var + BN_EPS) * gamma + beta
        x = jnp.maximum(x, 0.0)
        w_hwio = jnp.transpose(w, (2, 3, 1, 0))
        x = jax.lax.conv_general_dilated(
            x, w_hwio, window_strides=(1, 1), padding=((1, 1), (1, 1)),
            dimension_numbers=("NHWC", "HWIO", "NHWC")) + b
        x = jax.lax.reduce_window(x, -jnp.inf, jax.lax.max,
                                  (1, 3, 3, 1), (1, 2, 2, 1), "VALID")
    return jnp.mean(x, axis=(1, 2))


if __name__ == "__main__":
    key = jax.random.PRNGKey(0)
    kx, kp = jax.random.split(key)
    N, C, H, W = 2, 4, 16, 16
    x = jax.random.normal(kx, (N, C, H, W), jnp.float32)  # NCHW, like PyTorch
    params = init_params(kp, input_channels=C, emb_size=EMB_SIZE)

    emb = simple_metric_embedding_forward(x, params)
    emb = jax.block_until_ready(emb)

    ref = reference_forward(x, params)
    assert emb.shape == (N, EMB_SIZE), emb.shape
    # Conv matmuls use bf16 MXU operands with f32 accumulation, so the match
    # against the pure-f32 reference is slightly looser than pure f32.
    if not bool(jnp.allclose(emb, ref, atol=3e-2, rtol=3e-2)):
        max_err = float(jnp.max(jnp.abs(emb - ref)))
        raise AssertionError(
            f"Pallas result mismatches pure-JAX reference (max|err|={max_err:.3e})")
    print("KERNEL_OK")
</pallas_src>

<mosaic_0001>
module attributes {stable_mosaic.version = 11 : i64} {
  func.func @_block_kernel(%arg0: i32, %arg1: memref<1x8xf32, #tpu.memory_space<vmem>>, %arg2: memref<1x4xf32, #tpu.memory_space<vmem>>, %arg3: memref<1x4xf32, #tpu.memory_space<vmem>>, %arg4: memref<36x32xbf16, #tpu.memory_space<vmem>>, %arg5: memref<1x32xf32, #tpu.memory_space<vmem>>, %arg6: memref<256x2xbf16, #tpu.memory_space<vmem>>, %arg7: memref<49x222xf32, #tpu.memory_space<vmem>>, %arg8: memref<1x256x4xf32, #tpu.memory_space<vmem>>, %arg9: memref<1x49x32xf32, #tpu.memory_space<vmem>>) attributes {dimension_semantics = [#tpu.dimension_semantics<parallel>], iteration_bounds = array<i64: 2>, scalar_prefetch = 0 : i64, scratch_operands = 0 : i64, tpu.core_type = #tpu.core_type<tc>, window_params = [{pipeline_mode = #tpu.pipeline_mode<synchronous>, transform_indices = @transform_0, window_bounds = array<i64: 1, 8>}, {pipeline_mode = #tpu.pipeline_mode<synchronous>, transform_indices = @transform_1, window_bounds = array<i64: 1, 4>}, {pipeline_mode = #tpu.pipeline_mode<synchronous>, transform_indices = @transform_2, window_bounds = array<i64: 1, 4>}, {pipeline_mode = #tpu.pipeline_mode<synchronous>, transform_indices = @transform_3, window_bounds = array<i64: 36, 32>}, {pipeline_mode = #tpu.pipeline_mode<synchronous>, transform_indices = @transform_4, window_bounds = array<i64: 1, 32>}, {pipeline_mode = #tpu.pipeline_mode<synchronous>, transform_indices = @transform_5, window_bounds = array<i64: 256, 2>}, {pipeline_mode = #tpu.pipeline_mode<synchronous>, transform_indices = @transform_6, window_bounds = array<i64: 49, 222>}, {transform_indices = @transform_7, window_bounds = array<i64: 1, 256, 4>}, {transform_indices = @transform_8, window_bounds = array<i64: 1, 49, 32>}]} {
    %c0 = arith.constant 0 : index
    %c0_0 = arith.constant 0 : index
    %0 = vector.load %arg1[%c0, %c0_0] : memref<1x8xf32, #tpu.memory_space<vmem>>, vector<1x4xf32>
    %c0_1 = arith.constant 0 : index
    %c4 = arith.constant 4 : index
    %1 = vector.load %arg1[%c0_1, %c4] : memref<1x8xf32, #tpu.memory_space<vmem>>, vector<1x4xf32>
    %c0_2 = arith.constant 0 : index
    %c0_3 = arith.constant 0 : index
    %2 = vector.load %arg2[%c0_2, %c0_3] : memref<1x4xf32, #tpu.memory_space<vmem>>, vector<1x4xf32>
    %cst = arith.constant 9.99999974E-6 : f32
    %3 = vector.broadcast %cst : f32 to vector<1x4xf32>
    %4 = arith.addf %1, %3 : vector<1x4xf32>
    %5 = math.rsqrt %4 : vector<1x4xf32>
    %6 = arith.mulf %2, %5 : vector<1x4xf32>
    %c0_4 = arith.constant 0 : index
    %c0_5 = arith.constant 0 : index
    %7 = vector.load %arg3[%c0_4, %c0_5] : memref<1x4xf32, #tpu.memory_space<vmem>>, vector<1x4xf32>
    %8 = arith.mulf %0, %6 : vector<1x4xf32>
    %9 = arith.subf %7, %8 : vector<1x4xf32>
    %cst_6 = arith.constant 0.000000e+00 : bf16
    %10 = vector.broadcast %cst_6 : bf16 to vector<24x4xbf16>
    %cst_7 = arith.constant 0.000000e+00 : bf16
    %11 = vector.broadcast %cst_7 : bf16 to vector<24x4xbf16>
    %c0_8 = arith.constant 0 : index
    %c0_9 = arith.constant 0 : index
    %c0_10 = arith.constant 0 : index
    %12 = vector.load %arg8[%c0_8, %c0_9, %c0_10] : memref<1x256x4xf32, #tpu.memory_space<vmem>>, vector<1x256x4xf32>
    %13 = vector.shape_cast %12 : vector<1x256x4xf32> to vector<256x4xf32>
    %14 = vector.broadcast %6 : vector<1x4xf32> to vector<256x4xf32>
    %15 = arith.mulf %13, %14 : vector<256x4xf32>
    %16 = vector.broadcast %9 : vector<1x4xf32> to vector<256x4xf32>
    %17 = arith.addf %15, %16 : vector<256x4xf32>
    %cst_11 = arith.constant 0.000000e+00 : f32
    %18 = vector.broadcast %cst_11 : f32 to vector<256x4xf32>
    %19 = arith.maximumf %17, %18 : vector<256x4xf32>
    %20 = arith.truncf %19 : vector<256x4xf32> to vector<256x4xbf16>
    %21 = tpu.concatenate %11, %20, %10 in 0 : vector<24x4xbf16>, vector<256x4xbf16>, vector<24x4xbf16> -> vector<304x4xbf16>
    %c0_12 = arith.constant 0 : index
    %c0_13 = arith.constant 0 : index
    %22 = vector.load %arg6[%c0_12, %c0_13] : memref<256x2xbf16, #tpu.memory_space<vmem>>, vector<256x2xbf16>
    %23 = vector.extract_strided_slice %22 {offsets = [0, 0], sizes = [256, 1], strides = [1, 1]} : vector<256x2xbf16> to vector<256x1xbf16>
    %24 = vector.extract_strided_slice %22 {offsets = [0, 1], sizes = [256, 1], strides = [1, 1]} : vector<256x2xbf16> to vector<256x1xbf16>
    %25 = vector.extract_strided_slice %21 {offsets = [7, 0], sizes = [256, 4], strides = [1, 1]} : vector<304x4xbf16> to vector<256x4xbf16>
    %26 = vector.broadcast %23 : vector<256x1xbf16> to vector<256x4xbf16>
    %27 = arith.mulf %25, %26 : vector<256x4xbf16>
    %28 = vector.extract_strided_slice %21 {offsets = [8, 0], sizes = [256, 4], strides = [1, 1]} : vector<304x4xbf16> to vector<256x4xbf16>
    %29 = vector.extract_strided_slice %21 {offsets = [9, 0], sizes = [256, 4], strides = [1, 1]} : vector<304x4xbf16> to vector<256x4xbf16>
    %30 = vector.broadcast %24 : vector<256x1xbf16> to vector<256x4xbf16>
    %31 = arith.mulf %29, %30 : vector<256x4xbf16>
    %32 = vector.extract_strided_slice %21 {offsets = [23, 0], sizes = [256, 4], strides = [1, 1]} : vector<304x4xbf16> to vector<256x4xbf16>
    %33 = vector.broadcast %23 : vector<256x1xbf16> to vector<256x4xbf16>
    %34 = arith.mulf %32, %33 : vector<256x4xbf16>
    %35 = vector.extract_strided_slice %21 {offsets = [24, 0], sizes = [256, 4], strides = [1, 1]} : vector<304x4xbf16> to vector<256x4xbf16>
    %36 = vector.extract_strided_slice %21 {offsets = [25, 0], sizes = [256, 4], strides = [1, 1]} : vector<304x4xbf16> to vector<256x4xbf16>
    %37 = vector.broadcast %24 : vector<256x1xbf16> to vector<256x4xbf16>
    %38 = arith.mulf %36, %37 : vector<256x4xbf16>
    %39 = vector.extract_strided_slice %21 {offsets = [39, 0], sizes = [256, 4], strides = [1, 1]} : vector<304x4xbf16> to vector<256x4xbf16>
    %40 = vector.broadcast %23 : vector<256x1xbf16> to vector<256x4xbf16>
    %41 = arith.mulf %39, %40 : vector<256x4xbf16>
    %42 = vector.extract_strided_slice %21 {offsets = [40, 0], sizes = [256, 4], strides = [1, 1]} : vector<304x4xbf16> to vector<256x4xbf16>
    %43 = vector.extract_strided_slice %21 {offsets = [41, 0], sizes = [256, 4], strides = [1, 1]} : vector<304x4xbf16> to vector<256x4xbf16>
    %44 = vector.broadcast %24 : vector<256x1xbf16> to vector<256x4xbf16>
    %45 = arith.mulf %43, %44 : vector<256x4xbf16>
    %46 = tpu.concatenate %27, %28, %31, %34, %35, %38, %41, %42, %45 in 1 : vector<256x4xbf16>, vector<256x4xbf16>, vector<256x4xbf16>, vector<256x4xbf16>, vector<256x4xbf16>, vector<256x4xbf16>, vector<256x4xbf16>, vector<256x4xbf16>, vector<256x4xbf16> -> vector<256x36xbf16>
    %c0_14 = arith.constant 0 : index
    %c0_15 = arith.constant 0 : index
    %47 = vector.load %arg4[%c0_14, %c0_15] : memref<36x32xbf16, #tpu.memory_space<vmem>>, vector<36x32xbf16>
    %cst_16 = arith.constant dense<0.000000e+00> : vector<256x32xf32>
    %48 = tpu.matmul %46, %47, %cst_16 {dimension_numbers = #tpu.dot_dimension_numbers<[1], [0], [0], [1], [0, 0, 1, 1], [], []>} : vector<256x36xbf16>, vector<36x32xbf16>, vector<256x32xf32> -> vector<256x32xf32>
    %c0_17 = arith.constant 0 : index
    %c0_18 = arith.constant 0 : index
    %49 = vector.load %arg5[%c0_17, %c0_18] : memref<1x32xf32, #tpu.memory_space<vmem>>, vector<1x32xf32>
    %50 = vector.broadcast %49 : vector<1x32xf32> to vector<256x32xf32>
    %51 = arith.addf %48, %50 : vector<256x32xf32>
    %52 = vector.extract_strided_slice %51 {offsets = [0, 0], sizes = [254, 32], strides = [1, 1]} : vector<256x32xf32> to vector<254x32xf32>
    %53 = vector.extract_strided_slice %51 {offsets = [1, 0], sizes = [254, 32], strides = [1, 1]} : vector<256x32xf32> to vector<254x32xf32>
    %54 = arith.maximumf %52, %53 : vector<254x32xf32>
    %55 = vector.extract_strided_slice %51 {offsets = [2, 0], sizes = [254, 32], strides = [1, 1]} : vector<256x32xf32> to vector<254x32xf32>
    %56 = arith.maximumf %54, %55 : vector<254x32xf32>
    %57 = vector.extract_strided_slice %56 {offsets = [0, 0], sizes = [222, 32], strides = [1, 1]} : vector<254x32xf32> to vector<222x32xf32>
    %58 = vector.extract_strided_slice %56 {offsets = [16, 0], sizes = [222, 32], strides = [1, 1]} : vector<254x32xf32> to vector<222x32xf32>
    %59 = arith.maximumf %57, %58 : vector<222x32xf32>
    %60 = vector.extract_strided_slice %56 {offsets = [32, 0], sizes = [222, 32], strides = [1, 1]} : vector<254x32xf32> to vector<222x32xf32>
    %61 = arith.maximumf %59, %60 : vector<222x32xf32>
    %c0_19 = arith.constant 0 : index
    %c0_20 = arith.constant 0 : index
    %62 = vector.load %arg7[%c0_19, %c0_20] : memref<49x222xf32, #tpu.memory_space<vmem>>, vector<49x222xf32>
    %cst_21 = arith.constant dense<0.000000e+00> : vector<49x32xf32>
    %63 = tpu.matmul %62, %61, %cst_21 {dimension_numbers = #tpu.dot_dimension_numbers<[1], [0], [0], [1], [0, 0, 1, 1], [], []>} : vector<49x222xf32>, vector<222x32xf32>, vector<49x32xf32> -> vector<49x32xf32>
    %c0_22 = arith.constant 0 : index
    %c0_23 = arith.constant 0 : index
    %c0_24 = arith.constant 0 : index
    %64 = vector.load %arg9[%c0_22, %c0_23, %c0_24] : memref<1x49x32xf32, #tpu.memory_space<vmem>>, vector<1x49x32xf32>
    %65 = vector.shape_cast %64 : vector<1x49x32xf32> to vector<49x32xf32>
    %66 = vector.shape_cast %63 : vector<49x32xf32> to vector<1x49x32xf32>
    tpu.vector_store %arg9[%c0_22, %c0_23, %c0_24], %66 {strides = array<i32>} : memref<1x49x32xf32, #tpu.memory_space<vmem>>, vector<1x49x32xf32>,
    return
  }
  func.func @transform_0(%arg0: i32) -> (i32, i32) {
    %c0_i32 = arith.constant 0 : i32
    %c0_i32_0 = arith.constant 0 : i32
    %c0_i32_1 = arith.constant 0 : i32
    return %c0_i32, %c0_i32_0 : i32, i32
  }
  func.func @transform_1(%arg0: i32) -> (i32, i32) {
    %c0_i32 = arith.constant 0 : i32
    %c0_i32_0 = arith.constant 0 : i32
    %c0_i32_1 = arith.constant 0 : i32
    return %c0_i32, %c0_i32_0 : i32, i32
  }
  func.func @transform_2(%arg0: i32) -> (i32, i32) {
    %c0_i32 = arith.constant 0 : i32
    %c0_i32_0 = arith.constant 0 : i32
    %c0_i32_1 = arith.constant 0 : i32
    return %c0_i32, %c0_i32_0 : i32, i32
  }
  func.func @transform_3(%arg0: i32) -> (i32, i32) {
    %c0_i32 = arith.constant 0 : i32
    %c0_i32_0 = arith.constant 0 : i32
    %c0_i32_1 = arith.constant 0 : i32
    return %c0_i32, %c0_i32_0 : i32, i32
  }
  func.func @transform_4(%arg0: i32) -> (i32, i32) {
    %c0_i32 = arith.constant 0 : i32
    %c0_i32_0 = arith.constant 0 : i32
    %c0_i32_1 = arith.constant 0 : i32
    return %c0_i32, %c0_i32_0 : i32, i32
  }
  func.func @transform_5(%arg0: i32) -> (i32, i32) {
    %c0_i32 = arith.constant 0 : i32
    %c0_i32_0 = arith.constant 0 : i32
    %c0_i32_1 = arith.constant 0 : i32
    return %c0_i32, %c0_i32_0 : i32, i32
  }
  func.func @transform_6(%arg0: i32) -> (i32, i32) {
    %c0_i32 = arith.constant 0 : i32
    %c0_i32_0 = arith.constant 0 : i32
    %c0_i32_1 = arith.constant 0 : i32
    return %c0_i32, %c0_i32_0 : i32, i32
  }
  func.func @transform_7(%arg0: i32) -> (i32, i32, i32) {
    %c0_i32 = arith.constant 0 : i32
    %c0_i32_0 = arith.constant 0 : i32
    %c0_i32_1 = arith.constant 0 : i32
    return %arg0, %c0_i32, %c0_i32_0 : i32, i32, i32
  }
  func.func @transform_8(%arg0: i32) -> (i32, i32, i32) {
    %c0_i32 = arith.constant 0 : i32
    %c0_i32_0 = arith.constant 0 : i32
    %c0_i32_1 = arith.constant 0 : i32
    return %arg0, %c0_i32, %c0_i32_0 : i32, i32, i32
  }
}

module attributes {stable_mosaic.version = 11 : i64} {
  func.func @_bn_stats_kernel(%arg0: i32, %arg1: memref<1x256x4xf32, #tpu.memory_space<vmem>>, %arg2: memref<1x8xf32, #tpu.memory_space<vmem>>) attributes {dimension_semantics = [#tpu.dimension_semantics<arbitrary>], iteration_bounds = array<i64: 2>, scalar_prefetch = 0 : i64, scratch_operands = 0 : i64, tpu.core_type = #tpu.core_type<tc>, window_params = [{transform_indices = @transform_0, window_bounds = array<i64: 1, 256, 4>}, {pipeline_mode = #tpu.pipeline_mode<synchronous>, transform_indices = @transform_1, window_bounds = array<i64: 1, 8>}]} {
    %c0_i32 = arith.constant 0 : i32
    %0 = arith.cmpi eq, %arg0, %c0_i32 : i32
    %1 = arith.extui %0 : i1 to i32
    %c0_i32_0 = arith.constant 0 : i32
    %2 = arith.cmpi ne, %1, %c0_i32_0 : i32
    scf.if %2 {
      %cst_10 = arith.constant 0.000000e+00 : f32
      %17 = vector.broadcast %cst_10 : f32 to vector<1x8xf32>
      %c0_11 = arith.constant 0 : index
      %c0_12 = arith.constant 0 : index
      %18 = vector.load %arg2[%c0_11, %c0_12] : memref<1x8xf32, #tpu.memory_space<vmem>>, vector<1x8xf32>
      tpu.vector_store %arg2[%c0_11, %c0_12], %17 {strides = array<i32>} : memref<1x8xf32, #tpu.memory_space<vmem>>, vector<1x8xf32>,
    } else {
    }
    %c0 = arith.constant 0 : index
    %c0_1 = arith.constant 0 : index
    %c0_2 = arith.constant 0 : index
    %3 = vector.load %arg1[%c0, %c0_1, %c0_2] : memref<1x256x4xf32, #tpu.memory_space<vmem>>, vector<1x256x4xf32>
    %cst = arith.constant 1.000000e+00 : f32
    %4 = vector.broadcast %cst : f32 to vector<1x256xf32>
    %cst_3 = arith.constant 0.000000e+00 : f32
    %5 = vector.broadcast %cst_3 : f32 to vector<1x8xf32>
    %6 = vector.shape_cast %3 : vector<1x256x4xf32> to vector<256x4xf32>
    %7 = arith.mulf %6, %6 : vector<256x4xf32>
    %8 = tpu.concatenate %6, %7 in 1 : vector<256x4xf32>, vector<256x4xf32> -> vector<256x8xf32>
    %cst_4 = arith.constant dense<0.000000e+00> : vector<1x8xf32>
    %9 = tpu.matmul %4, %8, %cst_4 {dimension_numbers = #tpu.dot_dimension_numbers<[1], [0], [0], [1], [0, 0, 1, 1], [], []>} : vector<1x256xf32>, vector<256x8xf32>, vector<1x8xf32> -> vector<1x8xf32>
    %10 = arith.addf %5, %9 : vector<1x8xf32>
    %c0_5 = arith.constant 0 : index
    %c0_6 = arith.constant 0 : index
    %11 = vector.load %arg2[%c0_5, %c0_6] : memref<1x8xf32, #tpu.memory_space<vmem>>, vector<1x8xf32>
    %12 = arith.addf %11, %10 : vector<1x8xf32>
    %c0_7 = arith.constant 0 : index
    %c0_8 = arith.constant 0 : index
    %13 = vector.load %arg2[%c0_7, %c0_8] : memref<1x8xf32, #tpu.memory_space<vmem>>, vector<1x8xf32>
    tpu.vector_store %arg2[%c0_7, %c0_8], %12 {strides = array<i32>} : memref<1x8xf32, #tpu.memory_space<vmem>>, vector<1x8xf32>,
    %c1_i32 = arith.constant 1 : i32
    %14 = arith.cmpi eq, %arg0, %c1_i32 : i32
    %15 = arith.extui %14 : i1 to i32
    %c0_i32_9 = arith.constant 0 : i32
    %16 = arith.cmpi ne, %15, %c0_i32_9 : i32
    scf.if %16 {
      %c0_10 = arith.constant 0 : index
      %c0_11 = arith.constant 0 : index
      %17 = vector.load %arg2[%c0_10, %c0_11] : memref<1x8xf32, #tpu.memory_space<vmem>>, vector<1x8xf32>
      %18 = vector.extract_strided_slice %17 {offsets = [0, 0], sizes = [1, 4], strides = [1, 1]} : vector<1x8xf32> to vector<1x4xf32>
      %cst_12 = arith.constant 0.001953125 : f32
      %19 = vector.broadcast %cst_12 : f32 to vector<1x4xf32>
      %20 = arith.mulf %18, %19 : vector<1x4xf32>
      %21 = vector.extract_strided_slice %17 {offsets = [0, 4], sizes = [1, 4], strides = [1, 1]} : vector<1x8xf32> to vector<1x4xf32>
      %cst_13 = arith.constant 0.001953125 : f32
      %22 = vector.broadcast %cst_13 : f32 to vector<1x4xf32>
      %23 = arith.mulf %21, %22 : vector<1x4xf32>
      %24 = arith.mulf %20, %20 : vector<1x4xf32>
      %25 = arith.subf %23, %24 : vector<1x4xf32>
      %cst_14 = arith.constant 0.000000e+00 : f32
      %26 = vector.broadcast %cst_14 : f32 to vector<1x4xf32>
      %27 = arith.maximumf %25, %26 : vector<1x4xf32>
      %28 = tpu.concatenate %20, %27 in 1 : vector<1x4xf32>, vector<1x4xf32> -> vector<1x8xf32>
      %c0_15 = arith.constant 0 : index
      %c0_16 = arith.constant 0 : index
      %29 = vector.load %arg2[%c0_15, %c0_16] : memref<1x8xf32, #tpu.memory_space<vmem>>, vector<1x8xf32>
      tpu.vector_store %arg2[%c0_15, %c0_16], %28 {strides = array<i32>} : memref<1x8xf32, #tpu.memory_space<vmem>>, vector<1x8xf32>,
    } else {
    }
    return
  }
  func.func @transform_0(%arg0: i32) -> (i32, i32, i32) {
    %c0_i32 = arith.constant 0 : i32
    %c0_i32_0 = arith.constant 0 : i32
    %c0_i32_1 = arith.constant 0 : i32
    return %arg0, %c0_i32, %c0_i32_0 : i32, i32, i32
  }
  func.func @transform_1(%arg0: i32) -> (i32, i32) {
    %c0_i32 = arith.constant 0 : i32
    %c0_i32_0 = arith.constant 0 : i32
    %c0_i32_1 = arith.constant 0 : i32
    return %c0_i32, %c0_i32_0 : i32, i32
  }
}

module attributes {stable_mosaic.version = 11 : i64} {
  func.func @_bn_stats_kernel(%arg0: i32, %arg1: memref<1x49x32xf32, #tpu.memory_space<vmem>>, %arg2: memref<1x64xf32, #tpu.memory_space<vmem>>) attributes {dimension_semantics = [#tpu.dimension_semantics<arbitrary>], iteration_bounds = array<i64: 2>, scalar_prefetch = 0 : i64, scratch_operands = 0 : i64, tpu.core_type = #tpu.core_type<tc>, window_params = [{transform_indices = @transform_0, window_bounds = array<i64: 1, 49, 32>}, {pipeline_mode = #tpu.pipeline_mode<synchronous>, transform_indices = @transform_1, window_bounds = array<i64: 1, 64>}]} {
    %c0_i32 = arith.constant 0 : i32
    %0 = arith.cmpi eq, %arg0, %c0_i32 : i32
    %1 = arith.extui %0 : i1 to i32
    %c0_i32_0 = arith.constant 0 : i32
    %2 = arith.cmpi ne, %1, %c0_i32_0 : i32
    scf.if %2 {
      %cst_10 = arith.constant 0.000000e+00 : f32
      %17 = vector.broadcast %cst_10 : f32 to vector<1x64xf32>
      %c0_11 = arith.constant 0 : index
      %c0_12 = arith.constant 0 : index
      %18 = vector.load %arg2[%c0_11, %c0_12] : memref<1x64xf32, #tpu.memory_space<vmem>>, vector<1x64xf32>
      tpu.vector_store %arg2[%c0_11, %c0_12], %17 {strides = array<i32>} : memref<1x64xf32, #tpu.memory_space<vmem>>, vector<1x64xf32>,
    } else {
    }
    %c0 = arith.constant 0 : index
    %c0_1 = arith.constant 0 : index
    %c0_2 = arith.constant 0 : index
    %3 = vector.load %arg1[%c0, %c0_1, %c0_2] : memref<1x49x32xf32, #tpu.memory_space<vmem>>, vector<1x49x32xf32>
    %cst = arith.constant 1.000000e+00 : f32
    %4 = vector.broadcast %cst : f32 to vector<1x49xf32>
    %cst_3 = arith.constant 0.000000e+00 : f32
    %5 = vector.broadcast %cst_3 : f32 to vector<1x64xf32>
    %6 = vector.shape_cast %3 : vector<1x49x32xf32> to vector<49x32xf32>
    %7 = arith.mulf %6, %6 : vector<49x32xf32>
    %8 = tpu.concatenate %6, %7 in 1 : vector<49x32xf32>, vector<49x32xf32> -> vector<49x64xf32>
    %cst_4 = arith.constant dense<0.000000e+00> : vector<1x64xf32>
    %9 = tpu.matmul %4, %8, %cst_4 {dimension_numbers = #tpu.dot_dimension_numbers<[1], [0], [0], [1], [0, 0, 1, 1], [], []>} : vector<1x49xf32>, vector<49x64xf32>, vector<1x64xf32> -> vector<1x64xf32>
    %10 = arith.addf %5, %9 : vector<1x64xf32>
    %c0_5 = arith.constant 0 : index
    %c0_6 = arith.constant 0 : index
    %11 = vector.load %arg2[%c0_5, %c0_6] : memref<1x64xf32, #tpu.memory_space<vmem>>, vector<1x64xf32>
    %12 = arith.addf %11, %10 : vector<1x64xf32>
    %c0_7 = arith.constant 0 : index
    %c0_8 = arith.constant 0 : index
    %13 = vector.load %arg2[%c0_7, %c0_8] : memref<1x64xf32, #tpu.memory_space<vmem>>, vector<1x64xf32>
    tpu.vector_store %arg2[%c0_7, %c0_8], %12 {strides = array<i32>} : memref<1x64xf32, #tpu.memory_space<vmem>>, vector<1x64xf32>,
    %c1_i32 = arith.constant 1 : i32
    %14 = arith.cmpi eq, %arg0, %c1_i32 : i32
    %15 = arith.extui %14 : i1 to i32
    %c0_i32_9 = arith.constant 0 : i32
    %16 = arith.cmpi ne, %15, %c0_i32_9 : i32
    scf.if %16 {
      %c0_10 = arith.constant 0 : index
      %c0_11 = arith.constant 0 : index
      %17 = vector.load %arg2[%c0_10, %c0_11] : memref<1x64xf32, #tpu.memory_space<vmem>>, vector<1x64xf32>
      %18 = vector.extract_strided_slice %17 {offsets = [0, 0], sizes = [1, 32], strides = [1, 1]} : vector<1x64xf32> to vector<1x32xf32>
      %cst_12 = arith.constant 0.0102040814 : f32
      %19 = vector.broadcast %cst_12 : f32 to vector<1x32xf32>
      %20 = arith.mulf %18, %19 : vector<1x32xf32>
      %21 = vector.extract_strided_slice %17 {offsets = [0, 32], sizes = [1, 32], strides = [1, 1]} : vector<1x64xf32> to vector<1x32xf32>
      %cst_13 = arith.constant 0.0102040814 : f32
      %22 = vector.broadcast %cst_13 : f32 to vector<1x32xf32>
      %23 = arith.mulf %21, %22 : vector<1x32xf32>
      %24 = arith.mulf %20, %20 : vector<1x32xf32>
      %25 = arith.subf %23, %24 : vector<1x32xf32>
      %cst_14 = arith.constant 0.000000e+00 : f32
      %26 = vector.broadcast %cst_14 : f32 to vector<1x32xf32>
      %27 = arith.maximumf %25, %26 : vector<1x32xf32>
      %28 = tpu.concatenate %20, %27 in 1 : vector<1x32xf32>, vector<1x32xf32> -> vector<1x64xf32>
      %c0_15 = arith.constant 0 : index
      %c0_16 = arith.constant 0 : index
      %29 = vector.load %arg2[%c0_15, %c0_16] : memref<1x64xf32, #tpu.memory_space<vmem>>, vector<1x64xf32>
      tpu.vector_store %arg2[%c0_15, %c0_16], %28 {strides = array<i32>} : memref<1x64xf32, #tpu.memory_space<vmem>>, vector<1x64xf32>,
    } else {
    }
    return
  }
  func.func @transform_0(%arg0: i32) -> (i32, i32, i32) {
    %c0_i32 = arith.constant 0 : i32
    %c0_i32_0 = arith.constant 0 : i32
    %c0_i32_1 = arith.constant 0 : i32
    return %arg0, %c0_i32, %c0_i32_0 : i32, i32, i32
  }
  func.func @transform_1(%arg0: i32) -> (i32, i32) {
    %c0_i32 = arith.constant 0 : i32
    %c0_i32_0 = arith.constant 0 : i32
    %c0_i32_1 = arith.constant 0 : i32
    return %c0_i32, %c0_i32_0 : i32, i32
  }
}

module attributes {stable_mosaic.version = 11 : i64} {
  func.func @_block_kernel(%arg0: i32, %arg1: memref<1x64xf32, #tpu.memory_space<vmem>>, %arg2: memref<1x32xf32, #tpu.memory_space<vmem>>, %arg3: memref<1x32xf32, #tpu.memory_space<vmem>>, %arg4: memref<288x32xbf16, #tpu.memory_space<vmem>>, %arg5: memref<1x32xf32, #tpu.memory_space<vmem>>, %arg6: memref<49x2xbf16, #tpu.memory_space<vmem>>, %arg7: memref<9x33xf32, #tpu.memory_space<vmem>>, %arg8: memref<1x49x32xf32, #tpu.memory_space<vmem>>, %arg9: memref<1x9x32xf32, #tpu.memory_space<vmem>>) attributes {dimension_semantics = [#tpu.dimension_semantics<parallel>], iteration_bounds = array<i64: 2>, scalar_prefetch = 0 : i64, scratch_operands = 0 : i64, tpu.core_type = #tpu.core_type<tc>, window_params = [{pipeline_mode = #tpu.pipeline_mode<synchronous>, transform_indices = @transform_0, window_bounds = array<i64: 1, 64>}, {pipeline_mode = #tpu.pipeline_mode<synchronous>, transform_indices = @transform_1, window_bounds = array<i64: 1, 32>}, {pipeline_mode = #tpu.pipeline_mode<synchronous>, transform_indices = @transform_2, window_bounds = array<i64: 1, 32>}, {pipeline_mode = #tpu.pipeline_mode<synchronous>, transform_indices = @transform_3, window_bounds = array<i64: 288, 32>}, {pipeline_mode = #tpu.pipeline_mode<synchronous>, transform_indices = @transform_4, window_bounds = array<i64: 1, 32>}, {pipeline_mode = #tpu.pipeline_mode<synchronous>, transform_indices = @transform_5, window_bounds = array<i64: 49, 2>}, {pipeline_mode = #tpu.pipeline_mode<synchronous>, transform_indices = @transform_6, window_bounds = array<i64: 9, 33>}, {transform_indices = @transform_7, window_bounds = array<i64: 1, 49, 32>}, {transform_indices = @transform_8, window_bounds = array<i64: 1, 9, 32>}]} {
    %c0 = arith.constant 0 : index
    %c0_0 = arith.constant 0 : index
    %0 = vector.load %arg1[%c0, %c0_0] : memref<1x64xf32, #tpu.memory_space<vmem>>, vector<1x32xf32>
    %c0_1 = arith.constant 0 : index
    %c32 = arith.constant 32 : index
    %1 = vector.load %arg1[%c0_1, %c32] : memref<1x64xf32, #tpu.memory_space<vmem>>, vector<1x32xf32>
    %c0_2 = arith.constant 0 : index
    %c0_3 = arith.constant 0 : index
    %2 = vector.load %arg2[%c0_2, %c0_3] : memref<1x32xf32, #tpu.memory_space<vmem>>, vector<1x32xf32>
    %cst = arith.constant 9.99999974E-6 : f32
    %3 = vector.broadcast %cst : f32 to vector<1x32xf32>
    %4 = arith.addf %1, %3 : vector<1x32xf32>
    %5 = math.rsqrt %4 : vector<1x32xf32>
    %6 = arith.mulf %2, %5 : vector<1x32xf32>
    %c0_4 = arith.constant 0 : index
    %c0_5 = arith.constant 0 : index
    %7 = vector.load %arg3[%c0_4, %c0_5] : memref<1x32xf32, #tpu.memory_space<vmem>>, vector<1x32xf32>
    %8 = arith.mulf %0, %6 : vector<1x32xf32>
    %9 = arith.subf %7, %8 : vector<1x32xf32>
    %cst_6 = arith.constant 0.000000e+00 : bf16
    %10 = vector.broadcast %cst_6 : bf16 to vector<15x32xbf16>
    %cst_7 = arith.constant 0.000000e+00 : bf16
    %11 = vector.broadcast %cst_7 : bf16 to vector<8x32xbf16>
    %c0_8 = arith.constant 0 : index
    %c0_9 = arith.constant 0 : index
    %c0_10 = arith.constant 0 : index
    %12 = vector.load %arg8[%c0_8, %c0_9, %c0_10] : memref<1x49x32xf32, #tpu.memory_space<vmem>>, vector<1x49x32xf32>
    %13 = vector.shape_cast %12 : vector<1x49x32xf32> to vector<49x32xf32>
    %14 = vector.broadcast %6 : vector<1x32xf32> to vector<49x32xf32>
    %15 = arith.mulf %13, %14 : vector<49x32xf32>
    %16 = vector.broadcast %9 : vector<1x32xf32> to vector<49x32xf32>
    %17 = arith.addf %15, %16 : vector<49x32xf32>
    %cst_11 = arith.constant 0.000000e+00 : f32
    %18 = vector.broadcast %cst_11 : f32 to vector<49x32xf32>
    %19 = arith.maximumf %17, %18 : vector<49x32xf32>
    %20 = arith.truncf %19 : vector<49x32xf32> to vector<49x32xbf16>
    %21 = tpu.concatenate %11, %20, %10 in 0 : vector<8x32xbf16>, vector<49x32xbf16>, vector<15x32xbf16> -> vector<72x32xbf16>
    %c0_12 = arith.constant 0 : index
    %c0_13 = arith.constant 0 : index
    %22 = vector.load %arg6[%c0_12, %c0_13] : memref<49x2xbf16, #tpu.memory_space<vmem>>, vector<49x2xbf16>
    %23 = vector.extract_strided_slice %22 {offsets = [0, 0], sizes = [49, 1], strides = [1, 1]} : vector<49x2xbf16> to vector<49x1xbf16>
    %24 = vector.extract_strided_slice %22 {offsets = [0, 1], sizes = [49, 1], strides = [1, 1]} : vector<49x2xbf16> to vector<49x1xbf16>
    %25 = vector.extract_strided_slice %21 {offsets = [0, 0], sizes = [49, 32], strides = [1, 1]} : vector<72x32xbf16> to vector<49x32xbf16>
    %26 = vector.broadcast %23 : vector<49x1xbf16> to vector<49x32xbf16>
    %27 = arith.mulf %25, %26 : vector<49x32xbf16>
    %28 = vector.extract_strided_slice %21 {offsets = [1, 0], sizes = [49, 32], strides = [1, 1]} : vector<72x32xbf16> to vector<49x32xbf16>
    %29 = vector.extract_strided_slice %21 {offsets = [2, 0], sizes = [49, 32], strides = [1, 1]} : vector<72x32xbf16> to vector<49x32xbf16>
    %30 = vector.broadcast %24 : vector<49x1xbf16> to vector<49x32xbf16>
    %31 = arith.mulf %29, %30 : vector<49x32xbf16>
    %32 = vector.extract_strided_slice %21 {offsets = [7, 0], sizes = [49, 32], strides = [1, 1]} : vector<72x32xbf16> to vector<49x32xbf16>
    %33 = vector.broadcast %23 : vector<49x1xbf16> to vector<49x32xbf16>
    %34 = arith.mulf %32, %33 : vector<49x32xbf16>
    %35 = vector.extract_strided_slice %21 {offsets = [8, 0], sizes = [49, 32], strides = [1, 1]} : vector<72x32xbf16> to vector<49x32xbf16>
    %36 = vector.extract_strided_slice %21 {offsets = [9, 0], sizes = [49, 32], strides = [1, 1]} : vector<72x32xbf16> to vector<49x32xbf16>
    %37 = vector.broadcast %24 : vector<49x1xbf16> to vector<49x32xbf16>
    %38 = arith.mulf %36, %37 : vector<49x32xbf16>
    %39 = vector.extract_strided_slice %21 {offsets = [14, 0], sizes = [49, 32], strides = [1, 1]} : vector<72x32xbf16> to vector<49x32xbf16>
    %40 = vector.broadcast %23 : vector<49x1xbf16> to vector<49x32xbf16>
    %41 = arith.mulf %39, %40 : vector<49x32xbf16>
    %42 = vector.extract_strided_slice %21 {offsets = [15, 0], sizes = [49, 32], strides = [1, 1]} : vector<72x32xbf16> to vector<49x32xbf16>
    %43 = vector.extract_strided_slice %21 {offsets = [16, 0], sizes = [49, 32], strides = [1, 1]} : vector<72x32xbf16> to vector<49x32xbf16>
    %44 = vector.broadcast %24 : vector<49x1xbf16> to vector<49x32xbf16>
    %45 = arith.mulf %43, %44 : vector<49x32xbf16>
    %46 = tpu.concatenate %27, %28, %31, %34, %35, %38, %41, %42, %45 in 1 : vector<49x32xbf16>, vector<49x32xbf16>, vector<49x32xbf16>, vector<49x32xbf16>, vector<49x32xbf16>, vector<49x32xbf16>, vector<49x32xbf16>, vector<49x32xbf16>, vector<49x32xbf16> -> vector<49x288xbf16>
    %c0_14 = arith.constant 0 : index
    %c0_15 = arith.constant 0 : index
    %47 = vector.load %arg4[%c0_14, %c0_15] : memref<288x32xbf16, #tpu.memory_space<vmem>>, vector<288x32xbf16>
    %cst_16 = arith.constant dense<0.000000e+00> : vector<49x32xf32>
    %48 = tpu.matmul %46, %47, %cst_16 {dimension_numbers = #tpu.dot_dimension_numbers<[1], [0], [0], [1], [0, 0, 1, 1], [], []>} : vector<49x288xbf16>, vector<288x32xbf16>, vector<49x32xf32> -> vector<49x32xf32>
    %c0_17 = arith.constant 0 : index
    %c0_18 = arith.constant 0 : index
    %49 = vector.load %arg5[%c0_17, %c0_18] : memref<1x32xf32, #tpu.memory_space<vmem>>, vector<1x32xf32>
    %50 = vector.broadcast %49 : vector<1x32xf32> to vector<49x32xf32>
    %51 = arith.addf %48, %50 : vector<49x32xf32>
    %52 = vector.extract_strided_slice %51 {offsets = [0, 0], sizes = [47, 32], strides = [1, 1]} : vector<49x32xf32> to vector<47x32xf32>
    %53 = vector.extract_strided_slice %51 {offsets = [1, 0], sizes = [47, 32], strides = [1, 1]} : vector<49x32xf32> to vector<47x32xf32>
    %54 = arith.maximumf %52, %53 : vector<47x32xf32>
    %55 = vector.extract_strided_slice %51 {offsets = [2, 0], sizes = [47, 32], strides = [1, 1]} : vector<49x32xf32> to vector<47x32xf32>
    %56 = arith.maximumf %54, %55 : vector<47x32xf32>
    %57 = vector.extract_strided_slice %56 {offsets = [0, 0], sizes = [33, 32], strides = [1, 1]} : vector<47x32xf32> to vector<33x32xf32>
    %58 = vector.extract_strided_slice %56 {offsets = [7, 0], sizes = [33, 32], strides = [1, 1]} : vector<47x32xf32> to vector<33x32xf32>
    %59 = arith.maximumf %57, %58 : vector<33x32xf32>
    %60 = vector.extract_strided_slice %56 {offsets = [14, 0], sizes = [33, 32], strides = [1, 1]} : vector<47x32xf32> to vector<33x32xf32>
    %61 = arith.maximumf %59, %60 : vector<33x32xf32>
    %c0_19 = arith.constant 0 : index
    %c0_20 = arith.constant 0 : index
    %62 = vector.load %arg7[%c0_19, %c0_20] : memref<9x33xf32, #tpu.memory_space<vmem>>, vector<9x33xf32>
    %cst_21 = arith.constant dense<0.000000e+00> : vector<9x32xf32>
    %63 = tpu.matmul %62, %61, %cst_21 {dimension_numbers = #tpu.dot_dimension_numbers<[1], [0], [0], [1], [0, 0, 1, 1], [], []>} : vector<9x33xf32>, vector<33x32xf32>, vector<9x32xf32> -> vector<9x32xf32>
    %c0_22 = arith.constant 0 : index
    %c0_23 = arith.constant 0 : index
    %c0_24 = arith.constant 0 : index
    %64 = vector.load %arg9[%c0_22, %c0_23, %c0_24] : memref<1x9x32xf32, #tpu.memory_space<vmem>>, vector<1x9x32xf32>
    %65 = vector.shape_cast %64 : vector<1x9x32xf32> to vector<9x32xf32>
    %66 = vector.shape_cast %63 : vector<9x32xf32> to vector<1x9x32xf32>
    tpu.vector_store %arg9[%c0_22, %c0_23, %c0_24], %66 {strides = array<i32>} : memref<1x9x32xf32, #tpu.memory_space<vmem>>, vector<1x9x32xf32>,
    return
  }
  func.func @transform_0(%arg0: i32) -> (i32, i32) {
    %c0_i32 = arith.constant 0 : i32
    %c0_i32_0 = arith.constant 0 : i32
    %c0_i32_1 = arith.constant 0 : i32
    return %c0_i32, %c0_i32_0 : i32, i32
  }
  func.func @transform_1(%arg0: i32) -> (i32, i32) {
    %c0_i32 = arith.constant 0 : i32
    %c0_i32_0 = arith.constant 0 : i32
    %c0_i32_1 = arith.constant 0 : i32
    return %c0_i32, %c0_i32_0 : i32, i32
  }
  func.func @transform_2(%arg0: i32) -> (i32, i32) {
    %c0_i32 = arith.constant 0 : i32
    %c0_i32_0 = arith.constant 0 : i32
    %c0_i32_1 = arith.constant 0 : i32
    return %c0_i32, %c0_i32_0 : i32, i32
  }
  func.func @transform_3(%arg0: i32) -> (i32, i32) {
    %c0_i32 = arith.constant 0 : i32
    %c0_i32_0 = arith.constant 0 : i32
    %c0_i32_1 = arith.constant 0 : i32
    return %c0_i32, %c0_i32_0 : i32, i32
  }
  func.func @transform_4(%arg0: i32) -> (i32, i32) {
    %c0_i32 = arith.constant 0 : i32
    %c0_i32_0 = arith.constant 0 : i32
    %c0_i32_1 = arith.constant 0 : i32
    return %c0_i32, %c0_i32_0 : i32, i32
  }
  func.func @transform_5(%arg0: i32) -> (i32, i32) {
    %c0_i32 = arith.constant 0 : i32
    %c0_i32_0 = arith.constant 0 : i32
    %c0_i32_1 = arith.constant 0 : i32
    return %c0_i32, %c0_i32_0 : i32, i32
  }
  func.func @transform_6(%arg0: i32) -> (i32, i32) {
    %c0_i32 = arith.constant 0 : i32
    %c0_i32_0 = arith.constant 0 : i32
    %c0_i32_1 = arith.constant 0 : i32
    return %c0_i32, %c0_i32_0 : i32, i32
  }
  func.func @transform_7(%arg0: i32) -> (i32, i32, i32) {
    %c0_i32 = arith.constant 0 : i32
    %c0_i32_0 = arith.constant 0 : i32
    %c0_i32_1 = arith.constant 0 : i32
    return %arg0, %c0_i32, %c0_i32_0 : i32, i32, i32
  }
  func.func @transform_8(%arg0: i32) -> (i32, i32, i32) {
    %c0_i32 = arith.constant 0 : i32
    %c0_i32_0 = arith.constant 0 : i32
    %c0_i32_1 = arith.constant 0 : i32
    return %arg0, %c0_i32, %c0_i32_0 : i32, i32, i32
  }
}

module attributes {stable_mosaic.version = 11 : i64} {
  func.func @_block_kernel(%arg0: i32, %arg1: memref<1x64xf32, #tpu.memory_space<vmem>>, %arg2: memref<1x32xf32, #tpu.memory_space<vmem>>, %arg3: memref<1x32xf32, #tpu.memory_space<vmem>>, %arg4: memref<288x32xbf16, #tpu.memory_space<vmem>>, %arg5: memref<1x32xf32, #tpu.memory_space<vmem>>, %arg6: memref<9x2xbf16, #tpu.memory_space<vmem>>, %arg7: memref<1x1xf32, #tpu.memory_space<vmem>>, %arg8: memref<1x9x32xf32, #tpu.memory_space<vmem>>, %arg9: memref<1x1x32xf32, #tpu.memory_space<vmem>>) attributes {dimension_semantics = [#tpu.dimension_semantics<parallel>], iteration_bounds = array<i64: 2>, scalar_prefetch = 0 : i64, scratch_operands = 0 : i64, tpu.core_type = #tpu.core_type<tc>, window_params = [{pipeline_mode = #tpu.pipeline_mode<synchronous>, transform_indices = @transform_0, window_bounds = array<i64: 1, 64>}, {pipeline_mode = #tpu.pipeline_mode<synchronous>, transform_indices = @transform_1, window_bounds = array<i64: 1, 32>}, {pipeline_mode = #tpu.pipeline_mode<synchronous>, transform_indices = @transform_2, window_bounds = array<i64: 1, 32>}, {pipeline_mode = #tpu.pipeline_mode<synchronous>, transform_indices = @transform_3, window_bounds = array<i64: 288, 32>}, {pipeline_mode = #tpu.pipeline_mode<synchronous>, transform_indices = @transform_4, window_bounds = array<i64: 1, 32>}, {pipeline_mode = #tpu.pipeline_mode<synchronous>, transform_indices = @transform_5, window_bounds = array<i64: 9, 2>}, {pipeline_mode = #tpu.pipeline_mode<synchronous>, transform_indices = @transform_6, window_bounds = array<i64: 1, 1>}, {transform_indices = @transform_7, window_bounds = array<i64: 1, 9, 32>}, {transform_indices = @transform_8, window_bounds = array<i64: 1, 1, 32>}]} {
    %c0 = arith.constant 0 : index
    %c0_0 = arith.constant 0 : index
    %0 = vector.load %arg1[%c0, %c0_0] : memref<1x64xf32, #tpu.memory_space<vmem>>, vector<1x32xf32>
    %c0_1 = arith.constant 0 : index
    %c32 = arith.constant 32 : index
    %1 = vector.load %arg1[%c0_1, %c32] : memref<1x64xf32, #tpu.memory_space<vmem>>, vector<1x32xf32>
    %c0_2 = arith.constant 0 : index
    %c0_3 = arith.constant 0 : index
    %2 = vector.load %arg2[%c0_2, %c0_3] : memref<1x32xf32, #tpu.memory_space<vmem>>, vector<1x32xf32>
    %cst = arith.constant 9.99999974E-6 : f32
    %3 = vector.broadcast %cst : f32 to vector<1x32xf32>
    %4 = arith.addf %1, %3 : vector<1x32xf32>
    %5 = math.rsqrt %4 : vector<1x32xf32>
    %6 = arith.mulf %2, %5 : vector<1x32xf32>
    %c0_4 = arith.constant 0 : index
    %c0_5 = arith.constant 0 : index
    %7 = vector.load %arg3[%c0_4, %c0_5] : memref<1x32xf32, #tpu.memory_space<vmem>>, vector<1x32xf32>
    %8 = arith.mulf %0, %6 : vector<1x32xf32>
    %9 = arith.subf %7, %8 : vector<1x32xf32>
    %cst_6 = arith.constant 0.000000e+00 : bf16
    %10 = vector.broadcast %cst_6 : bf16 to vector<7x32xbf16>
    %cst_7 = arith.constant 0.000000e+00 : bf16
    %11 = vector.broadcast %cst_7 : bf16 to vector<8x32xbf16>
    %c0_8 = arith.constant 0 : index
    %c0_9 = arith.constant 0 : index
    %c0_10 = arith.constant 0 : index
    %12 = vector.load %arg8[%c0_8, %c0_9, %c0_10] : memref<1x9x32xf32, #tpu.memory_space<vmem>>, vector<1x9x32xf32>
    %13 = vector.shape_cast %12 : vector<1x9x32xf32> to vector<9x32xf32>
    %14 = vector.broadcast %6 : vector<1x32xf32> to vector<9x32xf32>
    %15 = arith.mulf %13, %14 : vector<9x32xf32>
    %16 = vector.broadcast %9 : vector<1x32xf32> to vector<9x32xf32>
    %17 = arith.addf %15, %16 : vector<9x32xf32>
    %cst_11 = arith.constant 0.000000e+00 : f32
    %18 = vector.broadcast %cst_11 : f32 to vector<9x32xf32>
    %19 = arith.maximumf %17, %18 : vector<9x32xf32>
    %20 = arith.truncf %19 : vector<9x32xf32> to vector<9x32xbf16>
    %21 = tpu.concatenate %11, %20, %10 in 0 : vector<8x32xbf16>, vector<9x32xbf16>, vector<7x32xbf16> -> vector<24x32xbf16>
    %c0_12 = arith.constant 0 : index
    %c0_13 = arith.constant 0 : index
    %22 = vector.load %arg6[%c0_12, %c0_13] : memref<9x2xbf16, #tpu.memory_space<vmem>>, vector<9x2xbf16>
    %23 = vector.extract_strided_slice %22 {offsets = [0, 0], sizes = [9, 1], strides = [1, 1]} : vector<9x2xbf16> to vector<9x1xbf16>
    %24 = vector.extract_strided_slice %22 {offsets = [0, 1], sizes = [9, 1], strides = [1, 1]} : vector<9x2xbf16> to vector<9x1xbf16>
    %25 = vector.extract_strided_slice %21 {offsets = [4, 0], sizes = [9, 32], strides = [1, 1]} : vector<24x32xbf16> to vector<9x32xbf16>
    %26 = vector.broadcast %23 : vector<9x1xbf16> to vector<9x32xbf16>
    %27 = arith.mulf %25, %26 : vector<9x32xbf16>
    %28 = vector.extract_strided_slice %21 {offsets = [5, 0], sizes = [9, 32], strides = [1, 1]} : vector<24x32xbf16> to vector<9x32xbf16>
    %29 = vector.extract_strided_slice %21 {offsets = [6, 0], sizes = [9, 32], strides = [1, 1]} : vector<24x32xbf16> to vector<9x32xbf16>
    %30 = vector.broadcast %24 : vector<9x1xbf16> to vector<9x32xbf16>
    %31 = arith.mulf %29, %30 : vector<9x32xbf16>
    %32 = vector.extract_strided_slice %21 {offsets = [7, 0], sizes = [9, 32], strides = [1, 1]} : vector<24x32xbf16> to vector<9x32xbf16>
    %33 = vector.broadcast %23 : vector<9x1xbf16> to vector<9x32xbf16>
    %34 = arith.mulf %32, %33 : vector<9x32xbf16>
    %35 = vector.extract_strided_slice %21 {offsets = [8, 0], sizes = [9, 32], strides = [1, 1]} : vector<24x32xbf16> to vector<9x32xbf16>
    %36 = vector.extract_strided_slice %21 {offsets = [9, 0], sizes = [9, 32], strides = [1, 1]} : vector<24x32xbf16> to vector<9x32xbf16>
    %37 = vector.broadcast %24 : vector<9x1xbf16> to vector<9x32xbf16>
    %38 = arith.mulf %36, %37 : vector<9x32xbf16>
    %39 = vector.extract_strided_slice %21 {offsets = [10, 0], sizes = [9, 32], strides = [1, 1]} : vector<24x32xbf16> to vector<9x32xbf16>
    %40 = vector.broadcast %23 : vector<9x1xbf16> to vector<9x32xbf16>
    %41 = arith.mulf %39, %40 : vector<9x32xbf16>
    %42 = vector.extract_strided_slice %21 {offsets = [11, 0], sizes = [9, 32], strides = [1, 1]} : vector<24x32xbf16> to vector<9x32xbf16>
    %43 = vector.extract_strided_slice %21 {offsets = [12, 0], sizes = [9, 32], strides = [1, 1]} : vector<24x32xbf16> to vector<9x32xbf16>
    %44 = vector.broadcast %24 : vector<9x1xbf16> to vector<9x32xbf16>
    %45 = arith.mulf %43, %44 : vector<9x32xbf16>
    %46 = tpu.concatenate %27, %28, %31, %34, %35, %38, %41, %42, %45 in 1 : vector<9x32xbf16>, vector<9x32xbf16>, vector<9x32xbf16>, vector<9x32xbf16>, vector<9x32xbf16>, vector<9x32xbf16>, vector<9x32xbf16>, vector<9x32xbf16>, vector<9x32xbf16> -> vector<9x288xbf16>
    %c0_14 = arith.constant 0 : index
    %c0_15 = arith.constant 0 : index
    %47 = vector.load %arg4[%c0_14, %c0_15] : memref<288x32xbf16, #tpu.memory_space<vmem>>, vector<288x32xbf16>
    %cst_16 = arith.constant dense<0.000000e+00> : vector<9x32xf32>
    %48 = tpu.matmul %46, %47, %cst_16 {dimension_numbers = #tpu.dot_dimension_numbers<[1], [0], [0], [1], [0, 0, 1, 1], [], []>} : vector<9x288xbf16>, vector<288x32xbf16>, vector<9x32xf32> -> vector<9x32xf32>
    %c0_17 = arith.constant 0 : index
    %c0_18 = arith.constant 0 : index
    %49 = vector.load %arg5[%c0_17, %c0_18] : memref<1x32xf32, #tpu.memory_space<vmem>>, vector<1x32xf32>
    %50 = vector.broadcast %49 : vector<1x32xf32> to vector<9x32xf32>
    %51 = arith.addf %48, %50 : vector<9x32xf32>
    %52 = vector.extract_strided_slice %51 {offsets = [0, 0], sizes = [7, 32], strides = [1, 1]} : vector<9x32xf32> to vector<7x32xf32>
    %53 = vector.extract_strided_slice %51 {offsets = [1, 0], sizes = [7, 32], strides = [1, 1]} : vector<9x32xf32> to vector<7x32xf32>
    %54 = arith.maximumf %52, %53 : vector<7x32xf32>
    %55 = vector.extract_strided_slice %51 {offsets = [2, 0], sizes = [7, 32], strides = [1, 1]} : vector<9x32xf32> to vector<7x32xf32>
    %56 = arith.maximumf %54, %55 : vector<7x32xf32>
    %57 = vector.extract_strided_slice %56 {offsets = [0, 0], sizes = [1, 32], strides = [1, 1]} : vector<7x32xf32> to vector<1x32xf32>
    %58 = vector.extract_strided_slice %56 {offsets = [3, 0], sizes = [1, 32], strides = [1, 1]} : vector<7x32xf32> to vector<1x32xf32>
    %59 = arith.maximumf %57, %58 : vector<1x32xf32>
    %60 = vector.extract_strided_slice %56 {offsets = [6, 0], sizes = [1, 32], strides = [1, 1]} : vector<7x32xf32> to vector<1x32xf32>
    %61 = arith.maximumf %59, %60 : vector<1x32xf32>
    %cst_19 = arith.constant dense<0.000000e+00> : vector<32xf32>
    %62 = vector.multi_reduction <add>, %61, %cst_19 [0] : vector<1x32xf32> to vector<32xf32>
    %63 = vector.shape_cast %62 : vector<32xf32> to vector<1x32xf32>
    %cst_20 = arith.constant 1.000000e+00 : f32
    %64 = vector.broadcast %cst_20 : f32 to vector<1x32xf32>
    %65 = arith.divf %63, %64 : vector<1x32xf32>
    %c0_21 = arith.constant 0 : index
    %c0_22 = arith.constant 0 : index
    %c0_23 = arith.constant 0 : index
    %66 = vector.load %arg9[%c0_21, %c0_22, %c0_23] : memref<1x1x32xf32, #tpu.memory_space<vmem>>, vector<1x1x32xf32>
    %67 = vector.shape_cast %66 : vector<1x1x32xf32> to vector<1x32xf32>
    %68 = vector.shape_cast %65 : vector<1x32xf32> to vector<1x1x32xf32>
    tpu.vector_store %arg9[%c0_21, %c0_22, %c0_23], %68 {strides = array<i32>} : memref<1x1x32xf32, #tpu.memory_space<vmem>>, vector<1x1x32xf32>,
    return
  }
  func.func @transform_0(%arg0: i32) -> (i32, i32) {
    %c0_i32 = arith.constant 0 : i32
    %c0_i32_0 = arith.constant 0 : i32
    %c0_i32_1 = arith.constant 0 : i32
    return %c0_i32, %c0_i32_0 : i32, i32
  }
  func.func @transform_1(%arg0: i32) -> (i32, i32) {
    %c0_i32 = arith.constant 0 : i32
    %c0_i32_0 = arith.constant 0 : i32
    %c0_i32_1 = arith.constant 0 : i32
    return %c0_i32, %c0_i32_0 : i32, i32
  }
  func.func @transform_2(%arg0: i32) -> (i32, i32) {
    %c0_i32 = arith.constant 0 : i32
    %c0_i32_0 = arith.constant 0 : i32
    %c0_i32_1 = arith.constant 0 : i32
    return %c0_i32, %c0_i32_0 : i32, i32
  }
  func.func @transform_3(%arg0: i32) -> (i32, i32) {
    %c0_i32 = arith.constant 0 : i32
    %c0_i32_0 = arith.constant 0 : i32
    %c0_i32_1 = arith.constant 0 : i32
    return %c0_i32, %c0_i32_0 : i32, i32
  }
  func.func @transform_4(%arg0: i32) -> (i32, i32) {
    %c0_i32 = arith.constant 0 : i32
    %c0_i32_0 = arith.constant 0 : i32
    %c0_i32_1 = arith.constant 0 : i32
    return %c0_i32, %c0_i32_0 : i32, i32
  }
  func.func @transform_5(%arg0: i32) -> (i32, i32) {
    %c0_i32 = arith.constant 0 : i32
    %c0_i32_0 = arith.constant 0 : i32
    %c0_i32_1 = arith.constant 0 : i32
    return %c0_i32, %c0_i32_0 : i32, i32
  }
  func.func @transform_6(%arg0: i32) -> (i32, i32) {
    %c0_i32 = arith.constant 0 : i32
    %c0_i32_0 = arith.constant 0 : i32
    %c0_i32_1 = arith.constant 0 : i32
    return %c0_i32, %c0_i32_0 : i32, i32
  }
  func.func @transform_7(%arg0: i32) -> (i32, i32, i32) {
    %c0_i32 = arith.constant 0 : i32
    %c0_i32_0 = arith.constant 0 : i32
    %c0_i32_1 = arith.constant 0 : i32
    return %arg0, %c0_i32, %c0_i32_0 : i32, i32, i32
  }
  func.func @transform_8(%arg0: i32) -> (i32, i32, i32) {
    %c0_i32 = arith.constant 0 : i32
    %c0_i32_0 = arith.constant 0 : i32
    %c0_i32_1 = arith.constant 0 : i32
    return %arg0, %c0_i32, %c0_i32_0 : i32, i32, i32
  }
}

module attributes {stable_mosaic.version = 11 : i64} {
  func.func @_bn_stats_kernel(%arg0: i32, %arg1: memref<1x9x32xf32, #tpu.memory_space<vmem>>, %arg2: memref<1x64xf32, #tpu.memory_space<vmem>>) attributes {dimension_semantics = [#tpu.dimension_semantics<arbitrary>], iteration_bounds = array<i64: 2>, scalar_prefetch = 0 : i64, scratch_operands = 0 : i64, tpu.core_type = #tpu.core_type<tc>, window_params = [{transform_indices = @transform_0, window_bounds = array<i64: 1, 9, 32>}, {pipeline_mode = #tpu.pipeline_mode<synchronous>, transform_indices = @transform_1, window_bounds = array<i64: 1, 64>}]} {
    %c0_i32 = arith.constant 0 : i32
    %0 = arith.cmpi eq, %arg0, %c0_i32 : i32
    %1 = arith.extui %0 : i1 to i32
    %c0_i32_0 = arith.constant 0 : i32
    %2 = arith.cmpi ne, %1, %c0_i32_0 : i32
    scf.if %2 {
      %cst_10 = arith.constant 0.000000e+00 : f32
      %17 = vector.broadcast %cst_10 : f32 to vector<1x64xf32>
      %c0_11 = arith.constant 0 : index
      %c0_12 = arith.constant 0 : index
      %18 = vector.load %arg2[%c0_11, %c0_12] : memref<1x64xf32, #tpu.memory_space<vmem>>, vector<1x64xf32>
      tpu.vector_store %arg2[%c0_11, %c0_12], %17 {strides = array<i32>} : memref<1x64xf32, #tpu.memory_space<vmem>>, vector<1x64xf32>,
    } else {
    }
    %c0 = arith.constant 0 : index
    %c0_1 = arith.constant 0 : index
    %c0_2 = arith.constant 0 : index
    %3 = vector.load %arg1[%c0, %c0_1, %c0_2] : memref<1x9x32xf32, #tpu.memory_space<vmem>>, vector<1x9x32xf32>
    %cst = arith.constant 1.000000e+00 : f32
    %4 = vector.broadcast %cst : f32 to vector<1x9xf32>
    %cst_3 = arith.constant 0.000000e+00 : f32
    %5 = vector.broadcast %cst_3 : f32 to vector<1x64xf32>
    %6 = vector.shape_cast %3 : vector<1x9x32xf32> to vector<9x32xf32>
    %7 = arith.mulf %6, %6 : vector<9x32xf32>
    %8 = tpu.concatenate %6, %7 in 1 : vector<9x32xf32>, vector<9x32xf32> -> vector<9x64xf32>
    %cst_4 = arith.constant dense<0.000000e+00> : vector<1x64xf32>
    %9 = tpu.matmul %4, %8, %cst_4 {dimension_numbers = #tpu.dot_dimension_numbers<[1], [0], [0], [1], [0, 0, 1, 1], [], []>} : vector<1x9xf32>, vector<9x64xf32>, vector<1x64xf32> -> vector<1x64xf32>
    %10 = arith.addf %5, %9 : vector<1x64xf32>
    %c0_5 = arith.constant 0 : index
    %c0_6 = arith.constant 0 : index
    %11 = vector.load %arg2[%c0_5, %c0_6] : memref<1x64xf32, #tpu.memory_space<vmem>>, vector<1x64xf32>
    %12 = arith.addf %11, %10 : vector<1x64xf32>
    %c0_7 = arith.constant 0 : index
    %c0_8 = arith.constant 0 : index
    %13 = vector.load %arg2[%c0_7, %c0_8] : memref<1x64xf32, #tpu.memory_space<vmem>>, vector<1x64xf32>
    tpu.vector_store %arg2[%c0_7, %c0_8], %12 {strides = array<i32>} : memref<1x64xf32, #tpu.memory_space<vmem>>, vector<1x64xf32>,
    %c1_i32 = arith.constant 1 : i32
    %14 = arith.cmpi eq, %arg0, %c1_i32 : i32
    %15 = arith.extui %14 : i1 to i32
    %c0_i32_9 = arith.constant 0 : i32
    %16 = arith.cmpi ne, %15, %c0_i32_9 : i32
    scf.if %16 {
      %c0_10 = arith.constant 0 : index
      %c0_11 = arith.constant 0 : index
      %17 = vector.load %arg2[%c0_10, %c0_11] : memref<1x64xf32, #tpu.memory_space<vmem>>, vector<1x64xf32>
      %18 = vector.extract_strided_slice %17 {offsets = [0, 0], sizes = [1, 32], strides = [1, 1]} : vector<1x64xf32> to vector<1x32xf32>
      %cst_12 = arith.constant 0.055555556 : f32
      %19 = vector.broadcast %cst_12 : f32 to vector<1x32xf32>
      %20 = arith.mulf %18, %19 : vector<1x32xf32>
      %21 = vector.extract_strided_slice %17 {offsets = [0, 32], sizes = [1, 32], strides = [1, 1]} : vector<1x64xf32> to vector<1x32xf32>
      %cst_13 = arith.constant 0.055555556 : f32
      %22 = vector.broadcast %cst_13 : f32 to vector<1x32xf32>
      %23 = arith.mulf %21, %22 : vector<1x32xf32>
      %24 = arith.mulf %20, %20 : vector<1x32xf32>
      %25 = arith.subf %23, %24 : vector<1x32xf32>
      %cst_14 = arith.constant 0.000000e+00 : f32
      %26 = vector.broadcast %cst_14 : f32 to vector<1x32xf32>
      %27 = arith.maximumf %25, %26 : vector<1x32xf32>
      %28 = tpu.concatenate %20, %27 in 1 : vector<1x32xf32>, vector<1x32xf32> -> vector<1x64xf32>
      %c0_15 = arith.constant 0 : index
      %c0_16 = arith.constant 0 : index
      %29 = vector.load %arg2[%c0_15, %c0_16] : memref<1x64xf32, #tpu.memory_space<vmem>>, vector<1x64xf32>
      tpu.vector_store %arg2[%c0_15, %c0_16], %28 {strides = array<i32>} : memref<1x64xf32, #tpu.memory_space<vmem>>, vector<1x64xf32>,
    } else {
    }
    return
  }
  func.func @transform_0(%arg0: i32) -> (i32, i32, i32) {
    %c0_i32 = arith.constant 0 : i32
    %c0_i32_0 = arith.constant 0 : i32
    %c0_i32_1 = arith.constant 0 : i32
    return %arg0, %c0_i32, %c0_i32_0 : i32, i32, i32
  }
  func.func @transform_1(%arg0: i32) -> (i32, i32) {
    %c0_i32 = arith.constant 0 : i32
    %c0_i32_0 = arith.constant 0 : i32
    %c0_i32_1 = arith.constant 0 : i32
    return %c0_i32, %c0_i32_0 : i32, i32
  }
}

</mosaic_0001>

<bundles_post_ra>
// kernel: simple_metric_embedding_forward.6
= control target key start
LH: loop header
LB: loop body
LE: loop exit
PB: predicated region body
PF: predicated region fallthrough
CT: control target
= control target key end

     0   :  { %s642_s6 = smov 0   ;;  %s922_s0 = inlined_call_operand.vmem [shape: f32[2,256,4], index: 0, kind: input, shape index: {}]   ;;  %s923_s1 = inlined_call_operand.vmem [shape: f32[1,8], index: 1, kind: output, shape index: {}]  }
   0x1 LB: > { %s648_s7 = sadd.s32 4294967295, %s626_s6   ;;  %p453_p0 = scmp.ge.s32.totalorder %s626_s6, 1  ;;  %s626_s6 = sphi %s642_s6, %s11_s6  }
   0x2   : > { %p82_p1 = scmp.lt.s32.totalorder %s626_s6, 3 }
   0x4   : > { %p83_p2 = pnand %p453_p0, %p82_p1 }
   0x5   : > { %p97_p3 = scmp.lt.s32.totalorder (!%p83_p2), %s648_s7, 1  ;;  %p456_p4 = scmp.ne.s32.totalorder (!%p83_p2), %s648_s7, 0 }
   0x6   : > { %86 = sbr.rel (%p83_p2) target bundleno = 531 (0x213), region = 24 }
   0xd   : > { %s98_s8 = scalar_select %p97_p3, %s648_s7, 1 }
   0xe   : > { %105 = sbr.rel (%p456_p4) target bundleno = 21 (0x15), region = 28  ;;  %vm106_vm0 = vcmask (!%p456_p4), 57344   ;;  %v628_v0 = vmov (!%p456_p4), 0.0  }
   0xf   : > { %s460_s9 = sshll.u32 %s98_s8, 8  ;;  %107 = vst.msk [vmem:[%s923_s1] sm:$0x1] (!%p456_p4), %vm106_vm0, %v628_v0 }
  0x10   : > { %s657_s12 = scalar_lea.vmem %s922_s0, %s460_s9 }
  0x15 PF: > { %v664_v1 = vld [vmem:[%s657_s12 + $0x80] sm:$0xff]  ;;  %v667_v2 = vld [vmem:[%s657_s12 + $0x88] sm:$0xff]  ;;  %v670_v3 = vld [vmem:[%s657_s12 + $0x90] sm:$0xff]  ;;  %s629_s15 = smov 4   ;;  %vm300_vm1 = vcmask 31744   ;;  %vm405_vm2 = vcmask 57344  }
  0x16   : > { %v156_v4 = vmul.f32 %v664_v1, %v664_v1  ;;  %v157_v5 = vmul.f32 %v667_v2, %v667_v2  ;;  %v677_v6 = vld [vmem:[%s657_s12 + $0x98] sm:$0xff]  ;;  %v158_v7 = vmul.f32 %v670_v3, %v670_v3  ;;  %v682_v8 = vld [vmem:[%s657_s12] sm:$0xff]  ;;  %v685_v9 = vld [vmem:[%s657_s12 + $0x8] sm:$0xff]  ;;  %p457_p5 = scmp.ne.s32.totalorder %s648_s7, 1 }
  0x17   : > { %v159_v10 = vmul.f32 %v677_v6, %v677_v6  ;;  %v140_v11 = vmul.f32 %v682_v8, %v682_v8  ;;  %v141_v12 = vmul.f32 %v685_v9, %v685_v9  ;;  %v694_v13 = vld [vmem:[%s657_s12 + $0x10] sm:$0xff]  ;;  %v697_v14 = vld [vmem:[%s657_s12 + $0x18] sm:$0xff]  ;;  %v700_v15 = vld [vmem:[%s657_s12 + $0xa0] sm:$0xff]  ;;  %s631_s22 = smov (!%p457_p5), 4  }
  0x18   : > { %v540_v16 = vpack.i.bf16 %v157_v5, %v156_v4  ;;  %v142_v17 = vmul.f32 %v694_v13, %v694_v13  ;;  %v143_v18 = vmul.f32 %v697_v14, %v697_v14  ;;  %v707_v19 = vld [vmem:[%s657_s12 + $0xa8] sm:$0xff]  ;;  %v710_v20 = vld [vmem:[%s657_s12 + $0x20] sm:$0xff]  ;;  %v160_v24 = vmul.f32 %v700_v15, %v700_v15  ;;  %v726_v29 = vld [vmem:[%s657_s12 + $0xb0] sm:$0xff] }
  0x19   : > { %v713_v21 = vld [vmem:[%s657_s12 + $0x28] sm:$0xff]  ;;  %v550_v22 = vpack.i.bf16 %v159_v10, %v158_v7  ;;  %v545_v23 = vpack.i.bf16 %v141_v12, %v140_v11  ;;  %v161_v25 = vmul.f32 %v707_v19, %v707_v19  ;;  %v144_v27 = vmul.f32 %v710_v20, %v710_v20  ;;  %v729_v30 = vld [vmem:[%s657_s12 + $0xb8] sm:$0xff]  ;;  %v732_v31 = vld [vmem:[%s657_s12 + $0x30] sm:$0xff] }
  0x1a   : > { %541 = vrot.lane.b32.xlu0 %v540_v16, %s629_s15  ;;  %v555_v26 = vpack.i.bf16 %v143_v18, %v142_v17  ;;  %v145_v28 = vmul.f32 %v713_v21, %v713_v21  ;;  %v735_v32 = vld [vmem:[%s657_s12 + $0x38] sm:$0xff]  ;;  %v162_v34 = vmul.f32 %v726_v29, %v726_v29  ;;  %v163_v35 = vmul.f32 %v729_v30, %v729_v30  ;;  %v748_v39 = vld [vmem:[%s657_s12 + $0xc0] sm:$0xff]  ;;  %v751_v40 = vld [vmem:[%s657_s12 + $0xc8] sm:$0xff] }
  0x1b   : > { %551 = vrot.lane.b32.xlu1 %v550_v22, %s629_s15  ;;  %v560_v33 = vpack.i.bf16 %v161_v25, %v160_v24  ;;  %v146_v37 = vmul.f32 %v732_v31, %v732_v31  ;;  %v147_v38 = vmul.f32 %v735_v32, %v735_v32  ;;  %v754_v41 = vld [vmem:[%s657_s12 + $0x40] sm:$0xff]  ;;  %v757_v42 = vld [vmem:[%s657_s12 + $0x48] sm:$0xff]  ;;  %v164_v44 = vmul.f32 %v748_v39, %v748_v39  ;;  %v770_v49 = vld [vmem:[%s657_s12 + $0xd0] sm:$0xff] }
  0x1c   : > { %v565_v36 = vpack.i.bf16 %v145_v28, %v144_v27  ;;  %v570_v43 = vpack.i.bf16 %v163_v35, %v162_v34  ;;  %v165_v45 = vmul.f32 %v751_v40, %v751_v40  ;;  %v148_v47 = vmul.f32 %v754_v41, %v754_v41  ;;  %v773_v50 = vld [vmem:[%s657_s12 + $0xd8] sm:$0xff]  ;;  %v776_v51 = vld [vmem:[%s657_s12 + $0x50] sm:$0xff]  ;;  %v792_v59 = vld [vmem:[%s657_s12 + $0xe0] sm:$0xff] }
  0x1d   : > { %v575_v46 = vpack.i.bf16 %v147_v38, %v146_v37  ;;  %v149_v48 = vmul.f32 %v757_v42, %v757_v42  ;;  %v779_v52 = vld [vmem:[%s657_s12 + $0x58] sm:$0xff]  ;;  %v166_v54 = vmul.f32 %v770_v49, %v770_v49  ;;  %v167_v55 = vmul.f32 %v773_v50, %v773_v50  ;;  %v795_v60 = vld [vmem:[%s657_s12 + $0xe8] sm:$0xff]  ;;  %v798_v61 = vld [vmem:[%s657_s12 + $0x60] sm:$0xff] }
  0x1e   : > { %546 = vrot.lane.b32.xlu0 %v545_v23, %s629_s15  ;;  %v580_v53 = vpack.i.bf16 %v165_v45, %v164_v44  ;;  %v150_v57 = vmul.f32 %v776_v51, %v776_v51  ;;  %v151_v58 = vmul.f32 %v779_v52, %v779_v52  ;;  %v801_v62 = vld [vmem:[%s657_s12 + $0x68] sm:$0xff]  ;;  %v168_v0 = vmul.f32 %v792_v59, %v792_v59  ;;  %v814_v11 = vld [vmem:[%s657_s12 + $0xf0] sm:$0xff]  ;;  %v817_v12 = vld [vmem:[%s657_s12 + $0xf8] sm:$0xff] }
  0x1f   : > { %556 = vrot.lane.b32.xlu1 %v555_v26, %s629_s15  ;;  %v585_v56 = vpack.i.bf16 %v149_v48, %v148_v47  ;;  %v590_v63 = vpack.i.bf16 %v167_v55, %v166_v54  ;;  %v169_v4 = vmul.f32 %v795_v60, %v795_v60  ;;  %v152_v7 = vmul.f32 %v798_v61, %v798_v61  ;;  %v820_v16 = vld [vmem:[%s657_s12 + $0x70] sm:$0xff]  ;;  %v823_v17 = vld [vmem:[%s657_s12 + $0x78] sm:$0xff] }
  0x20   : > { %v595_v5 = vpack.i.bf16 %v151_v58, %v150_v57  ;;  %v153_v10 = vmul.f32 %v801_v62, %v801_v62  ;;  %v170_v22 = vmul.f32 %v814_v11, %v814_v11  ;;  %v171_v23 = vmul.f32 %v817_v12, %v817_v12 }
  0x21   : > { %v600_v18 = vpack.i.bf16 %v169_v4, %v168_v0  ;;  %v154_v25 = vmul.f32 %v820_v16, %v820_v16  ;;  %v155_v26 = vmul.f32 %v823_v17, %v823_v17 }
  0x22   : > { %561 = vrot.lane.b32.xlu0 %v560_v33, %s629_s15  ;;  %v605_v24 = vpack.i.bf16 %v153_v10, %v152_v7  ;;  %v610_v27 = vpack.i.bf16 %v171_v23, %v170_v22  ;;  %v630_v33 = vmov 1.0  }
  0x23   : > { %566 = vrot.lane.b32.xlu1 %v565_v36, %s629_s15  ;;  %v615_v28 = vpack.i.bf16 %v155_v26, %v154_v25  ;;  %397 = vmatprep.mubr.f32.mxu0 %v630_v33 }
  0x26   : > { %571 = vrot.lane.b32.xlu0 %v570_v43, %s629_s15 }
  0x27   : > { %576 = vrot.lane.b32.xlu1 %v575_v46, %s629_s15 }
  0x2a   : > { %581 = vrot.lane.b32.xlu0 %v580_v53, %s629_s15 }
  0x2b   : > { %586 = vrot.lane.b32.xlu1 %v585_v56, %s629_s15 }
  0x2e   : > { %591 = vrot.lane.b32.xlu0 %v590_v63, %s629_s15 }
  0x2f   : > { %596 = vrot.lane.b32.xlu1 %v595_v5, %s629_s15 }
  0x32   : > { %601 = vrot.lane.b32.xlu0 %v600_v18, %s629_s15 }
  0x33   : > { %606 = vrot.lane.b32.xlu1 %v605_v24, %s629_s15 }
  0x36   : > { %611 = vrot.lane.b32.xlu0 %v610_v27, %s629_s15 }
  0x37   : > { %616 = vrot.lane.b32.xlu1 %v615_v28, %s629_s15 }
  0x8c   : > { %v542_v34 = vpop.permute.xlu0 %541 }
  0x8d   : > { %v544_v35 = vunpack.i.h.bf16 %v542_v34  ;;  %v543_v36 = vunpack.i.l.bf16 %v542_v34  ;;  %v552_v37 = vpop.permute.xlu1 %551 }
  0x8e   : > { %v554_v38 = vunpack.i.h.bf16 %v552_v37  ;;  %v553_v43 = vunpack.i.l.bf16 %v552_v37 }
  0x8f   : > { %v317_v44 = vsel %vm300_vm1, %v664_v1, %v543_v36  ;;  %v318_v45 = vsel %vm300_vm1, %v667_v2, %v544_v35 }
  0x90   : > { %v547_v46 = vpop.permute.xlu0 %546  ;;  %v496_v47 = vpack.c.bf16 %v318_v45, %v317_v44  ;;  %v319_v48 = vsel %vm300_vm1, %v670_v3, %v553_v43  ;;  %v320_v53 = vsel %vm300_vm1, %v677_v6, %v554_v38 }
  0x91   : > { %v549_v54 = vunpack.i.h.bf16 %v547_v46  ;;  %v548_v55 = vunpack.i.l.bf16 %v547_v46  ;;  %v557_v56 = vpop.permute.xlu1 %556  ;;  %v500_v63 = vpack.c.bf16 %v320_v53, %v319_v48 }
  0x92   : > { %497 = vmatprep.subr.bf16.mxu0 %v496_v47  ;;  %v559_v57 = vunpack.i.h.bf16 %v557_v56  ;;  %v558_v58 = vunpack.i.l.bf16 %v557_v56 }
  0x93   : > { %v301_v1 = vsel %vm300_vm1, %v682_v8, %v548_v55  ;;  %v302_v2 = vsel %vm300_vm1, %v685_v9, %v549_v54 }
  0x94   : > { %v498_v0 = vpack.c.bf16 %v302_v2, %v301_v1  ;;  %v562_v4 = vpop.permute.xlu0 %561  ;;  %v303_v3 = vsel %vm300_vm1, %v694_v13, %v558_v58  ;;  %v304_v6 = vsel %vm300_vm1, %v697_v14, %v559_v57 }
  0x95   : > { %v564_v5 = vunpack.i.h.bf16 %v562_v4  ;;  %v563_v7 = vunpack.i.l.bf16 %v562_v4  ;;  %v567_v10 = vpop.permute.xlu1 %566  ;;  %v502_v23 = vpack.c.bf16 %v304_v6, %v303_v3 }
  0x96   : > { %499 = vmatpush3.bf16.msra.mxu0 %v498_v0  ;;  %v569_v18 = vunpack.i.h.bf16 %v567_v10  ;;  %v568_v22 = vunpack.i.l.bf16 %v567_v10 }
  0x97   : > { %501 = vmatprep.subr.bf16.mxu0 %v500_v63  ;;  %v321_v8 = vsel %vm300_vm1, %v700_v15, %v563_v7  ;;  %v322_v9 = vsel %vm300_vm1, %v707_v19, %v564_v5 }
  0x98   : > { %v572_v24 = vpop.permute.xlu0 %571  ;;  %v504_v25 = vpack.c.bf16 %v322_v9, %v321_v8  ;;  %v305_v13 = vsel %vm300_vm1, %v710_v20, %v568_v22  ;;  %v306_v14 = vsel %vm300_vm1, %v713_v21, %v569_v18 }
  0x99   : > { %v574_v26 = vunpack.i.h.bf16 %v572_v24  ;;  %v573_v27 = vunpack.i.l.bf16 %v572_v24  ;;  %v577_v28 = vpop.permute.xlu1 %576  ;;  %v506_v36 = vpack.c.bf16 %v306_v14, %v305_v13 }
  0x9a   : > { %503 = vmatpush3.bf16.msra.mxu0 %v502_v23  ;;  %v579_v34 = vunpack.i.h.bf16 %v577_v28  ;;  %v578_v35 = vunpack.i.l.bf16 %v577_v28 }
  0x9b   : > { %505 = vmatprep.subr.bf16.mxu0 %v504_v25  ;;  %v323_v15 = vsel %vm300_vm1, %v726_v29, %v573_v27  ;;  %v324_v19 = vsel %vm300_vm1, %v729_v30, %v574_v26 }
  0x9c   : > { %v582_v37 = vpop.permute.xlu0 %581  ;;  %v508_v38 = vpack.c.bf16 %v324_v19, %v323_v15  ;;  %v307_v20 = vsel %vm300_vm1, %v732_v31, %v578_v35  ;;  %v308_v21 = vsel %vm300_vm1, %v735_v32, %v579_v34 }
  0x9d   : > { %v584_v43 = vunpack.i.h.bf16 %v582_v37  ;;  %v583_v44 = vunpack.i.l.bf16 %v582_v37  ;;  %v587_v45 = vpop.permute.xlu1 %586  ;;  %v510_v48 = vpack.c.bf16 %v308_v21, %v307_v20 }
  0x9e   : > { %507 = vmatpush3.bf16.msra.mxu0 %v506_v36  ;;  %v589_v46 = vunpack.i.h.bf16 %v587_v45  ;;  %v588_v47 = vunpack.i.l.bf16 %v587_v45 }
  0x9f   : > { %509 = vmatprep.subr.bf16.mxu0 %v508_v38  ;;  %v325_v29 = vsel %vm300_vm1, %v748_v39, %v583_v44  ;;  %v326_v30 = vsel %vm300_vm1, %v751_v40, %v584_v43 }
  0xa0   : > { %v592_v53 = vpop.permute.xlu0 %591  ;;  %v512_v54 = vpack.c.bf16 %v326_v30, %v325_v29  ;;  %v309_v31 = vsel %vm300_vm1, %v754_v41, %v588_v47  ;;  %v310_v32 = vsel %vm300_vm1, %v757_v42, %v589_v46 }
  0xa1   : > { %v594_v55 = vunpack.i.h.bf16 %v592_v53  ;;  %v593_v56 = vunpack.i.l.bf16 %v592_v53  ;;  %v597_v57 = vpop.permute.xlu1 %596  ;;  %v514_v2 = vpack.c.bf16 %v310_v32, %v309_v31 }
  0xa2   : > { %511 = vmatpush3.bf16.msra.mxu0 %v510_v48  ;;  %v599_v58 = vunpack.i.h.bf16 %v597_v57  ;;  %v598_v1 = vunpack.i.l.bf16 %v597_v57 }
  0xa3   : > { %513 = vmatprep.subr.bf16.mxu0 %v512_v54  ;;  %v327_v39 = vsel %vm300_vm1, %v770_v49, %v593_v56  ;;  %v328_v40 = vsel %vm300_vm1, %v773_v50, %v594_v55 }
  0xa4   : > { %v602_v63 = vpop.permute.xlu0 %601  ;;  %v516_v0 = vpack.c.bf16 %v328_v40, %v327_v39  ;;  %v311_v41 = vsel %vm300_vm1, %v776_v51, %v598_v1  ;;  %v312_v42 = vsel %vm300_vm1, %v779_v52, %v599_v58 }
  0xa5   : > { %v604_v4 = vunpack.i.h.bf16 %v602_v63  ;;  %v603_v3 = vunpack.i.l.bf16 %v602_v63  ;;  %v607_v6 = vpop.permute.xlu1 %606  ;;  %v518_v10 = vpack.c.bf16 %v312_v42, %v311_v41 }
  0xa6   : > { %515 = vmatpush3.bf16.msra.mxu0 %v514_v2  ;;  %v609_v5 = vunpack.i.h.bf16 %v607_v6  ;;  %v608_v7 = vunpack.i.l.bf16 %v607_v6 }
  0xa7   : > { %517 = vmatprep.subr.bf16.mxu0 %v516_v0  ;;  %v329_v49 = vsel %vm300_vm1, %v792_v59, %v603_v3  ;;  %v330_v50 = vsel %vm300_vm1, %v795_v60, %v604_v4 }
  0xa8   : > { %v612_v18 = vpop.permute.xlu0 %611  ;;  %v520_v22 = vpack.c.bf16 %v330_v50, %v329_v49  ;;  %v313_v51 = vsel %vm300_vm1, %v798_v61, %v608_v7  ;;  %v314_v52 = vsel %vm300_vm1, %v801_v62, %v609_v5 }
  0xa9   : > { %v614_v23 = vunpack.i.h.bf16 %v612_v18  ;;  %v613_v8 = vunpack.i.l.bf16 %v612_v18  ;;  %v617_v9 = vpop.permute.xlu1 %616  ;;  %v522_v13 = vpack.c.bf16 %v314_v52, %v313_v51 }
  0xaa   : > { %519 = vmatpush3.bf16.msra.mxu0 %v518_v10  ;;  %v619_v24 = vunpack.i.h.bf16 %v617_v9  ;;  %v618_v25 = vunpack.i.l.bf16 %v617_v9 }
  0xab   : > { %521 = vmatprep.subr.bf16.mxu0 %v520_v22  ;;  %v331_v59 = vsel %vm300_vm1, %v814_v11, %v613_v8  ;;  %v332_v60 = vsel %vm300_vm1, %v817_v12, %v614_v23  ;;  %v403_v11 = vld [vmem:[%s923_s1] sm:$0x1] }
  0xac   : > { %v524_v14 = vpack.c.bf16 %v332_v60, %v331_v59  ;;  %v315_v61 = vsel %vm300_vm1, %v820_v16, %v618_v25  ;;  %v316_v62 = vsel %vm300_vm1, %v823_v17, %v619_v24 }
  0xad   : > { %v526_v26 = vpack.c.bf16 %v316_v62, %v315_v61 }
  0xae   : > { %523 = vmatpush3.bf16.msra.mxu0 %v522_v13 }
  0xaf   : > { %525 = vmatprep.subr.bf16.mxu0 %v524_v14 }
  0xb2   : > { %527 = vmatpush3.bf16.msra.mxu0 %v526_v26 }
  0xb5   : > { %398 = vmatmul.mubr.f32.vlgmr.msra.gmra.mrb[0].mxu0 %v630_v33 }
 0x188   : > { %v493_v27 = vpop.f32.mrb[0].mxu0  ;;  %410 = sbr.rel (%p457_p5) target bundleno = 531 (0x213), region = 32 }
 0x189   : > { %v494_v28 = vpop.f32.mrb[1].mxu0 }
 0x18a   : > { %v495_v12 = vadd.f32 %v494_v28, %v493_v27 }
 0x18c   : > { %v404_v34 = vadd.f32 %v495_v12, %v403_v11 }
 0x18e   : > { %406 = vst.msk [vmem:[%s923_s1] sm:$0x1] %vm405_vm2, %v404_v34 }
 0x195   : > { %v411_v16 = vld [vmem:[%s923_s1] sm:$0x1] }
 0x196   : > { %v412_v17 = vmul.f32 0.001953125, %v411_v16 }
 0x198   : > { %v413_v33 = vmul.f32 %v412_v17, %v412_v17 }
 0x19a   : > { %415 = vrot.lane.b32.xlu0 %v413_v33, %s631_s22 }
 0x20c   : > { %v416_v35 = vpop.permute.xlu0 %415 }
 0x20d   : > { %v418_v36 = vsub.f32 %v412_v17, %v416_v35 }
 0x20f   : > { %v419_v15 = vmax.f32 %v418_v36, 0.0 }
 0x211   : > { %v420_v19 = vsel %vm300_vm1, %v412_v17, %v419_v15 }
 0x212   : > { %421 = vst.msk [vmem:[%s923_s1] sm:$0x1] %vm405_vm2, %v420_v19 }
 0x213 PF: > { %s11_s6 = sadd.s32 1, %s626_s6  }
 0x214   : > { %p8_p6 = scmp.ge.s32.totalorder %s11_s6, 4  }
 0x216   :  { %10 = sbr.rel (!%p8_p6) target bundleno = 1 (0x1), region = 58 }

// kernel: simple_metric_embedding_forward.8
= control target key start
LH: loop header
LB: loop body
LE: loop exit
PB: predicated region body
PF: predicated region fallthrough
CT: control target
= control target key end

     0   :  { %s384_s6 = smov 0   ;;  %s427_s0 = inlined_call_operand.vmem [shape: f32[2,49,32], index: 0, kind: input, shape index: {}]   ;;  %s428_s1 = inlined_call_operand.vmem [shape: f32[1,64], index: 1, kind: output, shape index: {}]  }
   0x1 LB: > { %s390_s7 = sadd.s32 4294967295, %s365_s6   ;;  %p286_p0 = scmp.ge.s32.totalorder %s365_s6, 1  ;;  %s365_s6 = sphi %s384_s6, %s11_s6  }
   0x2   : > { %p82_p1 = scmp.lt.s32.totalorder %s365_s6, 3 }
   0x4   : > { %p83_p2 = pnand %p286_p0, %p82_p1 }
   0x5   : > { %p97_p3 = scmp.lt.s32.totalorder (!%p83_p2), %s390_s7, 1  ;;  %p288_p4 = scmp.ne.s32.totalorder (!%p83_p2), %s390_s7, 0 }
   0x6   : > { %86 = sbr.rel (%p83_p2) target bundleno = 506 (0x1fa), region = 24 }
   0xd   : > { %s98_s8 = scalar_select %p97_p3, %s390_s7, 1 }
   0xe   : > { %105 = sbr.rel (%p288_p4) target bundleno = 21 (0x15), region = 28  ;;  %vm106_vm0 = vcmask (!%p288_p4), 516096   ;;  %v367_v0 = vmov (!%p288_p4), 0.0  }
   0xf   : > { %s328_s9 = smul.u32 56, %s98_s8  ;;  %107 = vst.msk [vmem:[%s428_s1] sm:$0x1] (!%p288_p4), %vm106_vm0, %v367_v0 }
  0x11   : > { %s101_s12 = scalar_lea.vmem %s427_s0, %s328_s9 }
  0x15 PF: > { %v108_v1 = vld [vmem:[%s101_s12] sm:$0xff]  ;;  %v109_v2 = vld [vmem:[%s101_s12 + $0x8] sm:$0xff]  ;;  %v110_v3 = vld [vmem:[%s101_s12 + $0x10] sm:$0xff]  ;;  %v368_v10 = vmov 0.0|0.0   ;;  %s369_s15 = smov 32   ;;  %vm370_vm1 = vmmov 0  }
  0x16   : > { %v115_v4 = vmul.f32 %v108_v1, %v108_v1  ;;  %v116_v5 = vmul.f32 %v109_v2, %v109_v2  ;;  %v111_v6 = vld [vmem:[%s101_s12 + $0x18] sm:$0xff]  ;;  %v117_v7 = vmul.f32 %v110_v3, %v110_v3  ;;  %v112_v8 = vld [vmem:[%s101_s12 + $0x20] sm:$0xff]  ;;  %v113_v9 = vld [vmem:[%s101_s12 + $0x28] sm:$0xff]  ;;  %319 = vmatprep.subr.bf16.mxu0 %v368_v10  ;;  %v371_v19 = vmov 0.0   ;;  %p291_p5 = scmp.ne.s32.totalorder %s390_s7, 1 }
  0x17   : > { %v118_v11 = vmul.f32 %v111_v6, %v111_v6  ;;  %v119_v12 = vmul.f32 %v112_v8, %v112_v8  ;;  %v120_v13 = vmul.f32 %v113_v9, %v113_v9  ;;  %v114_v15 = vld [vmem:[%s101_s12 + $0x30] sm:$0x1]  ;;  %316 = vmatprep.mubr.msk.f32.mxu0 %vm370_vm1, %v371_v19  ;;  %vm150_vm2 = vcmask 261120   ;;  %v236_v41 = vld [vmem:[%s428_s1] sm:$0x1]  ;;  %s373_s22 = smov (!%p291_p5), 32  }
  0x18   : > { %v344_v14 = vpack.i.bf16 %v116_v5, %v115_v4  ;;  %v121_v18 = vmul.f32 %v114_v15, %v114_v15  ;;  %vm162_vm3 = vcmask 1040384   ;;  %vm158_vm4 = vcmask 400384  }
  0x19   : > { %v354_v16 = vpack.i.bf16 %v120_v13, %v119_v12  ;;  %v349_v17 = vpack.i.bf16 %v118_v11, %v117_v7  ;;  %v372_v40 = vmov 1.0   ;;  %vm238_vm5 = vcmask 516096  }
  0x1a   : > { %345 = vrot.lane.b32.xlu0 %v344_v14, %s369_s15 }
  0x1b   : > { %355 = vrot.lane.b32.xlu1 %v354_v16, %s369_s15 }
  0x1e   : > { %350 = vrot.lane.b32.xlu0 %v349_v17, %s369_s15 }
  0x1f   : > { %141 = vrot.lane.b32.xlu1 %v121_v18, %s369_s15 }
  0x8c   : > { %v346_v20 = vpop.permute.xlu0 %345 }
  0x8d   : > { %v348_v21 = vunpack.i.h.bf16 %v346_v20  ;;  %v347_v22 = vunpack.i.l.bf16 %v346_v20  ;;  %v356_v23 = vpop.permute.xlu1 %355 }
  0x8e   : > { %v358_v26 = vunpack.i.h.bf16 %v356_v23  ;;  %v357_v27 = vunpack.i.l.bf16 %v356_v23 }
  0x8f   : > { %v151_v24 = vsel %vm150_vm2, %v108_v1, %v347_v22  ;;  %v152_v25 = vsel %vm150_vm2, %v109_v2, %v348_v21 }
  0x90   : > { %v351_v28 = vpop.permute.xlu0 %350  ;;  %v320_v29 = vpack.c.bf16 %v152_v25, %v151_v24  ;;  %v155_v34 = vsel %vm150_vm2, %v112_v8, %v357_v27  ;;  %v156_v35 = vsel %vm150_vm2, %v113_v9, %v358_v26 }
  0x91   : > { %v353_v30 = vunpack.i.h.bf16 %v351_v28  ;;  %v352_v31 = vunpack.i.l.bf16 %v351_v28  ;;  %v326_v37 = vpack.c.bf16 %v156_v35, %v155_v34  ;;  %v142_v38 = vpop.permute.xlu1 %141 }
  0x92   : > { %321 = vmatpush3.bf16.msra.mxu0 %v320_v29  ;;  %v157_v39 = vsel %vm150_vm2, %v114_v15, %v142_v38 }
  0x93   : > { %322 = vmatprep.subr.bf16.mxu0 %v368_v10  ;;  %v153_v32 = vsel %vm150_vm2, %v110_v3, %v352_v31  ;;  %v154_v33 = vsel %vm150_vm2, %v111_v6, %v353_v30 }
  0x94   : > { %v323_v36 = vpack.c.bf16 %v154_v33, %v153_v32 }
  0x96   : > { %324 = vmatpush3.bf16.msra.mxu0 %v323_v36 }
  0x97   : > { %325 = vmatprep.subr.bf16.mxu0 %v368_v10 }
  0x9a   : > { %327 = vmatpush3.bf16.msra.mxu0 %v326_v37 }
  0x9b   : > { %314 = vmatprep.subr.mxu0 %v371_v19 }
  0x9e   : > { %315 = vmatpush3.msk.msra.mxu0 %vm162_vm3, %v157_v39 }
  0x9f   : > { %317 = vmatmul.mubr.msk.f32.vlgmr.msra.gmra.mrb[0].mxu0 %vm158_vm4, %v372_v40 }
 0x16f   : > { %243 = sbr.rel (%p291_p5) target bundleno = 506 (0x1fa), region = 32 }
 0x172   : > { %v232_v42 = vpop.f32.mrb[0].mxu0 }
 0x173   : > { %v237_v43 = vadd.f32 %v236_v41, %v232_v42  ;;  %v318_v44 = vpop.f32.mrb[1].mxu0 }
 0x175   : > { %239 = vst.msk [vmem:[%s428_s1] sm:$0x1] %vm238_vm5, %v237_v43 }
 0x17c   : > { %v244_v45 = vld [vmem:[%s428_s1] sm:$0x1] }
 0x17d   : > { %v245_v46 = vmul.f32 0.010204081, %v244_v45 }
 0x17f   : > { %v246_v47 = vmul.f32 %v245_v46, %v245_v46 }
 0x181   : > { %248 = vrot.lane.b32.xlu0 %v246_v47, %s373_s22 }
 0x1f3   : > { %v249_v48 = vpop.permute.xlu0 %248 }
 0x1f4   : > { %v251_v49 = vsub.f32 %v245_v46, %v249_v48 }
 0x1f6   : > { %v252_v50 = vmax.f32 %v251_v49, 0.0 }
 0x1f8   : > { %v253_v51 = vsel %vm150_vm2, %v245_v46, %v252_v50 }
 0x1f9   : > { %254 = vst.msk [vmem:[%s428_s1] sm:$0x1] %vm238_vm5, %v253_v51 }
 0x1fa PF: > { %s11_s6 = sadd.s32 1, %s365_s6  }
 0x1fb   : > { %p8_p6 = scmp.ge.s32.totalorder %s11_s6, 4  }
 0x1fd   :  { %10 = sbr.rel (!%p8_p6) target bundleno = 1 (0x1), region = 58 }

// kernel: simple_metric_embedding_forward.10
= control target key start
LH: loop header
LB: loop body
LE: loop exit
PB: predicated region body
PF: predicated region fallthrough
CT: control target
= control target key end

     0   :  { %s322_s6 = smov 0   ;;  %s360_s0 = inlined_call_operand.vmem [shape: f32[2,9,32], index: 0, kind: input, shape index: {}]   ;;  %s361_s1 = inlined_call_operand.vmem [shape: f32[1,64], index: 1, kind: output, shape index: {}]  }
   0x1 LB: > { %s328_s7 = sadd.s32 4294967295, %s302_s6   ;;  %p251_p0 = scmp.ge.s32.totalorder %s302_s6, 1  ;;  %s302_s6 = sphi %s322_s6, %s11_s6  }
   0x2   : > { %p82_p1 = scmp.lt.s32.totalorder %s302_s6, 3 }
   0x4   : > { %p83_p2 = pnand %p251_p0, %p82_p1 }
   0x5   : > { %p97_p3 = scmp.lt.s32.totalorder (!%p83_p2), %s328_s7, 1  ;;  %p254_p4 = scmp.ne.s32.totalorder (!%p83_p2), %s328_s7, 0 }
   0x6   : > { %86 = sbr.rel (%p83_p2) target bundleno = 496 (0x1f0), region = 24 }
   0xd   : > { %s98_s8 = scalar_select %p97_p3, %s328_s7, 1 }
   0xe   : > { %105 = sbr.rel (%p254_p4) target bundleno = 21 (0x15), region = 28  ;;  %vm106_vm0 = vcmask (!%p254_p4), 516096   ;;  %v304_v0 = vmov (!%p254_p4), 0.0  }
   0xf   : > { %s260_s9 = sshll.u32 %s98_s8, 4  ;;  %107 = vst.msk [vmem:[%s361_s1] sm:$0x1] (!%p254_p4), %vm106_vm0, %v304_v0 }
  0x10   : > { %s101_s12 = scalar_lea.vmem %s360_s0, %s260_s9 }
  0x15 PF: > { %v108_v1 = vld [vmem:[%s101_s12] sm:$0xff]  ;;  %v109_v2 = vld [vmem:[%s101_s12 + $0x8] sm:$0x1]  ;;  %v305_v5 = vmov 0.0|0.0   ;;  %vm306_vm1 = vmmov 0   ;;  %v307_v7 = vmov 0.0  }
  0x16   : > { %v110_v3 = vmul.f32 %v108_v1, %v108_v1  ;;  %v111_v4 = vmul.f32 %v109_v2, %v109_v2  ;;  %271 = vmatprep.subr.bf16.mxu0 %v305_v5  ;;  %268 = vmatprep.mubr.msk.f32.mxu0 %vm306_vm1, %v307_v7  ;;  %s308_s15 = smov 32   ;;  %vm120_vm2 = vcmask 261120   ;;  %vm127_vm3 = vcmask 1040384   ;;  %v201_v15 = vld [vmem:[%s361_s1] sm:$0x1]  ;;  %p257_p5 = scmp.ne.s32.totalorder %s328_s7, 1 }
  0x17   : > { %vm309_vm4 = vmmov 1   ;;  %vm123_vm6 = vcmask 72704   ;;  %v310_v14 = vmov 1.0   ;;  %vm203_vm7 = vcmask 516096   ;;  %s311_s22 = smov (!%p257_p5), 32  }
  0x18   : > { %v291_v6 = vpack.i.bf16 %v111_v4, %v110_v3  ;;  %vm273_vm5 = vmpackc.low %vm127_vm3, %vm309_vm4 }
  0x1a   : > { %292 = vrot.lane.b32.xlu0 %v291_v6, %s308_s15 }
  0x8c   : > { %v293_v8 = vpop.permute.xlu0 %292 }
  0x8d   : > { %v295_v9 = vunpack.i.h.bf16 %v293_v8  ;;  %v294_v10 = vunpack.i.l.bf16 %v293_v8 }
  0x8f   : > { %v121_v11 = vsel %vm120_vm2, %v108_v1, %v294_v10  ;;  %v122_v12 = vsel %vm120_vm2, %v109_v2, %v295_v9 }
  0x90   : > { %v272_v13 = vpack.c.bf16 %v122_v12, %v121_v11 }
  0x92   : > { %274 = vmatpush3.bf16.msk.msra.mxu0 %vm273_vm5, %v272_v13 }
  0x95   : > { %269 = vmatmul.mubr.msk.f32.vlgmr.msra.gmra.mrb[0].mxu0 %vm123_vm6, %v310_v14 }
 0x165   : > { %208 = sbr.rel (%p257_p5) target bundleno = 496 (0x1f0), region = 32 }
 0x168   : > { %v197_v16 = vpop.f32.mrb[0].mxu0 }
 0x169   : > { %v202_v17 = vadd.f32 %v201_v15, %v197_v16  ;;  %v270_v18 = vpop.f32.mrb[1].mxu0 }
 0x16b   : > { %204 = vst.msk [vmem:[%s361_s1] sm:$0x1] %vm203_vm7, %v202_v17 }
 0x172   : > { %v209_v19 = vld [vmem:[%s361_s1] sm:$0x1] }
 0x173   : > { %v210_v20 = vmul.f32 0.055555556, %v209_v19 }
 0x175   : > { %v211_v21 = vmul.f32 %v210_v20, %v210_v20 }
 0x177   : > { %213 = vrot.lane.b32.xlu0 %v211_v21, %s311_s22 }
 0x1e9   : > { %v214_v22 = vpop.permute.xlu0 %213 }
 0x1ea   : > { %v216_v23 = vsub.f32 %v210_v20, %v214_v22 }
 0x1ec   : > { %v217_v24 = vmax.f32 %v216_v23, 0.0 }
 0x1ee   : > { %v218_v25 = vsel %vm120_vm2, %v210_v20, %v217_v24 }
 0x1ef   : > { %219 = vst.msk [vmem:[%s361_s1] sm:$0x1] %vm203_vm7, %v218_v25 }
 0x1f0 PF: > { %s11_s6 = sadd.s32 1, %s302_s6  }
 0x1f1   : > { %p8_p6 = scmp.ge.s32.totalorder %s11_s6, 4  }
 0x1f3   :  { %10 = sbr.rel (!%p8_p6) target bundleno = 1 (0x1), region = 58 }

// kernel: simple_metric_embedding_forward.9
= control target key start
LH: loop header
LB: loop body
LE: loop exit
PB: predicated region body
PF: predicated region fallthrough
CT: control target
= control target key end

     0   :  { %s1749_s27 = smov 0   ;;  %s2180_s0 = inlined_call_operand.vmem [shape: f32[1,64], index: 0, kind: input, shape index: {}]   ;;  %s2181_s1 = inlined_call_operand.vmem [shape: f32[1,32], index: 1, kind: input, shape index: {}]   ;;  %s2182_s2 = inlined_call_operand.vmem [shape: f32[1,32], index: 2, kind: input, shape index: {}]   ;;  %s2183_s3 = inlined_call_operand.vmem [shape: bf16[288,32], index: 3, kind: input, shape index: {}]   ;;  %s2184_s4 = inlined_call_operand.vmem [shape: f32[1,32], index: 4, kind: input, shape index: {}]   ;;  %s2185_s5 = inlined_call_operand.vmem [shape: bf16[49,2], index: 5, kind: input, shape index: {}]   ;;  %s2186_s6 = inlined_call_operand.vmem [shape: f32[9,33], index: 6, kind: input, shape index: {}]   ;;  %s2187_s7 = inlined_call_operand.vmem [shape: f32[2,49,32], index: 7, kind: input, shape index: {}]   ;;  %s2188_s8 = inlined_call_operand.vmem [shape: f32[2,9,32], index: 8, kind: output, shape index: {}]  }
   0x1 LB: > { %s1514_s28 = sadd.s32 4294967295, %s1696_s27   ;;  %p1518_p0 = scmp.ge.s32.totalorder %s1696_s27, 1  ;;  %s1696_s27 = sphi %s1749_s27, %s18_s27  }
   0x2   : > { %p262_p1 = scmp.lt.s32.totalorder %s1696_s27, 3 }
   0x4   : > { %p263_p2 = pnand %p1518_p0, %p262_p1 }
   0x5   : > { %v389_v0 = vld [vmem:[%s2185_s5 + $0x8] sm:$0xf] (!%p263_p2)  ;;  %v388_v1 = vld [vmem:[%s2185_s5 + $0x4] sm:$0xf] (!%p263_p2)  ;;  %v1698_v2 = vmov (!%p263_p2), 1   ;;  %v1699_v3 = vmov (!%p263_p2), 0   ;;  %v327_v20 = vlaneseq (!%p263_p2) }
   0x6   : > { %266 = sbr.rel (%p263_p2) target bundleno = 788 (0x314), region = 52  ;;  %1660 = vset.pattern.permute.xlu1 (!%p263_p2), %v1698_v2  ;;  %1662 = vset.pattern.permute.xlu0 (!%p263_p2), %v1699_v3  ;;  %v1766_v4 = vld [vmem:[%s2180_s0] sm:$0x1] (!%p263_p2)  ;;  %v390_v6 = vld [vmem:[%s2185_s5 + $0xc] sm:$0xf] (!%p263_p2)  ;;  %s1700_s17 = smov (!%p263_p2), 96  }
   0x7   : > { %527 = vperm.xlu1 (!%p263_p2), %1660, %v389_v0   ;;  %408 = vperm.xlu0 (!%p263_p2), %1662, %v388_v1   ;;  %v309_v5 = vadd.f32 (!%p263_p2), 1e-05, %v1766_v4  ;;  %v387_v7 = vld [vmem:[%s2185_s5] sm:$0xf] (!%p263_p2)  ;;  %v391_v9 = vld [vmem:[%s2185_s5 + $0x10] sm:$0xf] (!%p263_p2) }
   0x8   : > { %v392_v10 = vld [vmem:[%s2185_s5 + $0x14] sm:$0xf] (!%p263_p2)  ;;  %v1670_v11 = vld [vmem:[%s2183_s3 + $0x80] sm:$0xff] (!%p263_p2)   ;;  %v1671_v12 = vld [vmem:[%s2183_s3 + $0x88] sm:$0xff] (!%p263_p2)   ;;  %v1701_v18 = vmov (!%p263_p2), 839922192  }
   0x9   : > { %1688 = vrsqrt.f32 (!%p263_p2), %v309_v5  ;;  %1612 = vmatprep.subr.bf16.mxu1 (!%p263_p2), %v1670_v11  ;;  %v393_v13 = vld [vmem:[%s2185_s5 + $0x18] sm:$0x1] (!%p263_p2)  ;;  %v1672_v14 = vld [vmem:[%s2183_s3 + $0x40] sm:$0xff] (!%p263_p2)   ;;  %v1674_v16 = vld [vmem:[%s2183_s3 + $0x48] sm:$0xff] (!%p263_p2)   ;;  %v400_v19 = vunpack.c.l.s4 (!%p263_p2), %v1701_v18  ;;  %v328_v22 = vshrl.u32 (!%p263_p2), %v327_v20, 7  ;;  %p296_p3 = scmp.lt.s32.totalorder (!%p263_p2), %s1514_s28, 1 }
   0xa   : > { %1613 = vmatpush3.bf16.msra.mxu1 (!%p263_p2), %v1670_v11  ;;  %v1673_v15 = vld [vmem:[%s2183_s3] sm:$0xff] (!%p263_p2)   ;;  %1559 = vmatprep.subr.bf16.mxu0 (!%p263_p2), %v1672_v14  ;;  %v1675_v17 = vld [vmem:[%s2183_s3 + $0x8] sm:$0xff] (!%p263_p2)   ;;  %vm383_vm0 = vcmask (!%p263_p2), 1044480   ;;  %vm384_vm1 = vsmask.f32 (!%p263_p2), 4352  ;;  %vm367_vm2 = vcmask (!%p263_p2), 1043456  }
   0xb   : > { %538 = vperm.xlu1 (!%p263_p2), %1660, %v390_v6   ;;  %1663 = vset.pattern.permute.xlu0 (!%p263_p2), %v1698_v2  ;;  %v401_v21 = vunpack.c.0.s8 (!%p263_p2), %v400_v19  ;;  %v308_v31 = vld [vmem:[%s2181_s1] sm:$0x1] (!%p263_p2)  ;;  %v329_v32 = vsub.s32 (!%p263_p2), 0, %v328_v22  ;;  %vm694_vm3 = vcmask (!%p263_p2), 1046528   ;;  %vm908_vm4 = vcmask (!%p263_p2), 261120   ;;  %vm385_vm6 = vmand (!%p263_p2), %vm383_vm0, %vm384_vm1  ;;  %s1702_s18 = smov (!%p263_p2), 64  }
   0xc   : > { %505 = vperm.xlu0 (!%p263_p2), %1663, %v387_v7   ;;  %1614 = vmatprep.subr.bf16.mxu1 (!%p263_p2), %v1671_v12  ;;  %v316_v42 = vld [vmem:[%s2182_s2] sm:$0x1] (!%p263_p2)  ;;  %vm599_vm5 = vcmask (!%p263_p2), 1040384   ;;  %vm615_vm7 = vsmask.f32 (!%p263_p2), 3328  ;;  %s1703_s11 = smov (!%p263_p2), 32  }
   0xd   : > { %1560 = vmatpush3.bf16.msra.mxu0 %v1673_v15  ;;  %v1805_v25 = vsub.s32 %v401_v21, %v328_v22  ;;  %s2190_s28 = smov (!%p296_p3, %s1514_s28), 1  ;;  %vm718_vm8 = vsmask.f32 7424  ;;  %vm889_vm9 = vsmask.f32 256  ;;  %vm921_vm10 = vcmask 523264  }
   0xe   : > { %1615 = vmatpush3.bf16.msra.mxu1 %v1671_v12  ;;  %1561 = vmatprep.subr.bf16.mxu0 %v1674_v16  ;;  %s1645_s16 = smul.u32 56, %s2190_s28  ;;  %vm930_vm11 = vcmask 785408   ;;  %vm1371_vm12 = vcmask 269312   ;;  %vm1297_vm13 = vcmask 1045504   ;;  %vm1349_vm14 = vcmask 1041408  }
   0xf   : > { %1661 = vset.pattern.permute.xlu1 %v1699_v3  ;;  %vm1457_vm15 = vcmask 253952  }
  0x10   : > { %396 = vperm.xlu1 %1661, %v387_v7   ;;  %s300_s22 = scalar_lea.vmem %s2187_s7, %s1645_s16 }
  0x11   : > { %1562 = vmatpush3.bf16.msra.mxu0 %v1675_v17  ;;  %v319_v45 = vld [vmem:[%s300_s22] sm:$0xff]  ;;  %v320_v46 = vld [vmem:[%s300_s22 + $0x8] sm:$0xff]  ;;  %v321_v48 = vld [vmem:[%s300_s22 + $0x10] sm:$0xff] }
  0x12   : > { %v322_v49 = vld [vmem:[%s300_s22 + $0x18] sm:$0xff]  ;;  %v323_v50 = vld [vmem:[%s300_s22 + $0x20] sm:$0xff]  ;;  %v324_v55 = vld [vmem:[%s300_s22 + $0x28] sm:$0xff] }
  0x13   : > { %v1689_v8 = vpop.eup %1688  ;;  %v325_v59 = vld [vmem:[%s300_s22 + $0x30] sm:$0x1] }
  0x14   : > { %312 = vrot.lane.b32.xlu0 %v1689_v8, %s1700_s17  ;;  %420 = vperm.xlu1 %1661, %v389_v0  }
  0x18   : > { %516 = vperm.xlu0 %1663, %v388_v1   ;;  %432 = vperm.xlu1 %1661, %v390_v6  }
  0x1c   : > { %549 = vperm.xlu0 %1663, %v391_v9   ;;  %1664 = vset.pattern.permute.xlu1 %v1698_v2 }
  0x1d   : > { %560 = vperm.xlu1 %1664, %v392_v10  }
  0x20   : > { %1666 = vset.pattern.permute.xlu0 %v1699_v3 }
  0x21   : > { %1665 = vset.pattern.permute.xlu1 %v1699_v3  ;;  %456 = vperm.xlu0 %1666, %v392_v10  }
  0x22   : > { %444 = vperm.xlu1 %1665, %v391_v9  }
  0x25   : > { %1669 = vset.pattern.permute.xlu0 %v1698_v2 }
  0x26   : > { %1667 = vset.pattern.permute.xlu1 %v1698_v2 }
  0x27   : > { %571 = vperm.xlu1 %1667, %v393_v13  }
  0x2b   : > { %1668 = vset.pattern.permute.xlu1 %v1699_v3 }
  0x2c   : > { %468 = vperm.xlu1 %1668, %v393_v13  }
  0x86   : > { %v528_v23 = vpop.permute.xlu1 %527  ;;  %v409_v24 = vpop.permute.xlu0 %408 }
  0x87   : > { %v536_v27 = vrot.slane %v528_v23, %v1805_v25  ;;  %v417_v37 = vrot.slane %v409_v24, %v1805_v25 }
  0x8a   : > { %v539_v26 = vpop.permute.xlu1 %538 }
  0x8b   : > { %v547_v28 = vrot.slane %v539_v26, %v1805_v25  ;;  %v506_v29 = vpop.permute.xlu0 %505 }
  0x8c   : > { %v514_v58 = vrot.slane %v506_v29, %v1805_v25 }
  0x8d   : > { %v1814_v30 = vcombine.low %v536_v27, %v547_v28 }
  0x8f   : > { %v664_v33 = vshrl.u32 %v1814_v30, 16  ;;  %v667_v34 = vshll.u32 %v1814_v30, 16  ;;  %v397_v35 = vpop.permute.xlu1 %396  ;;  %v313_v36 = vpop.permute.xlu0 %312  ;;  %v601_v56 = vrot.slane %v1814_v30, 7 }
  0x90   : > { %v405_v38 = vrot.slane %v397_v35, %v1805_v25  ;;  %v315_v39 = vmul.f32 %v313_v36, %v308_v31 }
  0x91   : > { %v666_v40 = vrot.slane %v664_v33, 3  ;;  %v669_v41 = vrot.slane %v667_v34, 4 }
  0x92   : > { %v1829_v43 = vcombine.low %v405_v38, %v417_v37  ;;  %v317_v44 = vmul.f32 %v315_v39, %v1766_v4  ;;  %v330_v47 = vrot.slane %v315_v39, %v329_v32 }
  0x93   : > { %v421_v51 = vpop.permute.xlu1 %420  ;;  %v1835_v57 = vor.u32 %v669_v41, %v666_v40 }
  0x94   : > { %v617_v52 = vshrl.u32 %v1829_v43, 16  ;;  %v620_v53 = vshll.u32 %v1829_v43, 16  ;;  %v318_v54 = vsub.f32 %v316_v42, %v317_v44  ;;  %v332_v60 = vmul.f32 %v330_v47, %v319_v45 }
  0x95   : > { %v333_v61 = vmul.f32 %v330_v47, %v320_v46  ;;  %v334_v62 = vmul.f32 %v330_v47, %v321_v48  ;;  %v335_v63 = vmul.f32 %v330_v47, %v322_v49  ;;  %v336_v0 = vmul.f32 %v330_v47, %v323_v50 }
  0x96   : > { %v619_v1 = vrot.slane %v617_v52, 4  ;;  %v622_v2 = vrot.slane %v620_v53, 5  ;;  %v337_v3 = vmul.f32 %v330_v47, %v324_v55  ;;  %v343_v4 = vrot.slane %v318_v54, %v329_v32  ;;  %v1676_v54 = vld [vmem:[%s2183_s3 + $0x50] sm:$0xff]  }
  0x97   : > { %v517_v5 = vpop.permute.xlu0 %516  ;;  %v433_v6 = vpop.permute.xlu1 %432  ;;  %v338_v7 = vmul.f32 %v330_v47, %v325_v59  ;;  %v429_v8 = vrot.slane %v421_v51, %v1805_v25  ;;  %v695_v14 = vrot.slane %v1829_v43, 1  ;;  %v1677_v55 = vld [vmem:[%s2183_s3 + $0x10] sm:$0xff]   ;;  %1563 = vmatprep.subr.bf16.mxu0 %v1676_v54 }
  0x98   : > { %v525_v9 = vrot.slane %v517_v5, %v1805_v25  ;;  %v441_v10 = vrot.slane %v433_v6, %v1805_v25  ;;  %v345_v11 = vadd.f32 %v343_v4, %v332_v60  ;;  %v346_v12 = vadd.f32 %v343_v4, %v333_v61  ;;  %1564 = vmatpush3.bf16.msra.mxu0 %v1677_v55 }
  0x99   : > { %v347_v13 = vadd.f32 %v343_v4, %v334_v62  ;;  %v349_v15 = vadd.f32 %v343_v4, %v336_v0  ;;  %v350_v16 = vadd.f32 %v343_v4, %v337_v3  ;;  %v351_v17 = vadd.f32 %v343_v4, %v338_v7 }
  0x9a   : > { %v1842_v18 = vcombine.low %v514_v58, %v525_v9  ;;  %v348_v19 = vadd.f32 %v343_v4, %v335_v63  ;;  %v1844_v20 = vcombine.low %v429_v8, %v441_v10  ;;  %v352_v21 = vmax.f32 %v345_v11, 0.0  ;;  %v1678_v10 = vld [vmem:[%s2183_s3 + $0x58] sm:$0xff]  }
  0x9b   : > { %v353_v22 = vmax.f32 %v346_v12, 0.0  ;;  %v356_v23 = vmax.f32 %v349_v15, 0.0  ;;  %v357_v24 = vmax.f32 %v350_v16, 0.0  ;;  %v358_v26 = vmax.f32 %v351_v17, 0.0  ;;  %v550_v28 = vpop.permute.xlu0 %549  ;;  %v1679_v11 = vld [vmem:[%s2183_s3 + $0x18] sm:$0xff]   ;;  %1565 = vmatprep.subr.bf16.mxu0 %v1678_v10 }
  0x9c   : > { %v656_v27 = vshrl.u32 %v1842_v18, 16  ;;  %v561_v29 = vpop.permute.xlu1 %560  ;;  %v659_v31 = vshll.u32 %v1842_v18, 16  ;;  %v625_v32 = vshrl.u32 %v1844_v20, 16  ;;  %v628_v33 = vshll.u32 %v1844_v20, 16  ;;  %1566 = vmatpush3.bf16.msra.mxu0 %v1679_v11 }
  0x9d   : > { %v1850_v34 = vor.u32 %v622_v2, %v619_v1  ;;  %v361_v35 = vpack.c.bf16 %v357_v24, %v356_v23  ;;  %v362_v36 = vpack.c.bf16 %v358_v26, %v358_v26  ;;  %v696_v37 = vrot.slane %v1844_v20, 1 }
  0x9e   : > { %v354_v38 = vmax.f32 %v347_v13, 0.0  ;;  %v1853_v39 = vrot.slane %v656_v27, 3  ;;  %v1855_v40 = vrot.slane %v659_v31, 4  ;;  %v558_v41 = vrot.slane %v550_v28, %v1805_v25 }
  0x9f   : > { %v569_v42 = vrot.slane %v561_v29, %v1805_v25  ;;  %v371_v44 = vrot.slane %v361_v35, 4  ;;  %v373_v45 = vrot.slane %v362_v36, 4  ;;  %v355_v47 = vmax.f32 %v348_v19, 0.0 }
  0xa0   : > { %v457_v46 = vpop.permute.xlu0 %456  ;;  %v359_v48 = vpack.c.bf16 %v353_v22, %v352_v21  ;;  %v627_v49 = vrot.slane %v625_v32, 4  ;;  %v630_v50 = vrot.slane %v628_v33, 5  ;;  %v697_v1 = vsel %vm694_vm3, %v695_v14, %v696_v37 }
  0xa1   : > { %v1861_v51 = vcombine.low %v558_v41, %v569_v42  ;;  %v445_v52 = vpop.permute.xlu1 %444  ;;  %v465_v53 = vrot.slane %v457_v46, %v1805_v25  ;;  %v360_v59 = vpack.c.bf16 %v355_v47, %v354_v38  ;;  %v374_v61 = vsel %vm367_vm2, %v371_v44, %v373_v45  ;;  %v1680_v38 = vld [vmem:[%s2183_s3 + $0x60] sm:$0xff]  }
  0xa2   : > { %v453_v58 = vrot.slane %v445_v52, %v1805_v25  ;;  %v368_v60 = vrot.slane %v359_v48, 4  ;;  %v1874_v0 = vsel %vm385_vm6, %v374_v61, 0  ;;  %v600_v9 = vrot.slane %v1842_v18, 7  ;;  %v1681_v41 = vld [vmem:[%s2183_s3 + $0x20] sm:$0xff]   ;;  %1567 = vmatprep.subr.bf16.mxu0 %v1680_v38  ;;  %v1683_v61 = vld [vmem:[%s2183_s3 + $0x28] sm:$0xff]  }
  0xa3   : > { %v673_v62 = vshrl.u32 %v1861_v51, 16  ;;  %v676_v63 = vshll.u32 %v1861_v51, 16  ;;  %v603_v2 = vrot.slane %v1861_v51, 7  ;;  %v369_v4 = vrot.slane %v360_v59, 4  ;;  %1568 = vmatpush3.bf16.msra.mxu0 %v1681_v41 }
  0xa4   : > { %v1880_v3 = vcombine.low %v453_v58, %v465_v53  ;;  %v1883_v5 = vsel %vm367_vm2, 0, %v368_v60  ;;  %v716_v7 = vmul.bf16 %v1861_v51, %v1874_v0  ;;  %v1917_v32 = vor.u32 %v630_v50, %v627_v49 }
  0xa5   : > { %v675_v6 = vrot.slane %v673_v62, 3  ;;  %v706_v8 = vmul.bf16 %v695_v14, %v1883_v5  ;;  %v678_v12 = vrot.slane %v676_v63, 4  ;;  %v1898_v16 = vsel %vm367_vm2, %v368_v60, %v369_v4  ;;  %v1682_v60 = vld [vmem:[%s2183_s3 + $0x68] sm:$0xff]  }
  0xa6   : > { %v634_v13 = vshrl.u32 %v1880_v3, 16  ;;  %v637_v15 = vshll.u32 %v1880_v3, 16  ;;  %v572_v17 = vpop.permute.xlu1 %571  ;;  %v698_v14 = vrot.slane %v1880_v3, 1  ;;  %v714_v19 = vmul.bf16 %v1842_v18, %v1898_v16  ;;  %1569 = vmatprep.subr.bf16.mxu0 %v1682_v60 }
  0xa7   : > { %v1904_v21 = vsel %vm367_vm2, %v369_v4, %v371_v44  ;;  %v580_v22 = vrot.slane %v572_v17, %v1805_v25  ;;  %v707_v27 = vmul.bf16 %v697_v1, %v1898_v16  ;;  %v874_v29 = vrot.slane %v706_v8, 7  ;;  %1570 = vmatpush3.bf16.msra.mxu0 %v1683_v61 }
  0xa8   : > { %v636_v23 = vrot.slane %v634_v13, 4  ;;  %v639_v24 = vrot.slane %v637_v15, 5  ;;  %v715_v26 = vmul.bf16 %v1814_v30, %v1904_v21  ;;  %1616 = vmatprep.mubr.msk.bf16.mxu1 %vm908_vm4, %v714_v19  ;;  %v602_v18 = vsel %vm599_vm5, %v600_v9, %v601_v56 }
  0xa9   : > { %v1911_v28 = vcombine.low %v580_v22, %v580_v22  ;;  %v611_v31 = vmul.bf16 %v600_v9, %v1883_v5  ;;  %v875_v33 = vrot.slane %v707_v27, 7  ;;  %v612_v35 = vmul.bf16 %v602_v18, %v1898_v16  ;;  %v1684_v22 = vld [vmem:[%s2183_s3 + $0x70] sm:$0xff]  }
  0xaa   : > { %1617 = vmatmul.mubr.msk.bf16.vlgmr.msra.gmra.mrb[0].mxu1 %vm908_vm4, %v715_v26  ;;  %v604_v36 = vsel %vm599_vm5, %v601_v56, %v603_v2  ;;  %v1932_v42 = vor.u32 %v678_v12, %v675_v6  ;;  %v1934_v44 = vor.u32 %v639_v24, %v636_v23  ;;  %v699_v53 = vsel %vm694_vm3, %v696_v37, %v698_v14  ;;  %v1685_v23 = vld [vmem:[%s2183_s3 + $0x30] sm:$0xff]  }
  0xab   : > { %1620 = vmatprep.mubr.msk.bf16.mxu1 %vm908_vm4, %v716_v7  ;;  %v682_v45 = vshll.u32 %v1911_v28, 16  ;;  %v760_v30 = vrot.slane %v611_v31, 1  ;;  %v469_v46 = vpop.permute.xlu1 %468  ;;  %v876_v56 = vsel %vm599_vm5, %v874_v29, %v875_v33  ;;  %v761_v47 = vrot.slane %v612_v35, 1  ;;  %1571 = vmatprep.subr.bf16.mxu0 %v1684_v22 }
  0xac   : > { %v613_v48 = vmul.bf16 %v604_v36, %v1904_v21  ;;  %v477_v49 = vrot.slane %v469_v46, %v1805_v25  ;;  %v717_v52 = vmul.bf16 0, %v1911_v28  ;;  %881 = vrot.lane.b32.xlu0 %v876_v56, %s1702_s18  ;;  %v721_v54 = vshll.u32 %v1883_v5, 16  ;;  %1572 = vmatpush3.bf16.msra.mxu0 %v1685_v23  ;;  %v1687_v46 = vld [vmem:[%s2183_s3 + $0x38] sm:$0xff]  }
  0xad   : > { %v684_v50 = vrot.slane %v682_v45, 4  ;;  %v762_v55 = vsel %vm694_vm3, %v760_v30, %v761_v47  ;;  %v708_v59 = vmul.bf16 %v699_v53, %v1904_v21  ;;  %v719_v37 = vshrl.u32 %v1883_v5, 16  ;;  %v1686_v30 = vld [vmem:[%s2183_s3 + $0x78] sm:$0xff]  }
  0xae   : > { %v1950_v58 = vrot.slane %v613_v48, 1  ;;  %v1952_v25 = vcombine.low %v477_v49, %v477_v49  ;;  %767 = vrot.lane.b32.xlu1 %v762_v55, %s1702_s18  ;;  %v723_v62 = vrot.slane %v721_v54, 1  ;;  %v726_v63 = vshll.u32 %v1898_v16, 16  ;;  %1573 = vmatprep.subr.bf16.mxu0 %v1686_v30 }
  0xaf   : > { %v730_v1 = vshrl.u32 %v1898_v16, 16  ;;  %v605_v4 = vrot.slane %v1911_v28, 7  ;;  %v1973_v9 = vsel %vm384_vm1, %v1932_v42, %v684_v50  ;;  %v1976_v11 = vrot.slane %v708_v59, 7 }
  0xb0   : > { %v764_v6 = vsel %vm694_vm3, %v761_v47, %v1950_v58  ;;  %v503_v7 = vmul.bf16 %v1952_v25, %v1874_v0  ;;  %v643_v8 = vshll.u32 %v1952_v25, 16  ;;  %v700_v10 = vrot.slane %v1952_v25, 1  ;;  %1574 = vmatpush3.bf16.msra.mxu0 %v1687_v46 }
  0xb1   : > { %v728_v12 = vrot.slane %v726_v63, 1  ;;  %v724_v13 = vor.u32 %v723_v62, %v719_v37  ;;  %v891_v15 = vrot.slane %v730_v1, 7  ;;  %v734_v17 = vshll.u32 %v1904_v21, 16 }
  0xb2   : > { %1621 = vmatmul.mubr.msk.bf16.gmra.mrb[4].mxu1 %vm908_vm4, %v717_v52  ;;  %v738_v19 = vshrl.u32 %v1904_v21, 16  ;;  %769 = vrot.lane.b32.xlu1 %v764_v6, %s1702_s18  ;;  %v1988_v24 = vrot.slane %v643_v8, 5  ;;  %v878_v26 = vsel %vm599_vm5, %v875_v33, %v1976_v11  ;;  %v890_v27 = vrot.slane %v719_v37, 7 }
  0xb3   : > { %v742_v29 = vshll.u32 %v1874_v0, 16  ;;  %883 = vrot.lane.b32.xlu0 %v878_v26, %s1702_s18  ;;  %v892_v18 = vor.u32 %v891_v15, %v726_v63  ;;  %v732_v31 = vor.u32 %v730_v1, %v728_v12  ;;  %v736_v35 = vrot.slane %v734_v17, 1 }
  0xb4   : > { %v1994_v36 = vrot.slane %v738_v19, 7  ;;  %v662_v41 = vor.u32 %v1855_v40, %v1853_v39  ;;  %v632_v33 = vsel %vm615_vm7, %v1850_v34, %v1917_v32  ;;  %v651_v45 = vmul.bf16 %v1850_v34, %v1883_v5 }
  0xb5   : > { %v744_v38 = vrot.slane %v742_v29, 1  ;;  %v729_v56 = vsel %vm718_vm8, %v724_v13, %v728_v12  ;;  %v893_v39 = vsel %vm889_vm9, %v890_v27, %v892_v18  ;;  %v740_v47 = vor.u32 %v738_v19, %v736_v35 }
  0xb6   : > { %v895_v40 = vor.u32 %v1994_v36, %v734_v17  ;;  %748 = vrot.lane.b32.xlu1 %v729_v56, %s1703_s11  ;;  %v671_v34 = vsel %vm384_vm1, %v662_v41, %v1835_v57  ;;  %v690_v48 = vmul.bf16 %v662_v41, %v1883_v5  ;;  %v652_v49 = vmul.bf16 %v632_v33, %v1898_v16 }
  0xb7   : > { %v776_v50 = vshrl.u32 %v651_v45, 16  ;;  %900 = vrot.lane.b32.xlu0 %v893_v39, %s1700_s17  ;;  %v737_v52 = vsel %vm718_vm8, %v732_v31, %v736_v35  ;;  %v691_v54 = vmul.bf16 %v671_v34, %v1898_v16  ;;  %v779_v55 = vshll.u32 %v651_v45, 16 }
  0xb8   : > { %v896_v53 = vsel %vm889_vm9, %v891_v15, %v895_v40  ;;  %v745_v59 = vsel %vm718_vm8, %v740_v47, %v744_v38  ;;  %v828_v60 = vshrl.u32 %v690_v48, 16  ;;  %v831_v61 = vshll.u32 %v690_v48, 16 }
  0xb9   : > { %v784_v37 = vshrl.u32 %v652_v49, 16  ;;  %v836_v62 = vshrl.u32 %v691_v54, 16  ;;  %v839_v63 = vshll.u32 %v691_v54, 16  ;;  %v778_v1 = vrot.slane %v776_v50, 3 }
  0xba   : > { %v787_v6 = vshll.u32 %v652_v49, 16  ;;  %750 = vrot.lane.b32.xlu1 %v737_v52, %s1703_s11  ;;  %v830_v8 = vrot.slane %v828_v60, 4  ;;  %v833_v12 = vrot.slane %v831_v61, 5  ;;  %v701_v15 = vsel %vm694_vm3, %v698_v14, %v700_v10 }
  0xbb   : > { %v786_v13 = vrot.slane %v784_v37, 3  ;;  %902 = vrot.lane.b32.xlu0 %v896_v53, %s1700_s17  ;;  %v838_v17 = vrot.slane %v836_v62, 4  ;;  %v841_v19 = vrot.slane %v839_v63, 5  ;;  %v781_v22 = vrot.slane %v779_v55, 4 }
  0xbc   : > { %v789_v23 = vrot.slane %v787_v6, 4  ;;  %v834_v26 = vor.u32 %v833_v12, %v830_v8  ;;  %v709_v27 = vmul.bf16 %v701_v15, %v1874_v0  ;;  %v606_v18 = vsel %vm599_vm5, %v603_v2, %v605_v4 }
  0xbd   : > { %v680_v31 = vsel %vm384_vm1, %v1835_v57, %v1932_v42  ;;  %v842_v14 = vor.u32 %v841_v19, %v838_v17  ;;  %v614_v35 = vmul.bf16 %v606_v18, %v1874_v0  ;;  %v641_v28 = vsel %vm615_vm7, %v1917_v32, %v1934_v44 }
  0xbe   : > { %v790_v10 = vor.u32 %v789_v23, %v786_v13  ;;  %v692_v38 = vmul.bf16 %v680_v31, %v1904_v21  ;;  %752 = vrot.lane.b32.xlu1 %v745_v59, %s1703_s11  ;;  %v879_v41 = vrot.slane %v709_v27, 7  ;;  %v746_v51 = vshrl.u32 %v1874_v0, 16 }
  0xbf   : > { %v843_v2 = vsel %vm615_vm7, %v834_v26, %v842_v14  ;;  %v782_v4 = vor.u32 %v781_v22, %v778_v1  ;;  %v693_v57 = vmul.bf16 %v1973_v9, %v1874_v0  ;;  %v646_v42 = vsel %vm615_vm7, %v1934_v44, %v1988_v24 }
  0xc0   : > { %v845_v33 = vshrl.u32 %v692_v38, 16  ;;  %862 = vrot.lane.b32.xlu0 %v843_v2, %s1703_s11  ;;  %v848_v45 = vshll.u32 %v692_v38, 16  ;;  %v653_v30 = vmul.bf16 %v641_v28, %v1904_v21  ;;  %v880_v46 = vsel %vm599_vm5, %v1976_v11, %v879_v41 }
  0xc1   : > { %v791_v32 = vsel %vm384_vm1, %v782_v4, %v790_v10  ;;  %v765_v56 = vrot.slane %v614_v35, 1  ;;  %v897_v34 = vrot.slane %v746_v51, 7  ;;  %v854_v48 = vshrl.u32 %v693_v57, 16 }
  0xc2   : > { %v847_v39 = vrot.slane %v845_v33, 4  ;;  %810 = vrot.lane.b32.xlu1 %v791_v32, %s1700_s17  ;;  %v850_v40 = vrot.slane %v848_v45, 5  ;;  %v793_v9 = vshrl.u32 %v653_v30, 16  ;;  %v796_v47 = vshll.u32 %v653_v30, 16 }
  0xc3   : > { %v857_v44 = vshll.u32 %v693_v57, 16  ;;  %v654_v24 = vmul.bf16 %v646_v42, %v1874_v0  ;;  %v500_v49 = vmul.bf16 %v1829_v43, %v1883_v5  ;;  %v766_v53 = vsel %vm694_vm3, %v1950_v58, %v765_v56 }
  0xc4   : > { %885 = vrot.lane.b32.xlu0 %v880_v46, %s1702_s18  ;;  %v851_v50 = vor.u32 %v850_v40, %v847_v39  ;;  %v795_v52 = vrot.slane %v793_v9, 3  ;;  %v798_v11 = vrot.slane %v796_v47, 4  ;;  %v501_v59 = vmul.bf16 %v1844_v20, %v1898_v16 }
  0xc5   : > { %v802_v54 = vshrl.u32 %v654_v24, 16  ;;  %v805_v55 = vshll.u32 %v654_v24, 16  ;;  %v898_v61 = vor.u32 %v897_v34, %v742_v29  ;;  %v502_v43 = vmul.bf16 %v1880_v3, %v1904_v21 }
  0xc6   : > { %771 = vrot.lane.b32.xlu1 %v766_v53, %s1702_s18  ;;  %v799_v60 = vor.u32 %v798_v11, %v795_v52  ;;  %v820_v37 = vrot.slane %v1883_v5, 4  ;;  %v852_v62 = vsel %vm615_vm7, %v842_v14, %v851_v50  ;;  %v856_v63 = vrot.slane %v854_v48, 4 }
  0xc7   : > { %v859_v58 = vrot.slane %v857_v44, 5  ;;  %v821_v1 = vrot.slane %v1898_v16, 4  ;;  %v804_v20 = vrot.slane %v802_v54, 3  ;;  %v823_v6 = vrot.slane %v1904_v21, 4 }
  0xc8   : > { %864 = vrot.lane.b32.xlu0 %v852_v62, %s1703_s11  ;;  %v800_v8 = vsel %vm384_vm1, %v790_v10, %v799_v60  ;;  %v807_v12 = vrot.slane %v805_v55, 4  ;;  %v825_v13 = vrot.slane %v1874_v0, 4  ;;  %v899_v15 = vsel %vm889_vm9, %v1994_v36, %v898_v61 }
  0xc9   : > { %v822_v29 = vsel %vm367_vm2, %v820_v37, %v821_v1  ;;  %v824_v5 = vsel %vm367_vm2, %v821_v1, %v823_v6  ;;  %v860_v16 = vor.u32 %v859_v58, %v856_v63 }
  0xca   : > { %812 = vrot.lane.b32.xlu1 %v800_v8, %s1700_s17  ;;  %v826_v17 = vsel %vm367_vm2, %v823_v6, %v825_v13  ;;  %v808_v19 = vor.u32 %v807_v12, %v804_v20 }
  0xcb   : > { %v861_v22 = vsel %vm615_vm7, %v851_v50, %v860_v16 }
  0xcc   : > { %904 = vrot.lane.b32.xlu0 %v899_v15, %s1700_s17  ;;  %v809_v23 = vsel %vm384_vm1, %v799_v60, %v808_v19  ;;  %v2137_v15 = vld [vmem:[%s2184_s4] ss:$0 sm:$0xff] }
  0xce   : > { %754 = vrot.lane.b32.xlu1 %v746_v51, %s1703_s11 }
  0xd0   : > { %866 = vrot.lane.b32.xlu0 %v861_v22, %s1703_s11 }
  0xd2   : > { %814 = vrot.lane.b32.xlu1 %v809_v23, %s1700_s17 }
  0xd4   : > { %868 = vrot.lane.b32.xlu0 %v856_v63, %s1703_s11 }
  0xd6   : > { %773 = vrot.lane.b32.xlu1 %v765_v56, %s1702_s18 }
  0xd8   : > { %887 = vrot.lane.b32.xlu0 %v879_v41, %s1702_s18  ;;  %s1558_s18 = sshll.u32 %s2190_s28, 4 }
  0xd9   : > { %s305_s21 = scalar_lea.vmem %s2188_s8, %s1558_s18 }
  0xda   : > { %816 = vrot.lane.b32.xlu1 %v804_v20, %s1700_s17 }
  0xdc   : > { %906 = vrot.lane.b32.xlu0 %v897_v34, %s1700_s17 }
 0x11e   : > { %v882_v26 = vpop.permute.xlu0 %881 }
 0x120   : > { %v768_v36 = vpop.permute.xlu1 %767 }
 0x124   : > { %v770_v27 = vpop.permute.xlu1 %769 }
 0x125   : > { %v884_v18 = vpop.permute.xlu0 %883 }
 0x128   : > { %v749_v31 = vpop.permute.xlu1 %748 }
 0x129   : > { %v901_v14 = vpop.permute.xlu0 %900  ;;  %v911_v28 = vsel %vm908_vm4, %v500_v49, %v749_v31 }
 0x12a   : > { %v923_v57 = vsel %vm921_vm10, %v911_v28, %v768_v36 }
 0x12c   : > { %v751_v10 = vpop.permute.xlu1 %750 }
 0x12d   : > { %v903_v35 = vpop.permute.xlu0 %902  ;;  %v914_v32 = vsel %vm908_vm4, %v501_v59, %v751_v10 }
 0x12e   : > { %v925_v47 = vsel %vm921_vm10, %v914_v32, %v770_v27 }
 0x130   : > { %v753_v38 = vpop.permute.xlu1 %752 }
 0x131   : > { %v917_v50 = vsel %vm908_vm4, %v502_v43, %v753_v38 }
 0x132   : > { %v863_v51 = vpop.permute.xlu0 %862 }
 0x133   : > { %v945_v2 = vsel %vm908_vm4, %v822_v29, %v863_v51 }
 0x134   : > { %v811_v41 = vpop.permute.xlu1 %810  ;;  %v956_v4 = vsel %vm921_vm10, %v945_v2, %v882_v26 }
 0x135   : > { %v964_v33 = vsel %vm930_vm11, %v956_v4, %v901_v14  ;;  %v932_v45 = vsel %vm930_vm11, %v923_v57, %v811_v41 }
 0x136   : > { %1170 = vmatprep.mubr.bf16.mxu0 %v964_v33  ;;  %v886_v42 = vpop.permute.xlu0 %885 }
 0x137   : > { %1171 = vmatmul.mubr.bf16.vlgmr.msra.gmra.mrb[0].mxu0 %v932_v45 }
 0x138   : > { %v772_v30 = vpop.permute.xlu1 %771 }
 0x139   : > { %v927_v53 = vsel %vm921_vm10, %v917_v50, %v772_v30 }
 0x13a   : > { %v865_v46 = vpop.permute.xlu0 %864 }
 0x13b   : > { %v948_v56 = vsel %vm908_vm4, %v824_v5, %v865_v46 }
 0x13c   : > { %v813_v39 = vpop.permute.xlu1 %812  ;;  %v958_v40 = vsel %vm921_vm10, %v948_v56, %v884_v18 }
 0x13d   : > { %v967_v9 = vsel %vm930_vm11, %v958_v40, %v903_v35  ;;  %v935_v48 = vsel %vm930_vm11, %v925_v47, %v813_v39 }
 0x13e   : > { %v905_v34 = vpop.permute.xlu0 %904  ;;  %1178 = vmatprep.mubr.bf16.mxu0 %v967_v9 }
 0x13f   : > { %1179 = vmatmul.mubr.bf16.gmra.mrb[4].mxu0 %v935_v48 }
 0x140   : > { %v755_v44 = vpop.permute.xlu1 %754 }
 0x141   : > { %v920_v43 = vsel %vm908_vm4, %v503_v7, %v755_v44 }
 0x142   : > { %v867_v24 = vpop.permute.xlu0 %866 }
 0x143   : > { %v951_v49 = vsel %vm908_vm4, %v826_v17, %v867_v24 }
 0x144   : > { %v815_v52 = vpop.permute.xlu1 %814  ;;  %v960_v11 = vsel %vm921_vm10, %v951_v49, %v886_v42 }
 0x145   : > { %v970_v54 = vsel %vm930_vm11, %v960_v11, %v905_v34  ;;  %v938_v59 = vsel %vm930_vm11, %v927_v53, %v815_v52 }
 0x146   : > { %v869_v55 = vpop.permute.xlu0 %868  ;;  %1186 = vmatprep.mubr.bf16.mxu0 %v970_v54 }
 0x147   : > { %1187 = vmatmul.mubr.bf16.gmra.mrb[8].mxu0 %v938_v59  ;;  %v954_v3 = vsel %vm908_vm4, %v825_v13, %v869_v55  ;;  %v1369_v13 = vld [vmem:[%s2186_s6] sm:$0xff] }
 0x148   : > { %v774_v60 = vpop.permute.xlu1 %773  ;;  %1634 = vmatprep.mubr.msk.f32.mxu1 %vm1371_vm12, %v1369_v13 }
 0x149   : > { %v929_v63 = vsel %vm921_vm10, %v920_v43, %v774_v60 }
 0x14a   : > { %v888_v61 = vpop.permute.xlu0 %887 }
 0x14b   : > { %v962_v37 = vsel %vm921_vm10, %v954_v3, %v888_v61 }
 0x14c   : > { %v817_v21 = vpop.permute.xlu1 %816 }
 0x14d   : > { %v941_v1 = vsel %vm930_vm11, %v929_v63, %v817_v21 }
 0x14e   : > { %v907_v62 = vpop.permute.xlu0 %906 }
 0x14f   : > { %v973_v58 = vsel %vm930_vm11, %v962_v37, %v907_v62 }
 0x150   : > { %1194 = vmatprep.mubr.bf16.mxu0 %v973_v58 }
 0x151   : > { %1195 = vmatmul.mubr.bf16.gmra.mrb[12].mxu0 %v941_v1 }
 0x17d   : > { %v1618_v20 = vpop.f32.mrb[0].mxu1 }
 0x17e   : > { %v1236_v6 = vpop.f32.mrb[1].mxu1 }
 0x17f   : > { %v1619_v8 = vpop.f32.mrb[2].mxu1 }
 0x180   : > { %v1239_v12 = vpop.f32.mrb[3].mxu1 }
 0x185   : > { %v2128_v29 = vpop.f32.mrb[4].mxu1 }
 0x186   : > { %v1252_v0 = vpop.f32.mrb[5].mxu1 }
 0x187   : > { %v1623_v25 = vpop.f32.mrb[6].mxu1 }
 0x188   : > { %v1255_v7 = vpop.f32.mrb[7].mxu1 }
 0x20a   : > { %v1575_v5 = vpop.f32.mrb[0].mxu0 }
 0x20b   : > { %v1576_v16 = vpop.f32.mrb[1].mxu0 }
 0x20c   : > { %v1577_v17 = vadd.f32 %v1576_v16, %v1575_v5  ;;  %v1578_v19 = vpop.f32.mrb[2].mxu0 }
 0x20d   : > { %v1579_v22 = vpop.f32.mrb[3].mxu0 }
 0x20e   : > { %v1173_v23 = vadd.f32 %v1577_v17, %v2137_v15  ;;  %v1580_v36 = vadd.f32 %v1579_v22, %v1578_v19 }
 0x210   : > { %v1237_v26 = vadd.f32 %v1236_v6, %v1173_v23  ;;  %v1176_v27 = vadd.f32 %v1580_v36, %v2137_v15 }
 0x212   : > { %v1240_v18 = vadd.f32 %v1239_v12, %v1176_v27  ;;  %v1581_v31 = vpop.f32.mrb[4].mxu0  ;;  %v1273_v14 = vrot.slane %v1237_v26, 1  ;;  %v1298_v35 = vrot.slane %v1237_v26, 2 }
 0x213   : > { %v1582_v10 = vpop.f32.mrb[5].mxu0 }
 0x214   : > { %v1274_v38 = vrot.slane %v1240_v18, 1  ;;  %v1299_v28 = vrot.slane %v1240_v18, 2  ;;  %v1583_v51 = vadd.f32 %v1582_v10, %v1581_v31  ;;  %v1584_v2 = vpop.f32.mrb[6].mxu0 }
 0x215   : > { %v1585_v41 = vpop.f32.mrb[7].mxu0 }
 0x216   : > { %v1181_v4 = vadd.f32 %v1583_v51, %v2137_v15  ;;  %v1586_v33 = vadd.f32 %v1585_v41, %v1584_v2  ;;  %v1275_v57 = vsel %vm694_vm3, %v1273_v14, %v1274_v38  ;;  %v1300_v42 = vsel %vm1297_vm13, %v1298_v35, %v1299_v28 }
 0x217   : > { %v1290_v45 = vmax.f32 %v1237_v26, %v1275_v57 }
 0x218   : > { %v1245_v30 = vadd.f32 %v1618_v20, %v1181_v4  ;;  %v1184_v32 = vadd.f32 %v1586_v33, %v2137_v15 }
 0x219   : > { %v1317_v46 = vmax.f32 %v1290_v45, %v1300_v42 }
 0x21a   : > { %v1276_v56 = vrot.slane %v1245_v30, 1  ;;  %v1301_v39 = vrot.slane %v1245_v30, 2  ;;  %v1248_v40 = vadd.f32 %v1619_v8, %v1184_v32  ;;  %v1587_v9 = vpop.f32.mrb[8].mxu0 }
 0x21b   : > { %v1588_v47 = vpop.f32.mrb[9].mxu0  ;;  %v1329_v37 = vrot.slane %v1317_v46, 7 }
 0x21c   : > { %v1277_v34 = vsel %vm694_vm3, %v1274_v38, %v1276_v56  ;;  %v1278_v48 = vrot.slane %v1248_v40, 1  ;;  %v1303_v44 = vrot.slane %v1248_v40, 2  ;;  %v1589_v24 = vadd.f32 %v1588_v47, %v1587_v9  ;;  %v1590_v49 = vpop.f32.mrb[10].mxu0 }
 0x21d   : > { %v1591_v50 = vpop.f32.mrb[11].mxu0  ;;  %v1291_v52 = vmax.f32 %v1240_v18, %v1277_v34  ;;  %v1302_v11 = vsel %vm1297_vm13, %v1299_v28, %v1301_v39 }
 0x21e   : > { %v1279_v53 = vsel %vm694_vm3, %v1276_v56, %v1278_v48  ;;  %v1304_v54 = vsel %vm1297_vm13, %v1301_v39, %v1303_v44  ;;  %v1189_v55 = vadd.f32 %v1589_v24, %v2137_v15  ;;  %v1592_v59 = vadd.f32 %v1591_v50, %v1590_v49 }
 0x21f   : > { %v1292_v60 = vmax.f32 %v1245_v30, %v1279_v53  ;;  %v1318_v61 = vmax.f32 %v1291_v52, %v1302_v11  ;;  %v1370_v11 = vld [vmem:[%s2186_s6 + $0x8] sm:$0x1] }
 0x220   : > { %v1253_v3 = vadd.f32 %v1252_v0, %v1189_v55  ;;  %v1192_v21 = vadd.f32 %v1592_v59, %v2137_v15 }
 0x221   : > { %v1319_v43 = vmax.f32 %v1292_v60, %v1304_v54  ;;  %v1330_v62 = vrot.slane %v1318_v61, 7  ;;  %v1350_v8 = vrot.slane %v1318_v61, 6 }
 0x222   : > { %v1280_v63 = vrot.slane %v1253_v3, 1  ;;  %v1305_v58 = vrot.slane %v1253_v3, 2  ;;  %v1256_v1 = vadd.f32 %v1255_v7, %v1192_v21 }
 0x223   : > { %v1331_v20 = vsel %vm599_vm5, %v1329_v37, %v1330_v62  ;;  %v1332_v6 = vrot.slane %v1319_v43, 7  ;;  %v1351_v12 = vrot.slane %v1319_v43, 6 }
 0x224   : > { %v1281_v25 = vsel %vm694_vm3, %v1278_v48, %v1280_v63  ;;  %v1306_v13 = vsel %vm1297_vm13, %v1303_v44, %v1305_v58  ;;  %v1282_v5 = vrot.slane %v1256_v1, 1  ;;  %v1307_v0 = vrot.slane %v1256_v1, 2  ;;  %v1593_v16 = vpop.f32.mrb[12].mxu0 }
 0x225   : > { %v1293_v17 = vmax.f32 %v1248_v40, %v1281_v25  ;;  %v1594_v19 = vpop.f32.mrb[13].mxu0  ;;  %v1333_v22 = vsel %vm599_vm5, %v1330_v62, %v1332_v6  ;;  %v1343_v23 = vmax.f32 %v1317_v46, %v1331_v20  ;;  %v1352_v7 = vsel %vm1349_vm14, %v1350_v8, %v1351_v12 }
 0x226   : > { %v1283_v36 = vsel %vm694_vm3, %v1280_v63, %v1282_v5  ;;  %v1308_v26 = vsel %vm1297_vm13, %v1305_v58, %v1307_v0  ;;  %v1595_v27 = vadd.f32 %v1594_v19, %v1593_v16  ;;  %v1596_v18 = vpop.f32.mrb[14].mxu0  ;;  %v1344_v35 = vmax.f32 %v1318_v61, %v1333_v22 }
 0x227   : > { %v1320_v31 = vmax.f32 %v1293_v17, %v1306_v13  ;;  %v1294_v14 = vmax.f32 %v1253_v3, %v1283_v36  ;;  %v1597_v10 = vpop.f32.mrb[15].mxu0  ;;  %v1364_v38 = vmax.f32 %v1343_v23, %v1352_v7  ;;  %v1295_v56 = vmax.f32 %v1256_v1, %v1282_v5 }
 0x228   : > { %v1197_v28 = vadd.f32 %v1595_v27, %v2137_v15 }
 0x229   : > { %v1321_v51 = vmax.f32 %v1294_v14, %v1308_v26  ;;  %v1353_v2 = vrot.slane %v1320_v31, 6  ;;  %v1334_v41 = vrot.slane %v1320_v31, 7 }
 0x22a   : > { %v1261_v4 = vadd.f32 %v2128_v29, %v1197_v28 }
 0x22b   : > { %v1354_v33 = vsel %vm1349_vm14, %v1351_v12, %v1353_v2  ;;  %v1335_v57 = vsel %vm599_vm5, %v1332_v6, %v1334_v41  ;;  %v1336_v42 = vrot.slane %v1321_v51, 7  ;;  %v1355_v45 = vrot.slane %v1321_v51, 6 }
 0x22c   : > { %v1309_v30 = vrot.slane %v1261_v4, 2  ;;  %v1365_v32 = vmax.f32 %v1344_v35, %v1354_v33  ;;  %v1345_v46 = vmax.f32 %v1319_v43, %v1335_v57 }
 0x22d   : > { %v1337_v39 = vsel %vm599_vm5, %v1334_v41, %v1336_v42  ;;  %v1356_v40 = vsel %vm1349_vm14, %v1353_v2, %v1355_v45  ;;  %v1347_v44 = vmax.f32 %v1321_v51, %v1336_v42 }
 0x22e   : > { %v1310_v15 = vsel %vm1297_vm13, %v1307_v0, %v1309_v30  ;;  %v1637_v9 = vpack.c.bf16 %v1365_v32, %v1364_v38  ;;  %v1346_v47 = vmax.f32 %v1320_v31, %v1337_v39  ;;  %v1366_v34 = vmax.f32 %v1345_v46, %v1356_v40 }
 0x22f   : > { %v1322_v29 = vmax.f32 %v1295_v56, %v1310_v15 }
 0x230   : > { %1638 = vmatprep.subr.bf16.mxu1 %v1637_v9 }
 0x231   : > { %v1357_v48 = vrot.slane %v1322_v29, 6  ;;  %1640 = vmatpush3.bf16.msra.mxu1 %v1637_v9 }
 0x233   : > { %v1358_v24 = vsel %vm1349_vm14, %v1355_v45, %v1357_v48  ;;  %v1368_v49 = vmax.f32 %v1347_v44, %v1357_v48 }
 0x234   : > { %v1367_v50 = vmax.f32 %v1346_v47, %v1358_v24 }
 0x236   : > { %v1641_v52 = vpack.c.bf16 %v1367_v50, %v1366_v34 }
 0x238   : > { %1642 = vmatprep.subr.bf16.mxu1 %v1641_v52 }
 0x239   : > { %1644 = vmatpush3.bf16.msra.mxu1 %v1641_v52 }
 0x23a   : > { %1632 = vmatprep.subr.msk.mxu1 %vm599_vm5, %v1368_v49 }
 0x23d   : > { %1633 = vmatpush3.msk.msra.mxu1 %vm599_vm5, %v1368_v49 }
 0x23e   : > { %1635 = vmatmul.mubr.msk.f32.vlgmr.msra.gmra.mrb[8].mxu1 %vm1371_vm12, %v1370_v11 }
 0x311   : > { %v1636_v53 = vpop.f32.mrb[8].mxu1 }
 0x312   : > { %1458 = vst.msk [vmem:[%s305_s21 + $0x8] sm:$0x1] %vm1457_vm15, %v1636_v53  ;;  %v1447_v54 = vpop.f32.mrb[9].mxu1 }
 0x313   : > { %1456 = vst.msk [vmem:[%s305_s21] sm:$0xff] %vm908_vm4, %v1447_v54 }
 0x314 PF: > { %s18_s27 = sadd.s32 1, %s1696_s27  }
 0x315   : > { %p15_p4 = scmp.ge.s32.totalorder %s18_s27, 4  }
 0x317   :  { %17 = sbr.rel (!%p15_p4) target bundleno = 1 (0x1), region = 82 }

// kernel: simple_metric_embedding_forward.11
= control target key start
LH: loop header
LB: loop body
LE: loop exit
PB: predicated region body
PF: predicated region fallthrough
CT: control target
= control target key end

     0   :  { %15 = vsyncpa [#allocation4], 0  ;;  %s1332_s0 = inlined_call_operand.vmem [shape: f32[1,64], index: 0, kind: input, shape index: {}]   ;;  %s1333_s1 = inlined_call_operand.vmem [shape: f32[1,32], index: 1, kind: input, shape index: {}]   ;;  %s1334_s2 = inlined_call_operand.vmem [shape: f32[1,32], index: 2, kind: input, shape index: {}]   ;;  %s1335_s3 = inlined_call_operand.vmem [shape: bf16[288,32], index: 3, kind: input, shape index: {}]   ;;  %s1336_s4 = inlined_call_operand.vmem [shape: f32[1,32], index: 4, kind: input, shape index: {}]   ;;  %s1337_s5 = inlined_call_operand.vmem [shape: bf16[9,2], index: 5, kind: input, shape index: {}]   ;;  %s1338_s6 = inlined_call_operand.<no memory space> [shape: f32[1,1], index: 6, kind: input, shape index: {}]   ;;  %s1339_s7 = inlined_call_operand.vmem [shape: f32[2,9,32], index: 7, kind: input, shape index: {}]   ;;  %s1340_s8 = inlined_call_operand.hbm [shape: f32[2,1,32], index: 8, kind: output, shape index: {}]  }
   0x1   :  { %17 = vsyncpa [#allocation4 + $0x1], 0  ;;  %s1123_s27 = smov 0   ;;  %s1125_s28 = smov 0  }
   0x2   :  { %s1127_s29 = smov 0   ;;  %s1129_s30 = smov 0  }
   0x3 LB: > { %s1144_s6 = sadd.s32 4294967295, %s1067_s30   ;;  %s870_s9 = sadd.s32 4294967294, %s1067_s30   ;;  %s1067_s30 = sphi %s1129_s30, %s1346_s30   ;;  %s1063_s29 = sphi %s1127_s29, %s1345_s29   ;;  %s1059_s28 = sphi %s1125_s28, %s1344_s28   ;;  %s1055_s27 = sphi %s1123_s27, %s1343_s27  }
   0x4   : > { %s1148_s10 = sadd.s32 1, %s1067_s30   ;;  %s203_s11 = sadd.s32 1, %s1063_s29 }
   0x5   : > { %s200_s12 = ssub.s32 %s1067_s30, %s1148_s10  ;;  %p213_p0 = scmp.ne.s32.totalorder %s1063_s29, %s1059_s28 }
   0x6   : > { %p201_p1 = scmp.eq.s32.totalorder %s200_s12, 0  ;;  %p214_p2 = scmp.eq.s32.totalorder %s1144_s6, 1 }
   0x7   : > { %p219_p3 = scmp.ne.s32.totalorder %s1059_s28, %s1055_s27  ;;  %p220_p4 = scmp.eq.s32.totalorder %s870_s9, 1 }
   0x8   : > { %s1159_s13 = scalar_select %p201_p1, %s1063_s29, %s203_s11  }
   0x9   : > { %p1161_p5 = por %p214_p2, %p213_p0  ;;  %p1165_p6 = por %p220_p4, %p219_p3 }
   0xa   : > { %p873_p7 = scmp.ge.s32.totalorder %s1067_s30, 1  ;;  %p267_p8 = scmp.lt.s32.totalorder %s1067_s30, 3 }
   0xc   : > { %p268_p9 = pnand %p873_p7, %p267_p8 }
   0xd   : > { %v352_v0 = vld [vmem:[%s1337_s5 + $0x4] sm:$0x1] (!%p268_p9)  ;;  %v1069_v1 = vmov (!%p268_p9), 1   ;;  %v306_v2 = vld [vmem:[%s1332_s0] sm:$0x1] (!%p268_p9)  ;;  %v1070_v5 = vmov (!%p268_p9), 0   ;;  %v321_v16 = vlaneseq (!%p268_p9) }
   0xe   : > { %271 = sbr.rel (%p268_p9) target bundleno = 547 (0x223), region = 52  ;;  %983 = vset.pattern.permute.xlu1 (!%p268_p9), %v1069_v1  ;;  %982 = vset.pattern.permute.xlu0 (!%p268_p9), %v1069_v1  ;;  %v308_v3 = vadd.f32 (!%p268_p9), 1e-05, %v306_v2  ;;  %v351_v4 = vld [vmem:[%s1337_s5] sm:$0xf] (!%p268_p9)  ;;  %s1071_s22 = smov (!%p268_p9), 96  }
   0xf   : > { %397 = vperm.xlu1 (!%p268_p9), %983, %v352_v0   ;;  %v985_v7 = vld [vmem:[%s1335_s3 + $0x80] sm:$0xff] (!%p268_p9)   ;;  %v1072_v8 = vmov (!%p268_p9), 0.0   ;;  %v986_v9 = vld [vmem:[%s1335_s3 + $0x88] sm:$0xff] (!%p268_p9)   ;;  %vm1073_vm0 = vmmov (!%p268_p9), 0   ;;  %v991_v14 = vld [vmem:[%s1335_s3 + $0x50] sm:$0xff] (!%p268_p9)   ;;  %p300_p10 = scmp.lt.s32.totalorder (!%p268_p9), %s1144_s6, 1 }
  0x10   : > { %1003 = vrsqrt.f32 (!%p268_p9), %v308_v3  ;;  %927 = vmatprep.subr.bf16.mxu1 (!%p268_p9), %v1072_v8  ;;  %931 = vmatprep.mubr.msk.bf16.mxu1 (!%p268_p9), %vm1073_vm0, %v1072_v8  ;;  %v987_v10 = vld [vmem:[%s1335_s3 + $0x40] sm:$0xff] (!%p268_p9)   ;;  %v989_v12 = vld [vmem:[%s1335_s3 + $0x48] sm:$0xff] (!%p268_p9)   ;;  %v992_v15 = vld [vmem:[%s1335_s3 + $0x10] sm:$0xff] (!%p268_p9)   ;;  %v322_v17 = vshrl.u32 (!%p268_p9), %v321_v16, 7  ;;  %v1074_v18 = vmov (!%p268_p9), 839922192  }
  0x11   : > { %928 = vmatpush3.bf16.msra.mxu1 (!%p268_p9), %v985_v7  ;;  %v988_v11 = vld [vmem:[%s1335_s3] sm:$0xff] (!%p268_p9)   ;;  %902 = vmatprep.subr.bf16.mxu0 (!%p268_p9), %v987_v10  ;;  %v990_v13 = vld [vmem:[%s1335_s3 + $0x8] sm:$0xff] (!%p268_p9)   ;;  %v359_v19 = vunpack.c.l.s4 (!%p268_p9), %v1074_v18  ;;  %v993_v41 = vld [vmem:[%s1335_s3 + $0x58] sm:$0xff] (!%p268_p9)   ;;  %vm347_vm1 = vcmask (!%p268_p9), 1040384   ;;  %vm348_vm2 = vsmask.f32 (!%p268_p9), 256 }
  0x12   : > { %929 = vmatprep.subr.bf16.mxu1 (!%p268_p9), %v1072_v8  ;;  %903 = vmatpush3.bf16.msra.mxu0 (!%p268_p9), %v988_v11  ;;  %v307_v20 = vld [vmem:[%s1333_s1] sm:$0x1] (!%p268_p9)  ;;  %v323_v21 = vsub.s32 (!%p268_p9), 0, %v322_v17  ;;  %v994_v42 = vld [vmem:[%s1335_s3 + $0x18] sm:$0xff] (!%p268_p9)   ;;  %vm342_vm3 = vcmask (!%p268_p9), 1043456   ;;  %vm349_vm4 = vmand (!%p268_p9), %vm347_vm1, %vm348_vm2  ;;  %vm494_vm5 = vcmask (!%p268_p9), 1044480  }
  0x13   : > { %984 = vset.pattern.permute.xlu1 (!%p268_p9), %v1070_v5  ;;  %904 = vmatprep.subr.bf16.mxu0 (!%p268_p9), %v989_v12  ;;  %v360_v23 = vunpack.c.0.s8 (!%p268_p9), %v359_v19  ;;  %v315_v26 = vld [vmem:[%s1334_s2] sm:$0x1] (!%p268_p9)  ;;  %v997_v3 = vld [vmem:[%s1335_s3 + $0x68] sm:$0xff] (!%p268_p9)   ;;  %vm521_vm6 = vcmask (!%p268_p9), 261120   ;;  %vm468_vm7 = vcmask (!%p268_p9), 1045504   ;;  %s1075_s20 = smov (!%p268_p9), 64  }
  0x14   : > { %355 = vperm.xlu1 (!%p268_p9), %984, %v351_v4   ;;  %v995_v52 = vld [vmem:[%s1335_s3 + $0x60] sm:$0xff] (!%p268_p9)   ;;  %s1076_s16 = smov (!%p268_p9), 32   ;;  %vm472_vm8 = vsmask.f32 (!%p268_p9), 5376  ;;  %vm500_vm9 = vsmask.f32 (!%p268_p9), 4352 }
  0x15   : > { %930 = vmatpush3.bf16.msra.mxu1 %v986_v9  ;;  %s301_s26 = scalar_select %p300_p10, %s1144_s6, 1  ;;  %v363_v31 = vsub.s32 %v360_v23, %v322_v17  ;;  %v996_v53 = vld [vmem:[%s1335_s3 + $0x20] sm:$0xff]   ;;  %v999_v23 = vld [vmem:[%s1335_s3 + $0x70] sm:$0xff]   ;;  %vm525_vm10 = vcmask 523264   ;;  %vm528_vm11 = vcmask 785408   ;;  %vm800_vm12 = vcmask 253952  }
  0x16   : > { %905 = vmatpush3.bf16.msra.mxu0 %v990_v13  ;;  %s898_s19 = sshll.u32 %s1144_s6, 4  ;;  %s1077_s6 = smov [#allocation3]  }
  0x17   : > { %906 = vmatprep.subr.bf16.mxu0 %v991_v14  ;;  %s901_s12 = sshll.u32 %s301_s26, 4  ;;  %s1290_s25 = scalar_lea.hbm %s1340_s8, %s898_s19 }
  0x18   : > { %367 = vperm.xlu1 %984, %v352_v0   ;;  %s304_s18 = scalar_lea.vmem %s1339_s7, %s901_s12  ;;  %s1009_s11 = sshll.u32 %s1077_s6, 4  ;;  %s1010_s11 = int_to_ptr.vmem [resolvable:$false] %s1009_s11 }
  0x19   : > { %v318_v29 = vld [vmem:[%s304_s18] sm:$0xff]  ;;  %v319_v30 = vld [vmem:[%s304_s18 + $0x8] sm:$0x1]  ;;  %s298_s18 = sand.u32 1, %s1059_s28   ;;  %s1011_s12 = scalar_lea.vmem %s1010_s11, 32 }
  0x1a   : > { %v1004_v6 = vpop.eup %1003  ;;  %907 = vmatpush3.bf16.msra.mxu0 %v992_v15  ;;  %s803_s26 = scalar_lea.sflag [#allocation4], %s298_s18 }
  0x1b   : > { %311 = vrot.lane.b32.xlu0 %v1004_v6, %s1071_s22  ;;  %908 = vmatprep.subr.bf16.mxu0 %v993_v41 }
  0x1e   : > { %909 = vmatpush3.bf16.msra.mxu0 %v994_v42 }
  0x1f   : > { %386 = vperm.xlu0 %982, %v351_v4   ;;  %910 = vmatprep.subr.bf16.mxu0 %v995_v52  ;;  %v998_v4 = vld [vmem:[%s1335_s3 + $0x28] sm:$0xff]  }
  0x22   : > { %911 = vmatpush3.bf16.msra.mxu0 %v996_v53 }
  0x23   : > { %912 = vmatprep.subr.bf16.mxu0 %v997_v3 }
  0x26   : > { %913 = vmatpush3.bf16.msra.mxu0 %v998_v4 }
  0x27   : > { %914 = vmatprep.subr.bf16.mxu0 %v999_v23 }
  0x8d   : > { %v312_v22 = vpop.permute.xlu0 %311 }
  0x8e   : > { %v398_v24 = vpop.permute.xlu1 %397  ;;  %v314_v25 = vmul.f32 %v312_v22, %v307_v20 }
  0x8f   : > { %v406_v59 = vrot.slane %v398_v24, %v363_v31  ;;  %v1000_v24 = vld [vmem:[%s1335_s3 + $0x30] sm:$0xff]  }
  0x90   : > { %v316_v27 = vmul.f32 %v314_v25, %v306_v2  ;;  %v324_v28 = vrot.slane %v314_v25, %v323_v21  ;;  %915 = vmatpush3.bf16.msra.mxu0 %v1000_v24 }
  0x92   : > { %v317_v32 = vsub.f32 %v315_v26, %v316_v27  ;;  %v326_v34 = vmul.f32 %v324_v28, %v318_v29  ;;  %v327_v35 = vmul.f32 %v324_v28, %v319_v30 }
  0x93   : > { %v356_v33 = vpop.permute.xlu1 %355 }
  0x94   : > { %v332_v36 = vrot.slane %v317_v32, %v323_v21  ;;  %v364_v37 = vrot.slane %v356_v33, %v363_v31  ;;  %v1001_v33 = vld [vmem:[%s1335_s3 + $0x78] sm:$0xff]  }
  0x95   : > { %916 = vmatprep.subr.bf16.mxu0 %v1001_v33 }
  0x96   : > { %v334_v38 = vadd.f32 %v332_v36, %v326_v34  ;;  %v335_v39 = vadd.f32 %v332_v36, %v327_v35 }
  0x97   : > { %v368_v40 = vpop.permute.xlu1 %367 }
  0x98   : > { %v376_v43 = vrot.slane %v368_v40, %v363_v31  ;;  %v336_v44 = vmax.f32 %v334_v38, 0.0  ;;  %v337_v45 = vmax.f32 %v335_v39, 0.0  ;;  %v1002_v38 = vld [vmem:[%s1335_s3 + $0x38] sm:$0xff]  }
  0x99   : > { %917 = vmatpush3.bf16.msra.mxu0 %v1002_v38 }
  0x9a   : > { %v1222_v46 = vcombine.low %v364_v37, %v376_v43  ;;  %v338_v47 = vpack.c.bf16 %v337_v45, %v336_v44 }
  0x9c   : > { %v416_v48 = vshrl.u32 %v1222_v46, 16  ;;  %v419_v49 = vshll.u32 %v1222_v46, 16  ;;  %v436_v50 = vrot.slane %v1222_v46, 3  ;;  %v340_v51 = vrot.slane %v338_v47, 4 }
  0x9d   : > { %v382_v14 = vrot.slane %v1222_v46, 6 }
  0x9e   : > { %v418_v54 = vrot.slane %v416_v48, 4  ;;  %v421_v55 = vrot.slane %v419_v49, 5  ;;  %v1234_v56 = vsel %vm342_vm3, 0, %v340_v51  ;;  %v1236_v57 = vsel %vm349_vm4, %v340_v51, 0  ;;  %v387_v58 = vpop.permute.xlu0 %386 }
  0x9f   : > { %v395_v60 = vrot.slane %v387_v58, %v363_v31  ;;  %v438_v61 = vmul.bf16 %v436_v50, %v1234_v56  ;;  %v439_v62 = vmul.bf16 %v436_v50, %v1236_v57  ;;  %v444_v5 = vshrl.u32 %v1234_v56, 16 }
  0xa0   : > { %v422_v63 = vor.u32 %v421_v55, %v418_v54  ;;  %v446_v6 = vshll.u32 %v1234_v56, 16  ;;  %v505_v13 = vshrl.u32 %v1236_v57, 16  ;;  %v508_v22 = vshll.u32 %v1236_v57, 16 }
  0xa1   : > { %v877_v0 = vcombine.low %v395_v60, %v406_v59  ;;  %v495_v1 = vrot.slane %v438_v61, 3  ;;  %v496_v2 = vrot.slane %v439_v62, 3  ;;  %v501_v21 = vrot.slane %v444_v5, 3 }
  0xa2   : > { %v424_v12 = vmul.bf16 %v422_v63, %v1234_v56  ;;  %v448_v20 = vrot.slane %v446_v6, 1  ;;  %v502_v28 = vrot.slane %v446_v6, 4  ;;  %v384_v32 = vmul.bf16 %v382_v14, %v1234_v56 }
  0xa3   : > { %v426_v7 = vshrl.u32 %v877_v0, 16  ;;  %v429_v8 = vshll.u32 %v877_v0, 16  ;;  %v440_v9 = vrot.slane %v877_v0, 2  ;;  %v497_v10 = vsel %vm494_vm5, %v495_v1, %v496_v2 }
  0xa4   : > { %498 = vrot.lane.b32.xlu0 %v497_v10, %s1075_s20  ;;  %v412_v11 = vrot.slane %v877_v0, 5  ;;  %v457_v30 = vshrl.u32 %v424_v12, 16  ;;  %v460_v31 = vshll.u32 %v424_v12, 16  ;;  %v507_v37 = vrot.slane %v505_v13, 3 }
  0xa5   : > { %v428_v15 = vrot.slane %v426_v7, 3  ;;  %v431_v16 = vrot.slane %v429_v8, 4  ;;  %v442_v17 = vmul.bf16 %v440_v9, %v1234_v56  ;;  %v443_v18 = vmul.bf16 %v440_v9, %v1236_v57 }
  0xa6   : > { %v414_v19 = vmul.bf16 %v412_v11, %v1234_v56  ;;  %v449_v40 = vor.u32 %v448_v20, %v444_v5  ;;  %v469_v41 = vrot.slane %v1234_v56, 2  ;;  %v470_v42 = vrot.slane %v1236_v57, 2 }
  0xa7   : > { %v518_v25 = vrot.slane %v442_v17, 4  ;;  %v519_v26 = vrot.slane %v443_v18, 4  ;;  %v432_v27 = vor.u32 %v431_v16, %v428_v15  ;;  %v459_v47 = vrot.slane %v457_v30, 1  ;;  %v878_v17 = vld [vmem:[%s1336_s4] ss:$0 sm:$0xff] }
  0xa8   : > { %v453_v29 = vrot.slane %v414_v19, 1  ;;  %v462_v48 = vrot.slane %v460_v31, 2  ;;  %v510_v49 = vrot.slane %v508_v22, 4  ;;  %v471_v50 = vsel %vm468_vm7, %v469_v41, %v470_v42 }
  0xa9   : > { %v520_v34 = vsel %vm342_vm3, %v518_v25, %v519_v26  ;;  %v434_v35 = vmul.bf16 %v432_v27, %v1234_v56  ;;  %v435_v36 = vmul.bf16 %v432_v27, %v1236_v57  ;;  %v503_v59 = vor.u32 %v502_v28, %v501_v21 }
  0xaa   : > { %454 = vrot.lane.b32.xlu1 %v453_v29, %s1075_s20  ;;  %v585_v39 = vrot.slane %v520_v34, 2  ;;  %v463_v57 = vor.u32 %v462_v48, %v459_v47  ;;  %v511_v60 = vor.u32 %v510_v49, %v507_v37  ;;  %s299_s20 = scalar_lea.vmem [#allocation3], %s298_s18 }
  0xab   : > { %v474_v43 = vshrl.u32 %v434_v35, 16  ;;  %v477_v44 = vshll.u32 %v434_v35, 16  ;;  %v482_v45 = vshrl.u32 %v435_v36, 16  ;;  %v485_v46 = vshll.u32 %v435_v36, 16  ;;  %s815_s21 = sshll.u32 %s299_s20, 4  ;;  %s1292_s21 = int_to_ptr.vmem [resolvable:$true] %s815_s21 }
  0xac   : > { %932 = vmatmul.mubr.msk.bf16.vlgmr.msra.gmra.mrb[0].mxu1 %vm521_vm6, %v585_v39  ;;  %v512_v61 = vsel %vm500_vm9, %v503_v59, %v511_v60  ;;  %s1005_s9 = scalar_lea.vmem %s1292_s21, 16  ;;  %p1012_p0 = scmp.lt.s32.totalorder %s1292_s21, %s1010_s11 }
  0xad   : > { %v476_v51 = vrot.slane %v474_v43, 2  ;;  %v479_v52 = vrot.slane %v477_v44, 3  ;;  %v484_v53 = vrot.slane %v482_v45, 2  ;;  %v487_v54 = vrot.slane %v485_v46, 3  ;;  %p1006_p11 = scmp.ne.s32.totalorder %s1292_s21, %s1005_s9  ;;  %p1013_p1 = scmp.lt.s32.totalorder %s1011_s12, %s1005_s9 }
  0xae   : > { %450 = vrot.lane.b32.xlu1 %v449_v40, %s1076_s16 }
  0xaf   : > { %v480_v55 = vor.u32 %v479_v52, %v476_v51  ;;  %v488_v56 = vor.u32 %v487_v54, %v484_v53  ;;  %p1007_p12 = pnand %p1006_p11, %p1161_p5  ;;  %p1014_p2 = por %p1013_p1, %p1012_p0 }
  0xb1   : > { %v489_v58 = vsel %vm472_vm8, %v480_v55, %v488_v56  ;;  %p1008_p13 = pneg %p1007_p12 }
  0xb2   : > { %464 = vrot.lane.b32.xlu1 %v463_v57, %s1071_s22  ;;  %490 = vrot.lane.b32.xlu0 %v489_v58, %s1076_s16 }
  0xb3   : > { %p1015_p3 = pnand %p1014_p2, %p1008_p13 }
  0xb6   : > { %513 = vrot.lane.b32.xlu0 %v512_v61, %s1071_s22 }
 0x116   : > { %v499_v63 = vpop.permute.xlu0 %498 }
 0x11c   : > { %v455_v62 = vpop.permute.xlu1 %454 }
 0x120   : > { %v451_v0 = vpop.permute.xlu1 %450 }
 0x121   : > { %v524_v1 = vsel %vm521_vm6, %v384_v32, %v451_v0 }
 0x122   : > { %v527_v5 = vsel %vm525_vm10, %v524_v1, %v455_v62 }
 0x124   : > { %v491_v2 = vpop.permute.xlu0 %490  ;;  %v465_v3 = vpop.permute.xlu1 %464 }
 0x125   : > { %v533_v4 = vsel %vm521_vm6, %v471_v50, %v491_v2  ;;  %v530_v6 = vsel %vm528_vm11, %v527_v5, %v465_v3 }
 0x126   : > { %v535_v8 = vsel %vm525_vm10, %v533_v4, %v499_v63  ;;  %v583_v11 = vrot.slane %v530_v6, 2 }
 0x128   : > { %v514_v7 = vpop.permute.xlu0 %513 }
 0x129   : > { %v537_v9 = vsel %vm528_vm11, %v535_v8, %v514_v7 }
 0x12a   : > { %v584_v10 = vrot.slane %v537_v9, 2 }
 0x12c   : > { %731 = vmatprep.mubr.bf16.mxu0 %v584_v10 }
 0x12d   : > { %732 = vmatmul.mubr.bf16.vlgmr.msra.gmra.mrb[0].mxu0 %v583_v11 }
 0x17f   : > { %v774_v12 = vpop.f32.mrb[0].mxu1 }
 0x180   : > { %v933_v13 = vpop.f32.mrb[1].mxu1 }
 0x181   : > { %v777_v14 = vpop.f32.mrb[2].mxu1 }
 0x182   : > { %v934_v15 = vpop.f32.mrb[3].mxu1 }
 0x200   : > { %v918_v16 = vpop.f32.mrb[0].mxu0 }
 0x201   : > { %v919_v18 = vpop.f32.mrb[1].mxu0 }
 0x202   : > { %v920_v19 = vadd.f32 %v919_v18, %v918_v16  ;;  %v921_v20 = vpop.f32.mrb[2].mxu0 }
 0x203   : > { %v922_v21 = vpop.f32.mrb[3].mxu0 }
 0x204   : > { %v734_v22 = vadd.f32 %v920_v19, %v878_v17  ;;  %v923_v23 = vadd.f32 %v922_v21, %v921_v20 }
 0x206   : > { %v775_v24 = vadd.f32 %v774_v12, %v734_v22  ;;  %v737_v25 = vadd.f32 %v923_v23, %v878_v17 }
 0x208   : > { %v782_v26 = vrot.slane %v775_v24, 1  ;;  %v778_v27 = vadd.f32 %v777_v14, %v737_v25  ;;  %v787_v29 = vrot.slane %v775_v24, 2 }
 0x20a   : > { %v784_v28 = vmax.f32 %v775_v24, %v782_v26  ;;  %v788_v30 = vrot.slane %v778_v27, 2 }
 0x20c   : > { %v789_v31 = vsel %vm468_vm7, %v787_v29, %v788_v30 }
 0x20d   : > { %v791_v32 = vmax.f32 %v784_v28, %v789_v31 }
 0x20f   : > { %v793_v33 = vrot.slane %v791_v32, 3  ;;  %v796_v35 = vrot.slane %v791_v32, 6 }
 0x211   : > { %v795_v34 = vmax.f32 %v791_v32, %v793_v33 }
 0x213   : > { %v798_v36 = vmax.f32 %v795_v34, %v796_v35 }
 0x215   : > { %801 = vst.msk [vmem:[%s299_s20] sm:$0x1] %vm800_vm12, %v798_v36 }
 0x216   : > { %1018 = shalt.err (!%p1015_p3)
}
 0x217   : > { %s1019_s16 = scalar_lea.hbm %s1290_s25, 16  ;;  %s1023_s18 = scalar_lea.hbm %s1340_s8, 32 }
 0x218   : > { %p1020_p4 = scmp.ne.s32.totalorder %s1290_s25, %s1019_s16  ;;  %p1024_p9 = scmp.lt.u32.totalorder %s1290_s25, %s1340_s8 }
 0x219   : > { %p1025_p10 = scmp.lt.u32.totalorder %s1023_s18, %s1019_s16  ;;  %p1027_p12 = scmp.lt.u32.totalorder %s1019_s16, %s1290_s25 }
 0x21a   : > { %p1021_p7 = pnand %p1020_p4, %p1161_p5 }
 0x21b   : > { %p1026_p11 = por %p1025_p10, %p1024_p9 }
 0x21c   : > { %p1022_p8 = pneg %p1021_p7 }
 0x21d   : > { %p1028_p13 = por %p1027_p12, %p1026_p11 }
 0x21f   : > { %p1029_p0 = pnand %p1028_p13, %p1022_p8 }
 0x221   : > { %1032 = shalt.err (!%p1029_p0)
}
 0x222   : > { %935 = dma.vmem_to_hbm [thread:$0]  (%p1161_p5), %s1292_s21, 16, %s1290_s25, %s803_s26  }
 0x223 PF: > { %p941_p1 = scmp.ge.s32.totalorder %s1067_s30, 2  ;;  %s827_s23 = sand.u32 1, %s1055_s27  }
 0x224   : > { %s828_s24 = scalar_lea.sflag [#allocation4], %s827_s23 }
 0x225   : > { %p938_p2 = pnand %p941_p1, %p1165_p6 }
 0x227   : > { %1050 = dma.done.wait (!%p938_p2), %s828_s24, 16  }
 0x228   : > { %1052 = vsyncadd (!%p938_p2), %s828_s24, 4294967280  ;;  %p20_p3 = scmp.ge.s32.totalorder %s1148_s10, 4   ;;  %s1343_s27 = smov %s1059_s28 }
 0x229   : > { %s1344_s28 = smov %s1063_s29  ;;  %s1345_s29 = smov %s1159_s13 }
 0x22a   : > { %s1346_s30 = smov %s1148_s10  ;;  %22 = sbr.rel (!%p20_p3) target bundleno = 3 (0x3), region = 87 }
 0x231   :  { %832 = vsyncpa [#allocation4], 1 }
 0x232   :  { %834 = vsyncpa [#allocation4 + $0x1], 1 }

// kernel: simple_metric_embedding_forward.7
= control target key start
LH: loop header
LB: loop body
LE: loop exit
PB: predicated region body
PF: predicated region fallthrough
CT: control target
= control target key end

     0   :  { %s4028_s27 = smov 0   ;;  %s6000_s0 = inlined_call_operand.vmem [shape: f32[1,8], index: 0, kind: input, shape index: {}]   ;;  %s6001_s1 = inlined_call_operand.vmem [shape: f32[1,4], index: 1, kind: input, shape index: {}]   ;;  %s6002_s2 = inlined_call_operand.vmem [shape: f32[1,4], index: 2, kind: input, shape index: {}]   ;;  %s6003_s3 = inlined_call_operand.vmem [shape: bf16[36,32], index: 3, kind: input, shape index: {}]   ;;  %s6004_s4 = inlined_call_operand.vmem [shape: f32[1,32], index: 4, kind: input, shape index: {}]   ;;  %s6005_s5 = inlined_call_operand.vmem [shape: bf16[256,2], index: 5, kind: input, shape index: {}]   ;;  %s6006_s6 = inlined_call_operand.vmem [shape: f32[49,222], index: 6, kind: input, shape index: {}]   ;;  %s6007_s7 = inlined_call_operand.vmem [shape: f32[2,256,4], index: 7, kind: input, shape index: {}]   ;;  %s6008_s8 = inlined_call_operand.vmem [shape: f32[2,49,32], index: 8, kind: output, shape index: {}]  }
   0x1 LB: > { %s3716_s28 = sadd.s32 4294967295, %s3967_s27   ;;  %p3720_p0 = scmp.ge.s32.totalorder %s3967_s27, 1  ;;  %s3967_s27 = sphi %s4028_s27, %s18_s27  }
   0x2   : > { %p262_p1 = scmp.lt.s32.totalorder %s3967_s27, 3 }
   0x4   : > { %p263_p2 = pnand %p3720_p0, %p262_p1 }
   0x6   : > { %266 = sbr.rel (%p263_p2) target bundleno = 1060 (0x424), region = 52 }
   0xd   : > { %v547_v0 = vld [vmem:[%s6005_s5 + $0x4] sm:$0xf]  ;;  %v546_v1 = vld [vmem:[%s6005_s5] sm:$0xf]  ;;  %v3969_v2 = vmov 1   ;;  %s3970_s23 = smov 124   ;;  %v352_v35 = vlaneseq }
   0xe   : > { %3940 = vset.pattern.permute.xlu1 %v3969_v2  ;;  %3939 = vset.pattern.permute.xlu0 %v3969_v2  ;;  %v4047_v3 = vld [vmem:[%s6000_s0] sm:$0x1]  ;;  %v548_v4 = vld [vmem:[%s6005_s5 + $0x8] sm:$0xf]  ;;  %v550_v5 = vld [vmem:[%s6005_s5 + $0x10] sm:$0xf] }
   0xf   : > { %1232 = vperm.xlu1 %3940, %v547_v0   ;;  %1221 = vperm.xlu0 %3939, %v546_v1   ;;  %v309_v6 = vadd.f32 1e-05, %v4047_v3  ;;  %v549_v7 = vld [vmem:[%s6005_s5 + $0xc] sm:$0xf]  ;;  %v551_v8 = vld [vmem:[%s6005_s5 + $0x14] sm:$0xf] }
  0x10   : > { %v553_v10 = vld [vmem:[%s6005_s5 + $0x1c] sm:$0xf]  ;;  %v552_v11 = vld [vmem:[%s6005_s5 + $0x18] sm:$0xf]  ;;  %v555_v12 = vld [vmem:[%s6005_s5 + $0x24] sm:$0xf] }
  0x11   : > { %3959 = vrsqrt.f32 %v309_v6  ;;  %v3971_v13 = vmov 0   ;;  %v559_v14 = vld [vmem:[%s6005_s5 + $0x34] sm:$0xf]  ;;  %v563_v15 = vld [vmem:[%s6005_s5 + $0x44] sm:$0xf]  ;;  %v353_v38 = vshrl.u32 %v352_v35, 7 }
  0x12   : > { %v567_v16 = vld [vmem:[%s6005_s5 + $0x54] sm:$0xf]  ;;  %v554_v17 = vld [vmem:[%s6005_s5 + $0x20] sm:$0xf]  ;;  %v571_v18 = vld [vmem:[%s6005_s5 + $0x64] sm:$0xf] }
  0x13   : > { %1243 = vperm.xlu1 %3940, %v548_v4   ;;  %1265 = vperm.xlu0 %3939, %v550_v5   ;;  %v556_v19 = vld [vmem:[%s6005_s5 + $0x28] sm:$0xf]  ;;  %v575_v20 = vld [vmem:[%s6005_s5 + $0x74] sm:$0xf]  ;;  %v557_v21 = vld [vmem:[%s6005_s5 + $0x2c] sm:$0xf] }
  0x14   : > { %v558_v22 = vld [vmem:[%s6005_s5 + $0x30] sm:$0xf]  ;;  %v560_v23 = vld [vmem:[%s6005_s5 + $0x38] sm:$0xf]  ;;  %v561_v24 = vld [vmem:[%s6005_s5 + $0x3c] sm:$0xf] }
  0x15   : > { %v562_v25 = vld [vmem:[%s6005_s5 + $0x40] sm:$0xf]  ;;  %v564_v26 = vld [vmem:[%s6005_s5 + $0x48] sm:$0xf]  ;;  %v565_v27 = vld [vmem:[%s6005_s5 + $0x4c] sm:$0xf] }
  0x16   : > { %v568_v28 = vld [vmem:[%s6005_s5 + $0x58] sm:$0xf]  ;;  %v572_v29 = vld [vmem:[%s6005_s5 + $0x68] sm:$0xf]  ;;  %v566_v30 = vld [vmem:[%s6005_s5 + $0x50] sm:$0xf] }
  0x17   : > { %1254 = vperm.xlu1 %3940, %v549_v7   ;;  %v4134_v31 = vld [vmem:[%s6005_s5 + $0x7c] sm:$0xf]  ;;  %v3972_v33 = vmov 839922192   ;;  %v570_v36 = vld [vmem:[%s6005_s5 + $0x60] sm:$0xf] }
  0x18   : > { %v569_v32 = vld [vmem:[%s6005_s5 + $0x5c] sm:$0xf]  ;;  %v584_v34 = vunpack.c.l.s4 %v3972_v33  ;;  %p296_p3 = scmp.lt.s32.totalorder %s3716_s28, 1  ;;  %v4153_v42 = vld [vmem:[%s6005_s5 + $0x6c] sm:$0xf]  ;;  %v354_v50 = vsub.s32 0, %v353_v38 }
  0x19   : > { %v308_v47 = vld [vmem:[%s6001_s1] sm:$0x1]  ;;  %vm1652_vm0 = vsmask.f32 4352  ;;  %vm491_vm1 = vcmask 1043456   ;;  %s3973_s22 = smov 4  }
  0x1a   : > { %v585_v37 = vunpack.c.0.s8 %v584_v34  ;;  %s6110_s28 = smov (!%p296_p3, %s3716_s28), 1  ;;  %v316_v55 = vld [vmem:[%s6002_s2] sm:$0x1]  ;;  %vm1898_vm2 = vsmask.f32 7424  ;;  %vm2083_vm3 = vcmask 1046528  }
  0x1b   : > { %1276 = vperm.xlu1 %3940, %v551_v8   ;;  %v3960_v9 = vpop.eup %3959  ;;  %s3786_s12 = sshll.u32 %s6110_s28, 8  ;;  %vm1042_vm4 = vsmask.f32 3328  ;;  %s3975_s24 = smov 12   ;;  %vm3005_vm5 = vcmask 1041408   ;;  %vm2497_vm6 = vcmask 31744  }
  0x1c   : > { %312 = vrot.lane.b32.xlu0 %v3960_v9, %s3970_s23  ;;  %v4148_v39 = vsub.s32 %v585_v37, %v353_v38  ;;  %s4172_s15 = scalar_lea.vmem %s6007_s7, %s3786_s12  ;;  %s3974_s23 = smov 8   ;;  %vm2549_vm7 = vcmask 64512   ;;  %vm2584_vm8 = vcmask 97280   ;;  %vm2619_vm9 = vcmask 130048  }
  0x1d   : > { %v319_v62 = vld [vmem:[%s4172_s15] sm:$0xff]  ;;  %v321_v6 = vld [vmem:[%s4172_s15 + $0x10] sm:$0xff]  ;;  %s3976_s25 = smov 16   ;;  %s3977_s26 = smov 20   ;;  %vm2654_vm10 = vcmask 162816   ;;  %vm2689_vm11 = vcmask 195584  }
  0x1e   : > { %s3978_s29 = smov 24   ;;  %s3979_s30 = smov 28   ;;  %vm2724_vm12 = vcmask 228352   ;;  %vm2759_vm13 = vcmask 261120   ;;  %vm2956_vm14 = vcmask 293888   ;;  %vm3330_vm15 = vcmask 1045504  }
  0x1f   : > { %1298 = vperm.xlu1 %3940, %v553_v10   ;;  %s3980_s11 = smov 32  }
  0x20   : > { %1287 = vperm.xlu0 %3939, %v552_v11  }
  0x23   : > { %3941 = vset.pattern.permute.xlu1 %v3971_v13 }
  0x24   : > { %592 = vperm.xlu1 %3941, %v547_v0   ;;  %1320 = vperm.xlu0 %3939, %v555_v12  }
  0x28   : > { %604 = vperm.xlu1 %3941, %v548_v4   ;;  %1364 = vperm.xlu0 %3939, %v559_v14  }
  0x2c   : > { %628 = vperm.xlu1 %3941, %v550_v5   ;;  %1408 = vperm.xlu0 %3939, %v563_v15   ;;  %v320_v5 = vld [vmem:[%s4172_s15 + $0x8] sm:$0xff] }
  0x30   : > { %3942 = vset.pattern.permute.xlu1 %v3969_v2  ;;  %1452 = vperm.xlu0 %3939, %v567_v16  }
  0x31   : > { %1309 = vperm.xlu1 %3942, %v554_v17  }
  0x34   : > { %1496 = vperm.xlu0 %3939, %v571_v18  }
  0x35   : > { %1331 = vperm.xlu1 %3942, %v556_v19  }
  0x38   : > { %1540 = vperm.xlu0 %3939, %v575_v20  }
  0x39   : > { %1342 = vperm.xlu1 %3942, %v557_v21  }
  0x3c   : > { %3953 = vset.pattern.permute.xlu0 %v3971_v13 }
  0x3d   : > { %3943 = vset.pattern.permute.xlu1 %v3971_v13  ;;  %580 = vperm.xlu0 %3953, %v546_v1  }
  0x3e   : > { %664 = vperm.xlu1 %3943, %v553_v10  }
  0x41   : > { %616 = vperm.xlu0 %3953, %v549_v7   ;;  %v322_v7 = vld [vmem:[%s4172_s15 + $0x18] sm:$0xff] }
  0x42   : > { %676 = vperm.xlu1 %3943, %v554_v17  }
  0x45   : > { %640 = vperm.xlu0 %3953, %v551_v8   ;;  %v323_v8 = vld [vmem:[%s4172_s15 + $0x20] sm:$0xff] }
  0x46   : > { %3944 = vset.pattern.permute.xlu1 %v3969_v2 }
  0x47   : > { %1353 = vperm.xlu1 %3944, %v558_v22  }
  0x49   : > { %652 = vperm.xlu0 %3953, %v552_v11  }
  0x4b   : > { %1375 = vperm.xlu1 %3944, %v560_v23  }
  0x4d   : > { %688 = vperm.xlu0 %3953, %v555_v12  }
  0x4f   : > { %1386 = vperm.xlu1 %3944, %v561_v24  }
  0x51   : > { %700 = vperm.xlu0 %3953, %v556_v19   ;;  %v324_v19 = vld [vmem:[%s4172_s15 + $0x28] sm:$0xff] }
  0x53   : > { %3945 = vset.pattern.permute.xlu1 %v3971_v13 }
  0x54   : > { %712 = vperm.xlu1 %3945, %v557_v21  }
  0x55   : > { %736 = vperm.xlu0 %3953, %v559_v14  }
  0x58   : > { %724 = vperm.xlu1 %3945, %v558_v22  }
  0x59   : > { %748 = vperm.xlu0 %3953, %v560_v23  }
  0x5c   : > { %3946 = vset.pattern.permute.xlu1 %v3969_v2 }
  0x5d   : > { %1397 = vperm.xlu1 %3946, %v562_v25   ;;  %784 = vperm.xlu0 %3953, %v563_v15  }
  0x61   : > { %1419 = vperm.xlu1 %3946, %v564_v26   ;;  %796 = vperm.xlu0 %3953, %v564_v26  }
  0x65   : > { %1430 = vperm.xlu1 %3946, %v565_v27   ;;  %832 = vperm.xlu0 %3953, %v567_v16  }
  0x69   : > { %3947 = vset.pattern.permute.xlu1 %v3971_v13  ;;  %844 = vperm.xlu0 %3953, %v568_v28  }
  0x6a   : > { %760 = vperm.xlu1 %3947, %v561_v24   ;;  %v4206_v24 = vld [vmem:[%s6005_s5 + $0x78] sm:$0xf] }
  0x6d   : > { %880 = vperm.xlu0 %3953, %v571_v18  }
  0x6e   : > { %772 = vperm.xlu1 %3947, %v562_v25  }
  0x71   : > { %892 = vperm.xlu0 %3953, %v572_v29  }
  0x72   : > { %3948 = vset.pattern.permute.xlu1 %v3969_v2 }
  0x73   : > { %1441 = vperm.xlu1 %3948, %v566_v30  }
  0x75   : > { %928 = vperm.xlu0 %3953, %v575_v20  }
  0x77   : > { %1463 = vperm.xlu1 %3948, %v568_v28  }
  0x79   : > { %952 = vperm.xlu0 %3953, %v4134_v31  }
  0x7b   : > { %1474 = vperm.xlu1 %3948, %v569_v32  }
  0x7d   : > { %3955 = vset.pattern.permute.xlu0 %v3969_v2 }
  0x7f   : > { %3949 = vset.pattern.permute.xlu1 %v3971_v13 }
  0x80   : > { %808 = vperm.xlu1 %3949, %v565_v27  }
  0x84   : > { %820 = vperm.xlu1 %3949, %v566_v30  }
  0x88   : > { %3950 = vset.pattern.permute.xlu1 %v3969_v2 }
  0x89   : > { %1485 = vperm.xlu1 %3950, %v570_v36  }
  0x8d   : > { %1507 = vperm.xlu1 %3950, %v572_v29  }
  0x8e   : > { %v1233_v40 = vpop.permute.xlu1 %1232  ;;  %v1222_v41 = vpop.permute.xlu0 %1221 }
  0x8f   : > { %v1241_v43 = vrot.slane %v1233_v40, %v4148_v39  ;;  %v1230_v44 = vrot.slane %v1222_v41, %v4148_v39 }
  0x91   : > { %1518 = vperm.xlu1 %3950, %v4153_v42   ;;  %v3740_v48 = vcombine.low %v1230_v44, %v1241_v43 }
  0x92   : > { %v1244_v45 = vpop.permute.xlu1 %1243  ;;  %v1266_v46 = vpop.permute.xlu0 %1265 }
  0x93   : > { %v1252_v52 = vrot.slane %v1244_v45, %v4148_v39  ;;  %v1654_v56 = vshrl.u32 %v3740_v48, 16  ;;  %v1274_v59 = vrot.slane %v1266_v46, %v4148_v39  ;;  %v1657_v10 = vshll.u32 %v3740_v48, 16 }
  0x95   : > { %3951 = vset.pattern.permute.xlu1 %v3971_v13  ;;  %v1656_v9 = vrot.slane %v1654_v56, 3  ;;  %v1659_v38 = vrot.slane %v1657_v10, 4 }
  0x96   : > { %856 = vperm.xlu1 %3951, %v569_v32   ;;  %v1255_v49 = vpop.permute.xlu1 %1254  ;;  %v313_v51 = vpop.permute.xlu0 %312 }
  0x97   : > { %v1263_v53 = vrot.slane %v1255_v49, %v4148_v39  ;;  %v315_v54 = vmul.f32 %v313_v51, %v308_v47 }
  0x99   : > { %v3741_v57 = vcombine.low %v1252_v52, %v1263_v53  ;;  %v317_v58 = vmul.f32 %v315_v54, %v4047_v3  ;;  %v4179_v60 = vrot.slane %v315_v54, %v354_v50  ;;  %v4189_v3 = vld [vmem:[%s6005_s5 + $0x70] sm:$0xf] }
  0x9a   : > { %868 = vperm.xlu1 %3951, %v570_v36   ;;  %v1277_v61 = vpop.permute.xlu1 %1276 }
  0x9b   : > { %v1662_v63 = vshrl.u32 %v3741_v57, 16  ;;  %v1665_v0 = vshll.u32 %v3741_v57, 16  ;;  %v318_v1 = vsub.f32 %v316_v55, %v317_v58  ;;  %v1285_v4 = vrot.slane %v1277_v61, %v4148_v39  ;;  %v325_v57 = vld [vmem:[%s4172_s15 + $0x30] sm:$0xff] }
  0x9c   : > { %v357_v15 = vmul.f32 %v4179_v60, %v319_v62  ;;  %v358_v16 = vmul.f32 %v4179_v60, %v320_v5  ;;  %v359_v17 = vmul.f32 %v4179_v60, %v321_v6  ;;  %v360_v18 = vmul.f32 %v4179_v60, %v322_v7 }
  0x9d   : > { %v4192_v11 = vrot.slane %v318_v1, %v354_v50  ;;  %v3742_v12 = vcombine.low %v1274_v59, %v1285_v4  ;;  %v1664_v20 = vrot.slane %v1662_v63, 3  ;;  %v1667_v21 = vrot.slane %v1665_v0, 4  ;;  %v326_v63 = vld [vmem:[%s4172_s15 + $0x38] sm:$0xff] }
  0x9e   : > { %3952 = vset.pattern.permute.xlu1 %v3969_v2  ;;  %v1299_v14 = vpop.permute.xlu1 %1298  ;;  %v361_v23 = vmul.f32 %v4179_v60, %v323_v8  ;;  %v362_v33 = vmul.f32 %v4179_v60, %v324_v19  ;;  %v4222_v58 = vor.u32 %v1659_v38, %v1656_v9  ;;  %v363_v8 = vmul.f32 %v4179_v60, %v325_v57 }
  0x9f   : > { %v1307_v22 = vrot.slane %v1299_v14, %v4148_v39  ;;  %1529 = vperm.xlu1 %3952, %v4189_v3   ;;  %v1288_v2 = vpop.permute.xlu0 %1287  ;;  %v395_v25 = vadd.f32 %v4192_v11, %v357_v15  ;;  %v396_v26 = vadd.f32 %v4192_v11, %v358_v16  ;;  %v397_v27 = vadd.f32 %v4192_v11, %v359_v17 }
  0xa0   : > { %v398_v28 = vadd.f32 %v4192_v11, %v360_v18  ;;  %v1671_v29 = vshrl.u32 %v3742_v12, 16  ;;  %v1674_v30 = vshll.u32 %v3742_v12, 16  ;;  %v1296_v32 = vrot.slane %v1288_v2, %v4148_v39 }
  0xa1   : > { %v427_v34 = vmax.f32 %v395_v25, 0.0  ;;  %v428_v35 = vmax.f32 %v396_v26, 0.0  ;;  %v429_v36 = vmax.f32 %v397_v27, 0.0  ;;  %v399_v43 = vadd.f32 %v4192_v11, %v361_v23 }
  0xa2   : > { %v430_v37 = vmax.f32 %v398_v28, 0.0  ;;  %v3743_v40 = vcombine.low %v1296_v32, %v1307_v22  ;;  %v400_v44 = vadd.f32 %v4192_v11, %v362_v33  ;;  %v1668_v45 = vor.u32 %v1667_v21, %v1664_v20 }
  0xa3   : > { %1551 = vperm.xlu1 %3952, %v4206_v24   ;;  %v4215_v41 = vpop.permute.xlu1 %592  ;;  %v4219_v46 = vpop.permute.xlu0 %1320  ;;  %v459_v47 = vpack.c.bf16 %v428_v35, %v427_v34  ;;  %v1673_v49 = vrot.slane %v1671_v29, 3  ;;  %v431_v52 = vmax.f32 %v399_v43, 0.0  ;;  %v1676_v53 = vrot.slane %v1674_v30, 4 }
  0xa4   : > { %v460_v48 = vpack.c.bf16 %v430_v37, %v429_v36  ;;  %v1680_v50 = vshrl.u32 %v3743_v40, 16  ;;  %v1683_v51 = vshll.u32 %v3743_v40, 16  ;;  %v432_v56 = vmax.f32 %v400_v44, 0.0 }
  0xa5   : > { %v492_v54 = vrot.slane %v459_v47, 4  ;;  %v1677_v9 = vor.u32 %v1676_v53, %v1673_v49  ;;  %v364_v14 = vmul.f32 %v4179_v60, %v326_v63  ;;  %v401_v21 = vadd.f32 %v4192_v11, %v363_v8 }
  0xa6   : > { %v493_v55 = vrot.slane %v460_v48, 4  ;;  %v1682_v59 = vrot.slane %v1680_v50, 3  ;;  %v1685_v61 = vrot.slane %v1683_v51, 4  ;;  %v4236_v5 = vpack.c.bf16 %v432_v56, %v431_v52 }
  0xa7   : > { %1562 = vperm.xlu1 %3952, %v4134_v31   ;;  %v4225_v62 = vpop.permute.xlu1 %604  ;;  %v4228_v0 = vpop.permute.xlu0 %1364  ;;  %v4234_v4 = vsel %vm491_vm1, 0, %v492_v54  ;;  %v4243_v31 = vsel %vm1652_vm0, %v4222_v58, %v1668_v45  ;;  %v402_v22 = vadd.f32 %v4192_v11, %v364_v14  ;;  %v1813_v25 = vmul.bf16 0, %v4222_v58 }
  0xa8   : > { %v4231_v1 = vsel %vm491_vm1, %v492_v54, %v493_v55  ;;  %v4238_v6 = vor.u32 %v1685_v61, %v1682_v59  ;;  %v1905_v7 = vshll.u32 %v4234_v4, 16  ;;  %v495_v12 = vrot.slane %v4236_v5, 4 }
  0xa9   : > { %v1913_v10 = vshll.u32 %v4231_v1, 16  ;;  %v1909_v17 = vshrl.u32 %v4234_v4, 16  ;;  %v1814_v18 = vmul.bf16 %v4243_v31, %v4234_v4  ;;  %v4281_v32 = vsel %vm1652_vm0, %v1668_v45, %v1677_v9 }
  0xaa   : > { %v1907_v16 = vrot.slane %v1905_v7, 1  ;;  %v4260_v20 = vsel %vm1652_vm0, %v1677_v9, %v4238_v6  ;;  %v4268_v26 = vsel %vm491_vm1, %v493_v55, %v495_v12  ;;  %v433_v33 = vmax.f32 %v401_v21, 0.0 }
  0xab   : > { %3954 = vset.pattern.permute.xlu1 %v3971_v13  ;;  %v4250_v15 = vpop.permute.xlu1 %628  ;;  %v4255_v19 = vpop.permute.xlu0 %1408  ;;  %v1915_v2 = vrot.slane %v1913_v10, 1  ;;  %6035 = vst [vmem:[#allocation2_spill] sm:$0xff] %v4268_v26  ;;  %v2085_v27 = vrot.slane %v1814_v18, 1  ;;  %v1816_v28 = vmul.bf16 %v4260_v20, %v4268_v26  ;;  %v434_v34 = vmax.f32 %v402_v22, 0.0 }
  0xac   : > { %904 = vperm.xlu1 %3954, %v4153_v42   ;;  %v1911_v23 = vor.u32 %v1909_v17, %v1907_v16  ;;  %v1329_v35 = vrot.slane %v4219_v46, %v4148_v39  ;;  %v2084_v37 = vrot.slane %v1813_v25, 1  ;;  %v1815_v38 = vmul.bf16 %v4281_v32, %v4231_v1 }
  0xad   : > { %v4289_v40 = vrot.slane %v3971_v13, 1  ;;  %v2089_v44 = vrot.slane %v1816_v28, 1  ;;  %v1917_v47 = vshrl.u32 %v4231_v1, 16  ;;  %v4299_v48 = vpack.c.bf16 %v434_v34, %v433_v33 }
  0xae   : > { %v4271_v42 = vsel %vm1898_vm2, %v1911_v23, %v1915_v2  ;;  %v2086_v43 = vsel %vm2083_vm3, %v2084_v37, %v2085_v27  ;;  %v2087_v50 = vrot.slane %v1815_v38, 1  ;;  %v1921_v51 = vshll.u32 %v4268_v26, 16 }
  0xaf   : > { %v4275_v29 = vpop.permute.xlu0 %1452  ;;  %2034 = vrot.lane.b32.xlu0 %v4271_v42, %s3973_s22  ;;  %6036 = vst [vmem:[#allocation3_spill] sm:$0xff] %v4289_v40  ;;  %v1908_v52 = vsel %vm1898_vm2, %v4289_v40, %v1907_v16  ;;  %v1919_v56 = vor.u32 %v1917_v47, %v1915_v2  ;;  %v497_v59 = vrot.slane %v4299_v48, 4  ;;  %v613_v2 = vrot.slane %v4225_v62, %v4148_v39 }
  0xb0   : > { %916 = vperm.xlu1 %3954, %v4189_v3   ;;  %v1310_v30 = vpop.permute.xlu1 %1309  ;;  %v2090_v55 = vsel %vm2083_vm3, %v2087_v50, %v2089_v44  ;;  %v1923_v63 = vrot.slane %v1921_v51, 1  ;;  %v2088_v18 = vsel %vm2083_vm3, %v2085_v27, %v2087_v50  ;;  %v637_v34 = vrot.slane %v4250_v15, %v4148_v39 }
  0xb1   : > { %v1318_v36 = vrot.slane %v1310_v30, %v4148_v39  ;;  %v4329_v9 = vsel %vm491_vm1, %v495_v12, %v497_v59 }
  0xb2   : > { %v4315_v7 = vsel %vm1898_vm2, %v1919_v56, %v1923_v63  ;;  %6038 = vst [vmem:[#allocation5_spill] sm:$0xff] %v4329_v9  ;;  %v1933_v48 = vshrl.u32 %v4329_v9, 16 }
  0xb3   : > { %v3744_v3 = vcombine.low %v1318_v36, %v1329_v35  ;;  %v4292_v45 = vpop.permute.xlu0 %1496  ;;  %2117 = vrot.lane.b32.xlu0 %v2086_v43, %s3974_s23 }
  0xb4   : > { %940 = vperm.xlu1 %3954, %v4206_v24   ;;  %v4296_v46 = vpop.permute.xlu1 %1331 }
  0xb5   : > { %v1689_v49 = vshrl.u32 %v3744_v3, 16  ;;  %v1692_v13 = vshll.u32 %v3744_v3, 16 }
  0xb7   : > { %v1691_v53 = vrot.slane %v1689_v49, 3  ;;  %v1694_v54 = vrot.slane %v1692_v13, 4  ;;  %v4305_v24 = vpop.permute.xlu0 %1540  ;;  %2121 = vrot.lane.b32.xlu0 %v2090_v55, %s3974_s23 }
  0xb8   : > { %6037 = vst [vmem:[#allocation4_spill] sm:$0xff] %v4305_v24  ;;  %v4308_v57 = vpop.permute.xlu1 %1342  ;;  %2032 = vrot.lane.b32.xlu1 %v1908_v52, %s3973_s22  ;;  %v327_v52 = vld [vmem:[%s4172_s15 + $0x40] sm:$0xff] }
  0xb9   : > { %v4312_v61 = vor.u32 %v1694_v54, %v1691_v53  ;;  %v328_v53 = vld [vmem:[%s4172_s15 + $0x48] sm:$0xff] }
  0xbb   : > { %v4320_v8 = vsel %vm1652_vm0, %v4238_v6, %v4312_v61  ;;  %v601_v6 = vrot.slane %v4215_v41, %v4148_v39 }
  0xbc   : > { %2036 = vrot.lane.b32.xlu1 %v4315_v7, %s3973_s22  ;;  %v581_v10 = vpop.permute.xlu0 %580  ;;  %v1817_v16 = vmul.bf16 %v4320_v8, %v4329_v9 }
  0xbd   : > { %v4331_v14 = vpop.permute.xlu1 %664  ;;  %v589_v17 = vrot.slane %v581_v10, %v4148_v39 }
  0xbe   : > { %v4339_v21 = vrot.slane %v1817_v16, 1 }
  0xbf   : > { %v3724_v22 = vcombine.low %v589_v17, %v601_v6  ;;  %v365_v17 = vmul.f32 %v4179_v60, %v327_v52 }
  0xc0   : > { %2119 = vrot.lane.b32.xlu1 %v2088_v18, %s3974_s23  ;;  %v617_v5 = vpop.permute.xlu0 %616  ;;  %v4346_v23 = vsel %vm2083_vm3, %v2089_v44, %v4339_v21  ;;  %v366_v18 = vmul.f32 %v4179_v60, %v328_v53 }
  0xc1   : > { %v4342_v12 = vpop.permute.xlu1 %676  ;;  %v1044_v41 = vshrl.u32 %v3724_v22, 16  ;;  %v1047_v25 = vshll.u32 %v3724_v22, 16  ;;  %v625_v28 = vrot.slane %v617_v5, %v4148_v39  ;;  %v1925_v22 = vshrl.u32 %v4268_v26, 16 }
  0xc3   : > { %v1046_v27 = vrot.slane %v1044_v41, 4  ;;  %v1049_v30 = vrot.slane %v1047_v25, 5  ;;  %v3725_v33 = vcombine.low %v613_v2, %v625_v28  ;;  %v1929_v2 = vshll.u32 %v4329_v9, 16 }
  0xc4   : > { %v641_v35 = vpop.permute.xlu0 %640  ;;  %v403_v41 = vadd.f32 %v4192_v11, %v365_v17  ;;  %v404_v25 = vadd.f32 %v4192_v11, %v366_v18 }
  0xc5   : > { %v4353_v36 = vor.u32 %v1049_v30, %v1046_v27  ;;  %v1052_v37 = vshrl.u32 %v3725_v33, 16  ;;  %v1055_v38 = vshll.u32 %v3725_v33, 16  ;;  %v649_v3 = vrot.slane %v641_v35, %v4148_v39 }
  0xc6   : > { %v4356_v62 = vpop.permute.xlu1 %1353  ;;  %v1848_v27 = vmul.bf16 %v4243_v31, %v4231_v1  ;;  %v1849_v30 = vmul.bf16 %v4281_v32, %v4268_v26  ;;  %v1927_v33 = vor.u32 %v1925_v22, %v1923_v63  ;;  %v1340_v63 = vrot.slane %v4296_v46, %v4148_v39 }
  0xc7   : > { %v1054_v43 = vrot.slane %v1052_v37, 4  ;;  %v1057_v44 = vrot.slane %v1055_v38, 5  ;;  %v3726_v47 = vcombine.low %v637_v34, %v649_v3  ;;  %v1830_v49 = vmul.bf16 %v4353_v36, %v4234_v4 }
  0xc8   : > { %v1847_v34 = vmul.bf16 %v4222_v58, %v4234_v4  ;;  %v1351_v37 = vrot.slane %v4308_v57, %v4148_v39  ;;  %v1931_v38 = vrot.slane %v1929_v2, 1  ;;  %v435_v3 = vmax.f32 %v403_v41, 0.0  ;;  %v653_v52 = vpop.permute.xlu0 %652 }
  0xc9   : > { %v1058_v13 = vor.u32 %v1057_v44, %v1054_v43  ;;  %v1061_v15 = vshrl.u32 %v3726_v47, 16  ;;  %v1064_v50 = vshll.u32 %v3726_v47, 16  ;;  %2168 = vrot.lane.b32.xlu1 %v1830_v49, %s3975_s24  ;;  %v436_v43 = vmax.f32 %v404_v25, 0.0 }
  0xca   : > { %v4361_v51 = vpop.permute.xlu1 %1375  ;;  %v2261_v44 = vrot.slane %v1848_v27, 1  ;;  %v2263_v47 = vrot.slane %v1849_v30, 1  ;;  %v4404_v49 = vsel %vm1898_vm2, %v1927_v33, %v1931_v38  ;;  %v1864_v22 = vmul.bf16 %v4353_v36, %v4231_v1 }
  0xcb   : > { %v1063_v54 = vrot.slane %v1061_v15, 4  ;;  %v1066_v55 = vrot.slane %v1064_v50, 5  ;;  %v4367_v56 = vsel %vm1042_vm4, %v4353_v36, %v1058_v13  ;;  %v3745_v15 = vcombine.low %v1340_v63, %v1351_v37  ;;  %v330_v37 = vld [vmem:[%s4172_s15 + $0x58] sm:$0xff] }
  0xcc   : > { %v1831_v10 = vmul.bf16 %v4367_v56, %v4231_v1  ;;  %v4414_v50 = vpack.c.bf16 %v436_v43, %v435_v3  ;;  %v2264_v46 = vsel %vm2083_vm3, %v2261_v44, %v2263_v47  ;;  %v1881_v41 = vmul.bf16 %v4222_v58, %v4231_v1  ;;  %v329_v58 = vld [vmem:[%s4172_s15 + $0x50] sm:$0xff] }
  0xcd   : > { %v4371_v16 = vor.u32 %v1066_v55, %v1063_v54  ;;  %v1698_v55 = vshrl.u32 %v3745_v15, 16  ;;  %v1882_v25 = vmul.bf16 %v4243_v31, %v4268_v26  ;;  %v1865_v3 = vmul.bf16 %v4367_v56, %v4268_v26 }
  0xce   : > { %v4373_v6 = vpop.permute.xlu1 %1386  ;;  %2170 = vrot.lane.b32.xlu0 %v1831_v10, %s3975_s24  ;;  %v1701_v10 = vshll.u32 %v3745_v15, 16  ;;  %v499_v18 = vrot.slane %v4414_v50, 4  ;;  %v661_v43 = vrot.slane %v653_v52, %v4148_v39  ;;  %v673_v52 = vrot.slane %v4331_v14, %v4148_v39 }
  0xcf   : > { %v4381_v5 = vsel %vm1042_vm4, %v1058_v13, %v4371_v16  ;;  %v2260_v13 = vrot.slane %v1847_v34, 1  ;;  %v1700_v27 = vrot.slane %v1698_v55, 3  ;;  %v2431_v63 = vrot.slane %v1882_v25, 1 }
  0xd0   : > { %v1832_v28 = vmul.bf16 %v4381_v5, %v4268_v26  ;;  %v1703_v30 = vrot.slane %v1701_v10, 4  ;;  %v4442_v34 = vsel %vm491_vm1, %v497_v59, %v499_v18  ;;  %v1866_v31 = vmul.bf16 %v4381_v5, %v4329_v9 }
  0xd1   : > { %v2262_v53 = vsel %vm2083_vm3, %v2260_v13, %v2261_v44  ;;  %6039 = vst [vmem:[#allocation6_spill] sm:$0xff] %v4442_v34  ;;  %v1937_v59 = vshll.u32 %v4442_v34, 16  ;;  %v367_v13 = vmul.f32 %v4179_v60, %v329_v58  ;;  %v1883_v55 = vmul.bf16 %v4281_v32, %v4329_v9  ;;  %v3956_v32 = vld [vmem:[%s6003_s3] sm:$0xff]  }
  0xd2   : > { %2209 = vrot.lane.b32.xlu0 %v4271_v42, %s3976_s25  ;;  %2172 = vrot.lane.b32.xlu1 %v1832_v28, %s3975_s24  ;;  %v1850_v42 = vmul.bf16 %v4260_v20, %v4329_v9  ;;  %v689_v28 = vpop.permute.xlu0 %688  ;;  %v4458_v15 = vor.u32 %v1703_v30, %v1700_v27  ;;  %v1935_v10 = vor.u32 %v1933_v48, %v1931_v38  ;;  %v332_v48 = vld [vmem:[%s4172_s15 + $0x68] sm:$0xff] }
  0xd3   : > { %v4397_v35 = vpop.permute.xlu1 %712  ;;  %v697_v44 = vrot.slane %v689_v28, %v4148_v39  ;;  %v4474_v14 = vrot.slane %v1937_v59, 1  ;;  %v2433_v38 = vrot.slane %v1883_v55, 1  ;;  %v1884_v58 = vmul.bf16 %v4260_v20, %v4442_v34  ;;  %3806 = vmatprep.subr.bf16.mxu0 %v3956_v32 }
  0xd4   : > { %v4418_v54 = vrot.slane %v1850_v42, 1  ;;  %v368_v42 = vmul.f32 %v4179_v60, %v330_v37  ;;  %v4483_v28 = vsel %vm1652_vm0, %v4312_v61, %v4458_v15  ;;  %3807 = vmatpush3.bf16.msra.mxu0 %v3956_v32  ;;  %v1373_v50 = vrot.slane %v4228_v0, %v4148_v39 }
  0xd5   : > { %v4491_v30 = vsel %vm1898_vm2, %v1935_v10, %v4474_v14  ;;  %v2434_v20 = vsel %vm2083_vm3, %v2431_v63, %v2433_v38 }
  0xd6   : > { %2213 = vrot.lane.b32.xlu0 %v4404_v49, %s3976_s25  ;;  %2211 = vrot.lane.b32.xlu1 %v4315_v7, %s3976_s25  ;;  %v2266_v2 = vsel %vm2083_vm3, %v2263_v47, %v4418_v54  ;;  %v2430_v47 = vrot.slane %v1881_v41, 1  ;;  %v3727_v41 = vcombine.low %v661_v43, %v673_v52 }
  0xd7   : > { %v4412_v57 = vpop.permute.xlu1 %724 }
  0xd8   : > { %v1073_v61 = vshll.u32 %v3727_v41, 16 }
  0xda   : > { %2295 = vrot.lane.b32.xlu0 %v2264_v46, %s3977_s26  ;;  %2293 = vrot.lane.b32.xlu1 %v2262_v53, %s3977_s26  ;;  %v685_v46 = vrot.slane %v4342_v12, %v4148_v39  ;;  %v2432_v12 = vsel %vm2083_vm3, %v2430_v47, %v2431_v63  ;;  %v331_v47 = vld [vmem:[%s4172_s15 + $0x60] sm:$0xff]  ;;  %v1075_v10 = vrot.slane %v1073_v61, 5 }
  0xdb   : > { %v369_v63 = vmul.f32 %v4179_v60, %v331_v47 }
  0xdc   : > { %v4422_v17 = vpop.permute.xlu1 %1397  ;;  %v3728_v25 = vcombine.low %v685_v46, %v697_v44  ;;  %v3957_v46 = vld [vmem:[%s6003_s3 + $0x8] sm:$0xff]  }
  0xdd   : > { %3808 = vmatprep.subr.bf16.mxu0 %v3957_v46 }
  0xde   : > { %2344 = vrot.lane.b32.xlu0 %v1864_v22, %s3978_s29  ;;  %2297 = vrot.lane.b32.xlu1 %v2266_v2, %s3977_s26  ;;  %v405_v22 = vadd.f32 %v4192_v11, %v367_v13  ;;  %v406_v2 = vadd.f32 %v4192_v11, %v368_v42  ;;  %v1079_v43 = vshrl.u32 %v3728_v25, 16  ;;  %v1082_v44 = vshll.u32 %v3728_v25, 16  ;;  %v4517_v25 = vpop.permute.xlu0 %700 }
  0xdf   : > { %v4503_v13 = vrot.slane %v1884_v58, 1  ;;  %v1818_v42 = vmul.bf16 %v4483_v28, %v4442_v34  ;;  %3809 = vmatpush3.bf16.msra.mxu0 %v3957_v46 }
  0xe0   : > { %v4435_v33 = vpop.permute.xlu1 %1419  ;;  %v437_v37 = vmax.f32 %v405_v22, 0.0  ;;  %v1081_v22 = vrot.slane %v1079_v43, 4  ;;  %v1362_v43 = vrot.slane %v4356_v62, %v4148_v39 }
  0xe1   : > { %v4528_v61 = vrot.slane %v1818_v42, 1 }
  0xe2   : > { %2348 = vrot.lane.b32.xlu0 %v1866_v31, %s3978_s29  ;;  %2346 = vrot.lane.b32.xlu1 %v1865_v3, %s3978_s29  ;;  %v438_v31 = vmax.f32 %v406_v2, 0.0  ;;  %v1070_v3 = vshrl.u32 %v3727_v41, 16  ;;  %v1084_v2 = vrot.slane %v1082_v44, 5  ;;  %v370_v41 = vmul.f32 %v4179_v60, %v332_v48 }
  0xe4   : > { %v4464_v53 = vpop.permute.xlu1 %1430  ;;  %v4507_v52 = vpack.c.bf16 %v438_v31, %v437_v37  ;;  %v1072_v55 = vrot.slane %v1070_v3, 4  ;;  %v408_v58 = vadd.f32 %v4192_v11, %v370_v41  ;;  %v4522_v31 = vor.u32 %v1084_v2, %v1081_v22 }
  0xe6   : > { %2381 = vrot.lane.b32.xlu0 %v4404_v49, %s3979_s30  ;;  %2379 = vrot.lane.b32.xlu1 %v4315_v7, %s3979_s30  ;;  %v501_v32 = vrot.slane %v4507_v52, 4  ;;  %v1076_v37 = vor.u32 %v1075_v10, %v1072_v55  ;;  %v440_v48 = vmax.f32 %v408_v58, 0.0  ;;  %v3746_v55 = vcombine.low %v1362_v43, %v1373_v50 }
  0xe7   : > { %v721_v50 = vrot.slane %v4397_v35, %v4148_v39 }
  0xe8   : > { %v4538_v44 = vsel %vm491_vm1, %v499_v18, %v501_v32  ;;  %v4549_v52 = vsel %vm1042_vm4, %v1076_v37, %v4522_v31  ;;  %v4553_v62 = vsel %vm1042_vm4, %v4371_v16, %v1076_v37  ;;  %v737_v18 = vpop.permute.xlu0 %736  ;;  %v1710_v58 = vshll.u32 %v3746_v55, 16 }
  0xe9   : > { %v4487_v7 = vpop.permute.xlu1 %760  ;;  %6040 = vst [vmem:[#allocation7_spill] sm:$0xff] %v4538_v44  ;;  %6041 = vst [vmem:[#allocation8_spill] sm:$0xff] %v4549_v52  ;;  %v1945_v46 = vshll.u32 %v4538_v44, 16  ;;  %v1834_v16 = vmul.bf16 %v4549_v52, %v4442_v34  ;;  %v1833_v0 = vmul.bf16 %v4553_v62, %v4329_v9 }
  0xea   : > { %2463 = vrot.lane.b32.xlu0 %v2432_v12, %s3980_s11  ;;  %2383 = vrot.lane.b32.xlu1 %v4491_v30, %s3979_s30  ;;  %v407_v12 = vadd.f32 %v4192_v11, %v369_v63  ;;  %6042 = vst [vmem:[#allocation9_spill] sm:$0xff] %v4553_v62  ;;  %v1852_v63 = vmul.bf16 %v4483_v28, %v4538_v44 }
  0xeb   : > { %v1947_v41 = vrot.slane %v1945_v46, 1 }
  0xec   : > { %v439_v47 = vmax.f32 %v407_v12, 0.0  ;;  %v1707_v12 = vshrl.u32 %v3746_v55, 16  ;;  %v4579_v37 = vpop.permute.xlu0 %748  ;;  %v1712_v55 = vrot.slane %v1710_v58, 4 }
  0xed   : > { %v4500_v59 = vpop.permute.xlu1 %772 }
  0xee   : > { %2038 = vrot.lane.b32.xlu0 %v4404_v49, %s3973_s22  ;;  %2465 = vrot.lane.b32.xlu1 %v2434_v20, %s3980_s11  ;;  %v2436_v49 = vsel %vm2083_vm3, %v2433_v38, %v4503_v13  ;;  %v1395_v38 = vrot.slane %v4373_v6, %v4148_v39  ;;  %v2094_v20 = vsel %vm2083_vm3, %v4339_v21, %v4528_v61  ;;  %v1941_v6 = vshrl.u32 %v4442_v34, 16 }
  0xef   : > { %v1384_v21 = vrot.slane %v4361_v51, %v4148_v39  ;;  %v4568_v10 = vpack.c.bf16 %v440_v48, %v439_v47  ;;  %v1851_v51 = vmul.bf16 %v4320_v8, %v4442_v34  ;;  %v4585_v48 = vrot.slane %v1852_v63, 1 }
  0xf0   : > { %v1709_v46 = vrot.slane %v1707_v12, 3  ;;  %v745_v63 = vrot.slane %v737_v18, %v4148_v39  ;;  %v4611_v12 = vpop.permute.xlu0 %784 }
  0xf1   : > { %v3747_v22 = vcombine.low %v1384_v21, %v1395_v38  ;;  %v2267_v47 = vrot.slane %v1851_v51, 1  ;;  %v333_v21 = vld [vmem:[%s4172_s15 + $0x70] sm:$0xff] }
  0xf2   : > { %v4526_v3 = vpop.permute.xlu1 %1441  ;;  %2040 = vrot.lane.b32.xlu0 %v4491_v30, %s3973_s22  ;;  %2467 = vrot.lane.b32.xlu1 %v2436_v49, %s3980_s11  ;;  %v6009_v49 = vrot.slane %v4568_v10, 4 }
  0xf3   : > { %v1719_v38 = vshll.u32 %v3747_v22, 16  ;;  %v2268_v35 = vsel %vm2083_vm3, %v4418_v54, %v2267_v47  ;;  %v1949_v54 = vshrl.u32 %v4538_v44, 16 }
  0xf5   : > { %v1721_v51 = vrot.slane %v1719_v38, 4  ;;  %v1868_v38 = vmul.bf16 %v4549_v52, %v4538_v44  ;;  %v1951_v27 = vor.u32 %v1949_v54, %v1947_v41 }
  0xf6   : > { %v4545_v42 = vpop.permute.xlu1 %1463  ;;  %2125 = vrot.lane.b32.xlu0 %v2094_v20, %s3974_s23  ;;  %2123 = vrot.lane.b32.xlu1 %v4346_v23, %s3974_s23  ;;  %v1943_v23 = vor.u32 %v1941_v6, %v4474_v14  ;;  %v1716_v14 = vshrl.u32 %v3747_v22, 16  ;;  %v334_v6 = vld [vmem:[%s4172_s15 + $0x78] sm:$0xff] }
  0xf8   : > { %v4583_v43 = vsel %vm1898_vm2, %v1943_v23, %v1947_v41  ;;  %v1718_v22 = vrot.slane %v1716_v14, 3  ;;  %v2270_v23 = vsel %vm2083_vm3, %v2267_v47, %v4585_v48  ;;  %v1867_v14 = vmul.bf16 %v4553_v62, %v4442_v34 }
  0xfa   : > { %v4570_v2 = vpop.permute.xlu1 %1474  ;;  %2176 = vrot.lane.b32.xlu0 %v1834_v16, %s3975_s24  ;;  %2174 = vrot.lane.b32.xlu1 %v1833_v0, %s3975_s24  ;;  %v733_v16 = vrot.slane %v4412_v57, %v4148_v39  ;;  %v4602_v0 = vsel %vm491_vm1, %v501_v32, %v6009_v49  ;;  %v371_v32 = vmul.f32 %v4179_v60, %v333_v21 }
  0xfb   : > { %6043 = vst [vmem:[#allocation10_spill] sm:$0xff] %v4602_v0  ;;  %v1953_v18 = vshll.u32 %v4602_v0, 16  ;;  %v1885_v21 = vmul.bf16 %v4320_v8, %v4538_v44 }
  0xfc   : > { %v3730_v47 = vcombine.low %v733_v16, %v745_v63 }
  0xfd   : > { %v4635_v49 = vrot.slane %v1953_v18, 1  ;;  %v335_v18 = vld [vmem:[%s4172_s15 + $0x80] sm:$0xff] }
  0xfe   : > { %2217 = vrot.lane.b32.xlu0 %v4583_v43, %s3976_s25  ;;  %2215 = vrot.lane.b32.xlu1 %v4491_v30, %s3976_s25  ;;  %v709_v30 = vrot.slane %v4517_v25, %v4148_v39  ;;  %v372_v25 = vmul.f32 %v4179_v60, %v334_v6  ;;  %v4629_v6 = vor.u32 %v1721_v51, %v1718_v22  ;;  %v1100_v41 = vshll.u32 %v3730_v47, 16 }
  0xff   : > { %v4591_v20 = vpop.permute.xlu1 %808  ;;  %v2437_v22 = vrot.slane %v1885_v21, 1  ;;  %v1886_v51 = vmul.bf16 %v4483_v28, %v4602_v0 }
 0x100   : > { %v3729_v58 = vcombine.low %v709_v30, %v721_v50  ;;  %v1713_v50 = vor.u32 %v1712_v55, %v1709_v46  ;;  %v4641_v55 = vsel %vm1898_vm2, %v1951_v27, %v4635_v49 }
 0x101   : > { %v2438_v21 = vsel %vm2083_vm3, %v4503_v13, %v2437_v22  ;;  %v4665_v40 = vrot.slane %v1886_v51, 1  ;;  %v373_v13 = vmul.f32 %v4179_v60, %v335_v18 }
 0x102   : > { %2301 = vrot.lane.b32.xlu0 %v2270_v23, %s3977_s26  ;;  %2299 = vrot.lane.b32.xlu1 %v2268_v35, %s3977_s26  ;;  %v409_v23 = vadd.f32 %v4192_v11, %v371_v32  ;;  %v410_v35 = vadd.f32 %v4192_v11, %v372_v25  ;;  %v1088_v30 = vshrl.u32 %v3729_v58, 16  ;;  %v1091_v16 = vshll.u32 %v3729_v58, 16  ;;  %v4637_v25 = vpop.permute.xlu0 %796 }
 0x103   : > { %v4615_v57 = vpop.permute.xlu1 %820  ;;  %v1097_v32 = vshrl.u32 %v3730_v47, 16  ;;  %v4651_v58 = vsel %vm1652_vm0, %v4458_v15, %v1713_v50  ;;  %v336_v47 = vld [vmem:[%s4172_s15 + $0x88] sm:$0xff] }
 0x104   : > { %v441_v8 = vmax.f32 %v409_v23, 0.0  ;;  %v442_v46 = vmax.f32 %v410_v35, 0.0  ;;  %v1090_v27 = vrot.slane %v1088_v30, 4  ;;  %v1093_v28 = vrot.slane %v1091_v16, 5 }
 0x105   : > { %v1102_v23 = vrot.slane %v1100_v41, 5  ;;  %v1819_v15 = vmul.bf16 %v4651_v58, %v4538_v44  ;;  %v1406_v30 = vrot.slane %v4422_v17, %v4148_v39  ;;  %v374_v16 = vmul.f32 %v4179_v60, %v336_v47 }
 0x106   : > { %2352 = vrot.lane.b32.xlu0 %v1868_v38, %s3978_s29  ;;  %2350 = vrot.lane.b32.xlu1 %v1867_v14, %s3978_s29  ;;  %v4655_v14 = vsel %vm1652_vm0, %v1713_v50, %v4629_v6  ;;  %v1099_v38 = vrot.slane %v1097_v32, 4  ;;  %v4661_v35 = vpack.c.bf16 %v442_v46, %v441_v8  ;;  %v4673_v34 = vpop.permute.xlu0 %832  ;;  %v1417_v32 = vrot.slane %v4255_v19, %v4148_v39 }
 0x107   : > { %v1820_v50 = vmul.bf16 %v4655_v14, %v4602_v0  ;;  %v1094_v8 = vor.u32 %v1093_v28, %v1090_v27  ;;  %v411_v17 = vadd.f32 %v4192_v11, %v373_v13  ;;  %v412_v51 = vadd.f32 %v4192_v11, %v374_v16 }
 0x108   : > { %v4633_v63 = vpop.permute.xlu1 %1485  ;;  %v6014_v46 = vrot.slane %v4661_v35, 4  ;;  %v4687_v52 = vor.u32 %v1102_v23, %v1099_v38  ;;  %v2095_v18 = vrot.slane %v1819_v15, 1  ;;  %v3748_v47 = vcombine.low %v1406_v30, %v1417_v32 }
 0x109   : > { %v1439_v19 = vrot.slane %v4464_v53, %v4148_v39  ;;  %v1428_v27 = vrot.slane %v4435_v33, %v4148_v39  ;;  %v6045_v53 = vrot.slane %v4568_v10, 4  ;;  %v443_v15 = vmax.f32 %v411_v17, 0.0 }
 0x10a   : > { %2387 = vrot.lane.b32.xlu0 %v4641_v55, %s3979_s30  ;;  %2385 = vrot.lane.b32.xlu1 %v4583_v43, %s3979_s30  ;;  %v4700_v28 = vpop.permute.xlu0 %844  ;;  %v2096_v30 = vsel %vm2083_vm3, %v4528_v61, %v2095_v18  ;;  %v4721_v13 = vsel %vm1042_vm4, %v1094_v8, %v4687_v52  ;;  %v1728_v10 = vshll.u32 %v3748_v47, 16  ;;  %v1957_v17 = vshrl.u32 %v4602_v0, 16  ;;  %v3958_v61 = vld [vmem:[%s6003_s3 + $0x10] ss:$0 sps:$4 sm:$0x33]  }
 0x10b   : > { %v4713_v23 = vsel %vm491_vm1, %v6045_v53, %v6014_v46  ;;  %6047 = vst [vmem:[#allocation13_spill] sm:$0xff] %v4721_v13  ;;  %v3749_v16 = vcombine.low %v1428_v27, %v1439_v19  ;;  %3915 = vmatprep.subr.msk.bf16.mxu0 %vm3005_vm5, %v3958_v61 }
 0x10c   : > { %v4657_v54 = vpop.permute.xlu1 %1507  ;;  %6046 = vst [vmem:[#allocation12_spill] sm:$0xff] %v4713_v23  ;;  %v1959_v27 = vor.u32 %v1957_v17, %v4635_v49  ;;  %v1854_v53 = vmul.bf16 %v4655_v14, %v4713_v23  ;;  %v1730_v49 = vrot.slane %v1728_v10, 4  ;;  %v793_v10 = vrot.slane %v4611_v12, %v4148_v39 }
 0x10e   : > { %2042 = vrot.lane.b32.xlu0 %v4583_v43, %s3973_s22  ;;  %2469 = vrot.lane.b32.xlu1 %v2438_v21, %s3980_s11  ;;  %v2440_v43 = vsel %vm2083_vm3, %v2437_v22, %v4665_v40  ;;  %v4691_v21 = vrot.slane %v1820_v50, 1  ;;  %v4706_v22 = vsel %vm1042_vm4, %v4522_v31, %v1094_v8  ;;  %v444_v50 = vmax.f32 %v412_v51, 0.0  ;;  %v4747_v46 = vpop.permute.xlu0 %880 }
 0x10f   : > { %6044 = vst [vmem:[#allocation11_spill] sm:$0xff] %v4706_v22  ;;  %v1725_v31 = vshrl.u32 %v3748_v47, 16  ;;  %v1835_v32 = vmul.bf16 %v4706_v22, %v4538_v44  ;;  %v1961_v51 = vshll.u32 %v4713_v23, 16  ;;  %v769_v8 = vrot.slane %v4487_v7, %v4148_v39 }
 0x110   : > { %v4682_v41 = vpop.permute.xlu1 %1518  ;;  %v2098_v33 = vsel %vm2083_vm3, %v2095_v18, %v4691_v21  ;;  %v1836_v18 = vmul.bf16 %v4721_v13, %v4602_v0  ;;  %v1853_v47 = vmul.bf16 %v4651_v58, %v4602_v0  ;;  %v4740_v19 = vpack.c.bf16 %v444_v50, %v443_v15 }
 0x111   : > { %v1737_v7 = vshll.u32 %v3749_v16, 16  ;;  %v1461_v15 = vrot.slane %v4275_v29, %v4148_v39  ;;  %v1727_v50 = vrot.slane %v1725_v31, 3  ;;  %v1963_v17 = vrot.slane %v1961_v51, 1 }
 0x112   : > { %2044 = vrot.lane.b32.xlu0 %v4641_v55, %s3973_s22  ;;  %2471 = vrot.lane.b32.xlu1 %v2440_v43, %s3980_s11  ;;  %v2271_v9 = vrot.slane %v1853_v47, 1  ;;  %v4763_v31 = vrot.slane %v1854_v53, 1  ;;  %v338_v47 = vld [vmem:[%s4172_s15 + $0x98] sm:$0xff] }
 0x113   : > { %v4759_v62 = vsel %vm1898_vm2, %v1959_v27, %v1963_v17  ;;  %v1731_v27 = vor.u32 %v1730_v49, %v1727_v50 }
 0x115   : > { %v4702_v38 = vpop.permute.xlu1 %856 }
 0x116   : > { %2129 = vrot.lane.b32.xlu0 %v2098_v33, %s3974_s23  ;;  %2127 = vrot.lane.b32.xlu1 %v2096_v30, %s3974_s23  ;;  %v757_v33 = vrot.slane %v4579_v37, %v4148_v39  ;;  %v1734_v30 = vshrl.u32 %v3749_v16, 16  ;;  %v6018_v37 = vrot.slane %v4740_v19, 4  ;;  %v3007_v16 = vsel %vm3005_vm5, %v3958_v61, 0 }
 0x117   : > { %3811 = vmatpush3.bf16.msra.mxu0 %v3007_v16  ;;  %v1450_v61 = vrot.slane %v4526_v3, %v4148_v39  ;;  %v2272_v16 = vsel %vm2083_vm3, %v4585_v48, %v2271_v9 }
 0x118   : > { %v3731_v44 = vcombine.low %v757_v33, %v769_v8  ;;  %v1736_v51 = vrot.slane %v1734_v30, 3  ;;  %v1739_v8 = vrot.slane %v1737_v7, 4  ;;  %v4781_v7 = vpop.permute.xlu0 %892  ;;  %v376_v33 = vmul.f32 %v4179_v60, %v338_v47 }
 0x119   : > { %v4734_v43 = vpop.permute.xlu1 %868  ;;  %v3750_v48 = vcombine.low %v1450_v61, %v1461_v15  ;;  %v1483_v15 = vrot.slane %v4570_v2, %v4148_v39 }
 0x11a   : > { %2180 = vrot.lane.b32.xlu0 %v1836_v18, %s3975_s24  ;;  %2178 = vrot.lane.b32.xlu1 %v1835_v32, %s3975_s24  ;;  %v781_v32 = vrot.slane %v4500_v59, %v4148_v39  ;;  %v337_v59 = vld [vmem:[%s4172_s15 + $0x90] sm:$0xff]  ;;  %v1106_v30 = vshrl.u32 %v3731_v44, 16  ;;  %v1109_v3 = vshll.u32 %v3731_v44, 16  ;;  %v2274_v18 = vsel %vm2083_vm3, %v2271_v9, %v4763_v31 }
 0x11b   : > { %v375_v44 = vmul.f32 %v4179_v60, %v337_v59  ;;  %v4798_v53 = vor.u32 %v1739_v8, %v1736_v51  ;;  %v1965_v9 = vshrl.u32 %v4713_v23, 16  ;;  %v414_v47 = vadd.f32 %v4192_v11, %v376_v33 }
 0x11c   : > { %v3732_v49 = vcombine.low %v781_v32, %v793_v10  ;;  %v1108_v51 = vrot.slane %v1106_v30, 4  ;;  %v1111_v8 = vrot.slane %v1109_v3, 5  ;;  %v1887_v32 = vmul.bf16 %v4651_v58, %v4713_v23  ;;  %v4821_v2 = vpop.permute.xlu0 %928 }
 0x11d   : > { %v413_v59 = vadd.f32 %v4192_v11, %v375_v44  ;;  %v4819_v44 = vsel %vm1652_vm0, %v4629_v6, %v1731_v27  ;;  %v1743_v30 = vshrl.u32 %v3750_v48, 16  ;;  %v1746_v3 = vshll.u32 %v3750_v48, 16 }
 0x11e   : > { %v4761_v29 = vpop.permute.xlu1 %1529  ;;  %2221 = vrot.lane.b32.xlu0 %v4759_v62, %s3976_s25  ;;  %2219 = vrot.lane.b32.xlu1 %v4641_v55, %s3976_s25  ;;  %v6049_v55 = vrot.slane %v4661_v35, 4  ;;  %v1869_v35 = vmul.bf16 %v4706_v22, %v4602_v0  ;;  %v1115_v61 = vshrl.u32 %v3732_v49, 16  ;;  %v1118_v33 = vshll.u32 %v3732_v49, 16 }
 0x11f   : > { %6048 = vst [vmem:[#allocation14_spill] sm:$0xff] %v4761_v29  ;;  %v445_v58 = vmax.f32 %v413_v59, 0.0  ;;  %v1112_v49 = vor.u32 %v1111_v8, %v1108_v51  ;;  %v1745_v51 = vrot.slane %v1743_v30, 3  ;;  %v1748_v8 = vrot.slane %v1746_v3, 4 }
 0x120   : > { %v4790_v50 = vsel %vm491_vm1, %v6049_v55, %v6018_v37  ;;  %v1967_v55 = vor.u32 %v1965_v9, %v1963_v17  ;;  %v1472_v37 = vrot.slane %v4545_v42, %v4148_v39  ;;  %v446_v9 = vmax.f32 %v414_v47, 0.0  ;;  %v339_v42 = vld [vmem:[%s4172_s15 + $0xa0] sm:$0xff] }
 0x121   : > { %6050 = vst [vmem:[#allocation15_spill] sm:$0xff] %v4790_v50  ;;  %v1969_v10 = vshll.u32 %v4790_v50, 16  ;;  %v1117_v22 = vrot.slane %v1115_v61, 4  ;;  %v1888_v59 = vmul.bf16 %v4655_v14, %v4790_v50  ;;  %v1120_v47 = vrot.slane %v1118_v33, 5 }
 0x122   : > { %v4794_v12 = vpop.permute.xlu1 %1551  ;;  %2305 = vrot.lane.b32.xlu0 %v2274_v18, %s3977_s26  ;;  %2303 = vrot.lane.b32.xlu1 %v2272_v16, %s3977_s26  ;;  %v1870_v18 = vmul.bf16 %v4721_v13, %v4713_v23  ;;  %v3751_v0 = vcombine.low %v1472_v37, %v1483_v15  ;;  %v4835_v13 = vsel %vm1652_vm0, %v1731_v27, %v4798_v53 }
 0x123   : > { %6051 = vst [vmem:[#allocation16_spill] sm:$0xff] %v4794_v12  ;;  %v4827_v17 = vrot.slane %v1969_v10, 1  ;;  %v2441_v10 = vrot.slane %v1887_v32, 1  ;;  %v1821_v27 = vmul.bf16 %v4819_v44, %v4713_v23  ;;  %v817_v32 = vrot.slane %v4591_v20, %v4148_v39 }
 0x124   : > { %v4855_v15 = vpack.c.bf16 %v446_v9, %v445_v58  ;;  %v377_v14 = vmul.f32 %v4179_v60, %v339_v42  ;;  %v1752_v33 = vshrl.u32 %v3751_v0, 16  ;;  %v1755_v30 = vshll.u32 %v3751_v0, 16 }
 0x125   : > { %v829_v3 = vrot.slane %v4615_v57, %v4148_v39  ;;  %v1822_v6 = vmul.bf16 %v4835_v13, %v4790_v50  ;;  %v2442_v48 = vsel %vm2083_vm3, %v4665_v40, %v2441_v10  ;;  %v4867_v20 = vrot.slane %v1888_v59, 1 }
 0x126   : > { %v4813_v16 = vpop.permute.xlu1 %1562  ;;  %2356 = vrot.lane.b32.xlu0 %v1870_v18, %s3978_s29  ;;  %2354 = vrot.lane.b32.xlu1 %v1869_v35, %s3978_s29  ;;  %v340_v18 = vld [vmem:[%s4172_s15 + $0xa8] sm:$0xff]  ;;  %v4841_v35 = vsel %vm1898_vm2, %v1967_v55, %v4827_v17  ;;  %v4859_v55 = vpop.permute.xlu0 %952  ;;  %v415_v58 = vadd.f32 %v4192_v11, %v377_v14  ;;  %v4871_v42 = vor.u32 %v1120_v47, %v1117_v22  ;;  %v1754_v0 = vrot.slane %v1752_v33, 3  ;;  %v342_v14 = vld [vmem:[%s4172_s15 + $0xb8] sm:$0xff] }
 0x127   : > { %6052 = vst [vmem:[#allocation17_spill] sm:$0xff] %v4813_v16  ;;  %v378_v61 = vmul.f32 %v4179_v60, %v340_v18  ;;  %v2099_v18 = vrot.slane %v1821_v27, 1  ;;  %v1855_v40 = vmul.bf16 %v4819_v44, %v4790_v50  ;;  %v1749_v59 = vor.u32 %v1748_v8, %v1745_v51 }
 0x128   : > { %v6053_v22 = vrot.slane %v4637_v25, %v4148_v39  ;;  %v4893_v12 = vrot.slane %v1822_v6, 1  ;;  %v865_v51 = vrot.slane %v4702_v38, %v4148_v39  ;;  %v2444_v8 = vsel %vm2083_vm3, %v2441_v10, %v4867_v20 }
 0x129   : > { %v416_v9 = vadd.f32 %v4192_v11, %v378_v61  ;;  %v6023_v61 = vrot.slane %v4855_v15, 4  ;;  %v447_v25 = vmax.f32 %v415_v58, 0.0  ;;  %v4908_v6 = vsel %vm1042_vm4, %v1112_v49, %v4871_v42 }
 0x12a   : > { %2391 = vrot.lane.b32.xlu0 %v4841_v35, %s3979_s30  ;;  %2389 = vrot.lane.b32.xlu1 %v4759_v62, %s3979_s30  ;;  %v3733_v47 = vcombine.low %v6053_v22, %v817_v32  ;;  %v4891_v27 = vpop.permute.xlu0 %2034  ;;  %6055 = vst [vmem:[#allocation18_spill] sm:$0xff] %v4908_v6  ;;  %v4912_v38 = vsel %vm1042_vm4, %v4687_v52, %v1112_v49  ;;  %v2275_v10 = vrot.slane %v1855_v40, 1  ;;  %v1973_v52 = vshrl.u32 %v4790_v50, 16 }
 0x12b   : > { %v4849_v37 = vpop.permute.xlu1 %904  ;;  %v448_v32 = vmax.f32 %v416_v9, 0.0  ;;  %6056 = vst [vmem:[#allocation19_spill] sm:$0xff] %v4912_v38  ;;  %v1494_v58 = vrot.slane %v4633_v63, %v4148_v39  ;;  %v6057_v9 = vrot.slane %v4740_v19, 4  ;;  %v6059_v49 = vrot.slane %v4700_v28, %v4148_v39 }
 0x12c   : > { %v2102_v63 = vsel %vm2083_vm3, %v2099_v18, %v4893_v12  ;;  %v1838_v19 = vmul.bf16 %v4908_v6, %v4790_v50  ;;  %v1837_v28 = vmul.bf16 %v4912_v38, %v4713_v23 }
 0x12d   : > { %v3735_v40 = vcombine.low %v6059_v49, %v865_v51 }
 0x12e   : > { %2046 = vrot.lane.b32.xlu0 %v4759_v62, %s3973_s22  ;;  %2473 = vrot.lane.b32.xlu1 %v2442_v48, %s3980_s11  ;;  %v1757_v62 = vrot.slane %v1755_v30, 4  ;;  %v6054_v48 = vrot.slane %v4673_v34, %v4148_v39  ;;  %v2100_v34 = vsel %vm2083_vm3, %v4691_v21, %v2099_v18  ;;  %v1124_v30 = vshrl.u32 %v3733_v47, 16 }
 0x12f   : > { %v4878_v57 = vpop.permute.xlu1 %916  ;;  %v4921_v21 = vsel %vm491_vm1, %v6057_v9, %v6023_v61  ;;  %v6060_v9 = vrot.slane %v4292_v45, %v4148_v39  ;;  %v877_v45 = vrot.slane %v4734_v43, %v4148_v39 }
 0x130   : > { %v3734_v26 = vcombine.low %v829_v3, %v6054_v48  ;;  %v1127_v3 = vshll.u32 %v3733_v47, 16  ;;  %v4923_v22 = vor.u32 %v1757_v62, %v1754_v0  ;;  %v4933_v47 = vpack.c.bf16 %v448_v32, %v447_v25  ;;  %v4935_v0 = vpop.permute.xlu0 %2117 }
 0x131   : > { %v1975_v62 = vor.u32 %v1973_v52, %v4827_v17  ;;  %v1977_v18 = vshll.u32 %v4921_v21, 16  ;;  %v1856_v51 = vmul.bf16 %v4835_v13, %v4921_v21  ;;  %v1126_v25 = vrot.slane %v1124_v30, 4 }
 0x132   : > { %2048 = vrot.lane.b32.xlu0 %v4841_v35, %s3973_s22  ;;  %2475 = vrot.lane.b32.xlu1 %v2444_v8, %s3980_s11  ;;  %6058 = vst [vmem:[#allocation20_spill] sm:$0xff] %v4923_v22  ;;  %v1133_v48 = vshrl.u32 %v3734_v26, 16  ;;  %v1136_v8 = vshll.u32 %v3734_v26, 16  ;;  %v1129_v32 = vrot.slane %v1127_v3, 5  ;;  %v3752_v49 = vcombine.low %v1494_v58, %v6060_v9 }
 0x133   : > { %v4902_v33 = vpop.permute.xlu1 %940  ;;  %v4956_v17 = vsel %vm1652_vm0, %v4798_v53, %v1749_v59  ;;  %v4960_v52 = vsel %vm1652_vm0, %v1749_v59, %v4923_v22  ;;  %v1142_v30 = vshrl.u32 %v3735_v40, 16  ;;  %v1145_v3 = vshll.u32 %v3735_v40, 16 }
 0x134   : > { %v1135_v61 = vrot.slane %v1133_v48, 4  ;;  %v1138_v23 = vrot.slane %v1136_v8, 5  ;;  %v1979_v48 = vrot.slane %v1977_v18, 1  ;;  %v4969_v53 = vrot.slane %v1856_v51, 1 }
 0x135   : > { %v380_v59 = vmul.f32 %v4179_v60, %v342_v14  ;;  %v4973_v9 = vor.u32 %v1129_v32, %v1126_v25  ;;  %v1761_v40 = vshrl.u32 %v3752_v49, 16  ;;  %v1764_v24 = vshll.u32 %v3752_v49, 16 }
 0x136   : > { %2133 = vrot.lane.b32.xlu0 %v2102_v63, %s3974_s23  ;;  %2131 = vrot.lane.b32.xlu1 %v2100_v34, %s3974_s23  ;;  %v2276_v34 = vsel %vm2083_vm3, %v4763_v31, %v2275_v10  ;;  %v341_v63 = vld [vmem:[%s4172_s15 + $0xb0] sm:$0xff]  ;;  %6061 = vst [vmem:[#allocation21_spill] sm:$0xff] %v4969_v53  ;;  %v1889_v43 = vmul.bf16 %v4819_v44, %v4921_v21  ;;  %v1147_v16 = vrot.slane %v1145_v3, 5  ;;  %v6063_v32 = vrot.slane %v4933_v47, 4 }
 0x137   : > { %v4939_v26 = vpop.permute.xlu1 %2032  ;;  %v379_v8 = vmul.f32 %v4179_v60, %v341_v63  ;;  %v1139_v58 = vor.u32 %v1138_v23, %v1135_v61  ;;  %v418_v51 = vadd.f32 %v4192_v11, %v380_v59  ;;  %v1144_v63 = vrot.slane %v1142_v30, 4 }
 0x138   : > { %v6062_v14 = vrot.slane %v4747_v46, %v4148_v39  ;;  %v6064_v44 = vrot.slane %v4855_v15, 4  ;;  %v1516_v61 = vrot.slane %v4657_v54, %v4148_v39  ;;  %v2278_v46 = vsel %vm2083_vm3, %v2275_v10, %v4969_v53 }
 0x139   : > { %v417_v18 = vadd.f32 %v4192_v11, %v379_v8  ;;  %v1981_v49 = vshrl.u32 %v4921_v21, 16  ;;  %v1823_v15 = vmul.bf16 %v4956_v17, %v4921_v21  ;;  %v1763_v30 = vrot.slane %v1761_v40, 3 }
 0x13a   : > { %2184 = vrot.lane.b32.xlu0 %v1838_v19, %s3975_s24  ;;  %2182 = vrot.lane.b32.xlu1 %v1837_v28, %s3975_s24  ;;  %v4977_v19 = vpop.permute.xlu0 %2121  ;;  %v4980_v28 = vsel %vm1898_vm2, %v1975_v62, %v1979_v48  ;;  %v3736_v25 = vcombine.low %v877_v45, %v6062_v14  ;;  %v4992_v23 = vsel %vm491_vm1, %v6064_v44, %v6063_v32  ;;  %v1766_v3 = vrot.slane %v1764_v24, 4 }
 0x13b   : > { %v4967_v31 = vpop.permute.xlu1 %2036  ;;  %v1527_v54 = vrot.slane %v4682_v41, %v4148_v39  ;;  %v2445_v45 = vrot.slane %v1889_v43, 1  ;;  %v1890_v59 = vmul.bf16 %v4835_v13, %v4992_v23  ;;  %v449_v14 = vmax.f32 %v417_v18, 0.0 }
 0x13c   : > { %v450_v10 = vmax.f32 %v418_v51, 0.0  ;;  %v5014_v32 = vor.u32 %v1147_v16, %v1144_v63  ;;  %v1151_v44 = vshrl.u32 %v3736_v25, 16  ;;  %v1154_v29 = vshll.u32 %v3736_v25, 16 }
 0x13d   : > { %v5018_v24 = vsel %vm1042_vm4, %v4973_v9, %v1139_v58  ;;  %v1871_v13 = vmul.bf16 %v4912_v38, %v4790_v50  ;;  %v1824_v16 = vmul.bf16 %v4960_v52, %v4992_v23  ;;  %v2103_v43 = vrot.slane %v1823_v15, 1 }
 0x13e   : > { %2225 = vrot.lane.b32.xlu0 %v4980_v28, %s3976_s25  ;;  %2223 = vrot.lane.b32.xlu1 %v4841_v35, %s3976_s25  ;;  %v1985_v35 = vshll.u32 %v4992_v23, 16  ;;  %v3753_v18 = vcombine.low %v1516_v61, %v1527_v54  ;;  %v1872_v51 = vmul.bf16 %v4908_v6, %v4921_v21  ;;  %v1983_v63 = vor.u32 %v1981_v49, %v1979_v48  ;;  %v348_v61 = vld [vmem:[%s4172_s15 + $0xe8] sm:$0xff] }
 0x13f   : > { %v5000_v62 = vpop.permute.xlu1 %2119  ;;  %v2446_v25 = vsel %vm2083_vm3, %v4867_v20, %v2445_v45  ;;  %v5035_v41 = vor.u32 %v1766_v3, %v1763_v30  ;;  %v5041_v50 = vpack.c.bf16 %v450_v10, %v449_v14  ;;  %v1153_v15 = vrot.slane %v1151_v44, 4  ;;  %v344_v3 = vld [vmem:[%s4172_s15 + $0xc8] sm:$0xff] }
 0x140   : > { %v5009_v8 = vpop.permute.xlu0 %2170  ;;  %v5039_v22 = vrot.slane %v1985_v35, 1  ;;  %v1156_v54 = vrot.slane %v1154_v29, 5  ;;  %v5045_v6 = vrot.slane %v1890_v59, 1  ;;  %v5049_v20 = vsel %vm1042_vm4, %v1139_v58, %v5014_v32 }
 0x141   : > { %6065 = vst [vmem:[#allocation22_spill] sm:$0xff] %v5035_v41  ;;  %6067 = vst [vmem:[#allocation24_spill] sm:$0xff] %v5049_v20  ;;  %v913_v48 = vrot.slane %v4849_v37, %v4148_v39  ;;  %v5057_v30 = vrot.slane %v1824_v16, 1  ;;  %v5061_v29 = vsel %vm2083_vm3, %v4893_v12, %v2103_v43  ;;  %v1770_v35 = vshrl.u32 %v3753_v18, 16  ;;  %v347_v16 = vld [vmem:[%s4172_s15 + $0xe0] sm:$0xff] }
 0x142   : > { %2309 = vrot.lane.b32.xlu0 %v2278_v46, %s3977_s26  ;;  %2307 = vrot.lane.b32.xlu1 %v2276_v34, %s3977_s26  ;;  %v343_v46 = vld [vmem:[%s4172_s15 + $0xc0] sm:$0xff]  ;;  %6066 = vst [vmem:[#allocation23_spill] sm:$0xff] %v5045_v6  ;;  %v1773_v59 = vshll.u32 %v3753_v18, 16  ;;  %v5070_v14 = vsel %vm1042_vm4, %v4871_v42, %v4973_v9  ;;  %v925_v10 = vrot.slane %v4878_v57, %v4148_v39  ;;  %v6073_v38 = vrot.slane %v4933_v47, 4 }
 0x143   : > { %v5024_v40 = vpop.permute.xlu1 %2168  ;;  %6068 = vst [vmem:[#allocation25_spill] sm:$0xff] %v5057_v30  ;;  %v381_v58 = vmul.f32 %v4179_v60, %v343_v46  ;;  %v5082_v18 = vor.u32 %v1156_v54, %v1153_v15  ;;  %v5086_v42 = vsel %vm1898_vm2, %v1983_v63, %v5039_v22  ;;  %v2448_v57 = vsel %vm2083_vm3, %v2445_v45, %v5045_v6  ;;  %v345_v54 = vld [vmem:[%s4172_s15 + $0xd0] sm:$0xff] }
 0x144   : > { %v5037_v34 = vpop.permute.xlu0 %2209  ;;  %v382_v9 = vmul.f32 %v4179_v60, %v344_v3  ;;  %v5102_v45 = vsel %vm2083_vm3, %v2103_v43, %v5057_v30  ;;  %v5108_v3 = vrot.slane %v1770_v35, 3  ;;  %v5116_v37 = vrot.slane %v1773_v59, 4 }
 0x145   : > { %v6071_v43 = vrot.slane %v4821_v2, %v4148_v39  ;;  %v6072_v35 = vrot.slane %v5041_v50, 4  ;;  %v949_v59 = vrot.slane %v4902_v33, %v4148_v39  ;;  %v5136_v2 = vsel %vm1042_vm4, %v5014_v32, %v5082_v18  ;;  %v350_v32 = vld [vmem:[%s4172_s15 + $0xf8] sm:$0xff] }
 0x146   : > { %2360 = vrot.lane.b32.xlu0 %v1872_v51, %s3978_s29  ;;  %2358 = vrot.lane.b32.xlu1 %v1871_v13, %s3978_s29  ;;  %v5078_v13 = vadd.f32 %v4192_v11, %v381_v58  ;;  %v6070_v51 = vrot.slane %v4781_v7, %v4148_v39  ;;  %v346_v7 = vld [vmem:[%s4172_s15 + $0xd8] sm:$0xff]  ;;  %v385_v33 = vmul.f32 %v4179_v60, %v347_v16 }
 0x147   : > { %v5055_v49 = vpop.permute.xlu1 %2172  ;;  %v3738_v15 = vcombine.low %v925_v10, %v6071_v43  ;;  %v5128_v58 = vsel %vm491_vm1, %v6073_v38, %v6072_v35  ;;  %v383_v10 = vmul.f32 %v4179_v60, %v345_v54  ;;  %v384_v43 = vmul.f32 %v4179_v60, %v346_v7  ;;  %v349_v35 = vld [vmem:[%s4172_s15 + $0xf0] sm:$0xff] }
 0x148   : > { %v5074_v12 = vpop.permute.xlu0 %2213  ;;  %v3737_v46 = vcombine.low %v6070_v51, %v913_v48  ;;  %v1989_v48 = vshrl.u32 %v4992_v23, 16  ;;  %v420_v51 = vadd.f32 %v4192_v11, %v382_v9  ;;  %v451_v9 = vmax.f32 %v5078_v13, 0.0 }
 0x149   : > { %6069 = vst [vmem:[#allocation26_spill] sm:$0xff] %v5074_v12  ;;  %v386_v13 = vmul.f32 %v4179_v60, %v348_v61  ;;  %v6074_v54 = vmul.bf16 0, %v4353_v36  ;;  %v421_v30 = vadd.f32 %v4192_v11, %v383_v10  ;;  %v423_v41 = vadd.f32 %v4192_v11, %v385_v33 }
 0x14a   : > { %2395 = vrot.lane.b32.xlu0 %v5086_v42, %s3979_s30  ;;  %2393 = vrot.lane.b32.xlu1 %v4980_v28, %s3979_s30  ;;  %v1160_v20 = vshrl.u32 %v3737_v46, 16  ;;  %v1163_v47 = vshll.u32 %v3737_v46, 16  ;;  %v452_v46 = vmax.f32 %v420_v51, 0.0  ;;  %v1215_v61 = vmul.bf16 %v5136_v2, %v5128_v58 }
 0x14b   : > { %v5098_v63 = vpop.permute.xlu1 %2211  ;;  %v2500_v7 = vsel %vm2497_vm6, %v6074_v54, %v4939_v26  ;;  %v424_v16 = vadd.f32 %v4192_v11, %v386_v13  ;;  %v1172_v12 = vshll.u32 %v3738_v15, 16  ;;  %v6075_v36 = vrot.slane %v4859_v55, %v4148_v39 }
 0x14c   : > { %v5121_v44 = vpop.permute.xlu0 %2295  ;;  %v387_v51 = vmul.f32 %v4179_v60, %v349_v35  ;;  %v388_v10 = vmul.f32 %v4179_v60, %v350_v32  ;;  %v1162_v54 = vrot.slane %v1160_v20, 4  ;;  %v2551_v53 = vsel %vm2549_vm7, %v2500_v7, %v4935_v0 }
 0x14d   : > { %v3739_v26 = vcombine.low %v949_v59, %v6075_v36  ;;  %v1991_v55 = vor.u32 %v1989_v48, %v5039_v22  ;;  %v1993_v60 = vshll.u32 %v5128_v58, 16  ;;  %v455_v35 = vmax.f32 %v423_v41, 0.0 }
 0x14e   : > { %2050 = vrot.lane.b32.xlu0 %v4980_v28, %s3973_s22  ;;  %2477 = vrot.lane.b32.xlu1 %v2446_v25, %s3980_s11  ;;  %v422_v28 = vadd.f32 %v4192_v11, %v384_v43  ;;  %v1169_v25 = vshrl.u32 %v3738_v15, 16  ;;  %v1165_v43 = vrot.slane %v1163_v47, 5  ;;  %v2586_v15 = vsel %vm2584_vm8, %v2551_v53, %v5024_v40 }
 0x14f   : > { %v2294_v38 = vpop.permute.xlu1 %2293  ;;  %v425_v20 = vadd.f32 %v4192_v11, %v387_v51  ;;  %v426_v0 = vadd.f32 %v4192_v11, %v388_v10  ;;  %v5177_v47 = vpack.c.bf16 %v452_v46, %v451_v9  ;;  %v1174_v7 = vrot.slane %v1172_v12, 5 }
 0x150   : > { %v2345_v6 = vpop.permute.xlu0 %2344  ;;  %v454_v13 = vmax.f32 %v422_v28, 0.0  ;;  %v1171_v32 = vrot.slane %v1169_v25, 4  ;;  %v1178_v36 = vshrl.u32 %v3739_v26, 16  ;;  %v456_v22 = vmax.f32 %v424_v16, 0.0 }
 0x151   : > { %v6076_v53 = vmul.bf16 %v4367_v56, %v4234_v4  ;;  %v1166_v48 = vor.u32 %v1165_v43, %v1162_v54  ;;  %v1181_v51 = vshll.u32 %v3739_v26, 16  ;;  %v2621_v11 = vsel %vm2619_vm9, %v2586_v15, %v5037_v34 }
 0x152   : > { %2052 = vrot.lane.b32.xlu0 %v5086_v42, %s3973_s22  ;;  %2479 = vrot.lane.b32.xlu1 %v2448_v57, %s3980_s11  ;;  %v453_v57 = vmax.f32 %v421_v30, 0.0  ;;  %v2656_v12 = vsel %vm2654_vm10, %v2621_v11, %v2294_v38  ;;  %v457_v4 = vmax.f32 %v425_v20, 0.0  ;;  %v458_v56 = vmax.f32 %v426_v0, 0.0  ;;  %v6082_v11 = vld [vmem:[#allocation21_spill] sm:$0xff] }
 0x153   : > { %v5167_v33 = vpop.permute.xlu1 %2297  ;;  %v2503_v40 = vsel %vm2497_vm6, %v6076_v53, %v4891_v27  ;;  %v5193_v9 = vrot.slane %v1993_v60, 1  ;;  %v1858_v34 = vmul.bf16 %v4960_v52, %v5128_v58  ;;  %v1175_v28 = vor.u32 %v1174_v7, %v1171_v32 }
 0x154   : > { %v5175_v59 = vpop.permute.xlu0 %2348  ;;  %v2553_v30 = vsel %vm2549_vm7, %v2503_v40, %v5000_v62  ;;  %v1180_v25 = vrot.slane %v1178_v36, 4  ;;  %v472_v16 = vpack.c.bf16 %v454_v13, %v453_v57  ;;  %v473_v62 = vpack.c.bf16 %v456_v22, %v455_v35 }
 0x155   : > { %v1183_v26 = vrot.slane %v1181_v51, 5  ;;  %v6078_v38 = vmul.bf16 %v4381_v5, %v4231_v1  ;;  %v2588_v54 = vsel %vm2584_vm8, %v2553_v30, %v5009_v8  ;;  %v6079_v43 = vmul.bf16 %v5018_v24, %v4992_v23 }
 0x156   : > { %2137 = vrot.lane.b32.xlu0 %v5102_v45, %s3974_s23  ;;  %2135 = vrot.lane.b32.xlu1 %v5061_v29, %s3974_s23  ;;  %v6077_v45 = vmul.bf16 %v4956_v17, %v4992_v23  ;;  %v515_v29 = vrot.slane %v5177_v47, 4  ;;  %v6080_v15 = vmul.bf16 %v5070_v14, %v4921_v21  ;;  %v2691_v60 = vsel %vm2689_vm11, %v2656_v12, %v2345_v6  ;;  %v6083_v12 = vld [vmem:[#allocation26_spill] sm:$0xff] }
 0x157   : > { %v2347_v41 = vpop.permute.xlu1 %2346  ;;  %v2506_v10 = vsel %vm2497_vm6, %v6078_v38, %v4967_v31  ;;  %v2623_v1 = vsel %vm2619_vm9, %v2588_v54, %v5098_v63  ;;  %v5222_v31 = vsel %vm1042_vm4, %v5082_v18, %v1166_v48  ;;  %v5224_v8 = vpack.c.bf16 %v458_v56, %v457_v4 }
 0x158   : > { %v2382_v27 = vpop.permute.xlu0 %2381  ;;  %v2279_v46 = vrot.slane %v6077_v45, 1  ;;  %v5228_v0 = vor.u32 %v5116_v37, %v5108_v3  ;;  %v5232_v6 = vsel %vm1898_vm2, %v1991_v55, %v5193_v9  ;;  %v5234_v57 = vrot.slane %v1858_v34, 1 }
 0x159   : > { %v1873_v63 = vmul.bf16 %v5070_v14, %v4992_v23  ;;  %v2555_v18 = vsel %vm2549_vm7, %v2506_v10, %v4977_v19  ;;  %v6081_v35 = vrot.slane %v5041_v50, 4  ;;  %v517_v3 = vrot.slane %v472_v16, 4 }
 0x15a   : > { %2188 = vrot.lane.b32.xlu0 %v6079_v43, %s3975_s24  ;;  %2186 = vrot.lane.b32.xlu1 %v6080_v15, %s3975_s24  ;;  %v2590_v55 = vsel %vm2584_vm8, %v2555_v18, %v5055_v49  ;;  %v2658_v32 = vsel %vm2654_vm10, %v2623_v1, %v5121_v44  ;;  %v519_v7 = vrot.slane %v473_v62, 4  ;;  %v5256_v36 = vor.u32 %v1183_v26, %v1180_v25 }
 0x15b   : > { %v2380_v20 = vpop.permute.xlu1 %2379  ;;  %v5244_v37 = vsel %vm491_vm1, %v6081_v35, %v515_v29  ;;  %v2693_v22 = vsel %vm2689_vm11, %v2658_v32, %v2347_v41  ;;  %v5260_v49 = vsel %vm1042_vm4, %v1166_v48, %v1175_v28  ;;  %v521_v44 = vrot.slane %v5224_v8, 4 }
 0x15c   : > { %v2726_v5 = vsel %vm2724_vm12, %v2691_v60, %v2380_v20  ;;  %v2464_v47 = vpop.permute.xlu0 %2463  ;;  %v1216_v50 = vmul.bf16 %v5222_v31, %v5244_v37  ;;  %v1874_v30 = vmul.bf16 %v5018_v24, %v5128_v58  ;;  %v2625_v4 = vsel %vm2619_vm9, %v2590_v55, %v6083_v12 }
 0x15d   : > { %v2761_v13 = vsel %vm2759_vm13, %v2726_v5, %v2464_v47  ;;  %v2282_v41 = vsel %vm2083_vm3, %v2279_v46, %v5234_v57  ;;  %v1891_v48 = vmul.bf16 %v4956_v17, %v5128_v58  ;;  %v5276_v56 = vsel %vm491_vm1, %v515_v29, %v517_v3 }
 0x15e   : > { %2229 = vrot.lane.b32.xlu0 %v5232_v6, %s3976_s25  ;;  %2227 = vrot.lane.b32.xlu1 %v5086_v42, %s3976_s25  ;;  %v2806_v53 = vshrl.u32 %v2761_v13, 16  ;;  %v2809_v40 = vshll.u32 %v2761_v13, 16  ;;  %v2280_v42 = vsel %vm2083_vm3, %v6082_v11, %v2279_v46  ;;  %v2660_v34 = vsel %vm2654_vm10, %v2625_v4, %v5167_v33 }
 0x15f   : > { %v2384_v19 = vpop.permute.xlu1 %2383  ;;  %v2728_v45 = vsel %vm2724_vm12, %v2693_v22, %v2382_v27  ;;  %v1997_v16 = vshrl.u32 %v5128_v58, 16  ;;  %v1217_v46 = vmul.bf16 %v5260_v49, %v5276_v56  ;;  %v2001_v29 = vshll.u32 %v5244_v37, 16  ;;  %v6084_v22 = vld [vmem:[#allocation22_spill] sm:$0xff] }
 0x160   : > { %v5263_v51 = vpop.permute.xlu0 %2038  ;;  %v5291_v33 = vsel %vm491_vm1, %v519_v7, %v521_v44  ;;  %v5295_v62 = vsel %vm1042_vm4, %v1175_v28, %v5256_v36  ;;  %v2808_v27 = vrot.slane %v2806_v53, 3  ;;  %v2811_v26 = vrot.slane %v2809_v40, 4  ;;  %v6085_v53 = vld [vmem:[#allocation20_spill] sm:$0xff] }
 0x161   : > { %v2695_v43 = vsel %vm2689_vm11, %v2660_v34, %v5175_v59  ;;  %v1999_v15 = vor.u32 %v1997_v16, %v5193_v9  ;;  %v5303_v60 = vsel %vm491_vm1, %v517_v3, %v519_v7  ;;  %v1219_v20 = vmul.bf16 %v5256_v36, %v5291_v33 }
 0x162   : > { %2313 = vrot.lane.b32.xlu0 %v2282_v41, %s3977_s26  ;;  %2311 = vrot.lane.b32.xlu1 %v2280_v42, %s3977_s26  ;;  %v2730_v28 = vsel %vm2724_vm12, %v2695_v43, %v2384_v19  ;;  %v1218_v59 = vmul.bf16 %v5295_v62, %v5303_v60  ;;  %v2003_v18 = vrot.slane %v2001_v29, 1  ;;  %v2812_v55 = vor.u32 %v2811_v26, %v2808_v27  ;;  %v6087_v43 = vld [vmem:[#allocation14_spill] sm:$0xff] }
 0x163   : > { %v2466_v25 = vpop.permute.xlu1 %2465  ;;  %v2449_v7 = vrot.slane %v1891_v48, 1  ;;  %v5323_v40 = vsel %vm1652_vm0, %v6085_v53, %v6084_v22  ;;  %v6086_v48 = vld [vmem:[#allocation23_spill] sm:$0xff]  ;;  %v2005_v53 = vshrl.u32 %v5244_v37, 16 }
 0x164   : > { %v2763_v17 = vsel %vm2759_vm13, %v2728_v45, %v2466_v25  ;;  %v5297_v38 = vpop.permute.xlu0 %2040  ;;  %v5316_v19 = vsel %vm1898_vm2, %v1999_v15, %v2003_v18  ;;  %v1825_v25 = vmul.bf16 %v5323_v40, %v5128_v58  ;;  %v1538_v15 = vrot.slane %v6087_v43, %v4148_v39 }
 0x165   : > { %v2813_v10 = vshrl.u32 %v2763_v17, 16  ;;  %v2816_v54 = vshll.u32 %v2763_v17, 16  ;;  %v2450_v34 = vsel %vm2083_vm3, %v6086_v48, %v2449_v7  ;;  %v1842_v48 = vmul.bf16 %v5136_v2, %v5244_v37 }
 0x166   : > { %2364 = vrot.lane.b32.xlu0 %v1874_v30, %s3978_s29  ;;  %2362 = vrot.lane.b32.xlu1 %v1873_v63, %s3978_s29  ;;  %v1892_v63 = vmul.bf16 %v4960_v52, %v5244_v37  ;;  %v5333_v52 = vsel %vm1652_vm0, %v6084_v22, %v5228_v0 }
 0x167   : > { %v2815_v1 = vrot.slane %v2813_v10, 3  ;;  %v2818_v5 = vrot.slane %v2816_v54, 4  ;;  %v2468_v47 = vpop.permute.xlu1 %2467  ;;  %v1826_v16 = vmul.bf16 %v5333_v52, %v5244_v37  ;;  %v2107_v10 = vrot.slane %v1825_v25, 1 }
 0x168   : > { %v2765_v9 = vsel %vm2759_vm13, %v2730_v28, %v2468_v47  ;;  %v5313_v13 = vpop.permute.xlu0 %2125  ;;  %v5342_v45 = vrot.slane %v1892_v63, 1  ;;  %v6088_v28 = vld [vmem:[#allocation17_spill] sm:$0xff]  ;;  %v6089_v47 = vld [vmem:[#allocation4_spill] sm:$0xff] }
 0x169   : > { %v2821_v35 = vshrl.u32 %v2765_v9, 16  ;;  %v2824_v3 = vshll.u32 %v2765_v9, 16  ;;  %v2819_v32 = vor.u32 %v2818_v5, %v2815_v1  ;;  %v5358_v54 = vrot.slane %v1826_v16, 1 }
 0x16a   : > { %2399 = vrot.lane.b32.xlu0 %v5316_v19, %s3979_s30  ;;  %2397 = vrot.lane.b32.xlu1 %v5232_v6, %s3979_s30  ;;  %v2452_v26 = vsel %vm2083_vm3, %v2449_v7, %v5342_v45  ;;  %v1571_v1 = vrot.slane %v6088_v28, %v4148_v39  ;;  %v1549_v9 = vrot.slane %v6089_v47, %v4148_v39 }
 0x16b   : > { %v2823_v11 = vrot.slane %v2821_v35, 3  ;;  %v2826_v42 = vrot.slane %v2824_v3, 4  ;;  %v2124_v30 = vpop.permute.xlu1 %2123  ;;  %v2820_v12 = vsel %vm1652_vm0, %v2812_v55, %v2819_v32  ;;  %v2110_v35 = vsel %vm2083_vm3, %v2107_v10, %v5358_v54  ;;  %v6090_v3 = vld [vmem:[#allocation25_spill] sm:$0xff] }
 0x16c   : > { %3812 = vmatprep.mubr.msk.bf16.mxu0 %vm2956_vm14, %v2820_v12  ;;  %v5338_v41 = vpop.permute.xlu0 %2176  ;;  %v2108_v55 = vsel %vm2083_vm3, %v6090_v3, %v2107_v10  ;;  %v3754_v22 = vcombine.low %v1538_v15, %v1549_v9  ;;  %v2007_v16 = vor.u32 %v2005_v53, %v2003_v18  ;;  %v6094_v10 = vld [vmem:[#allocation9_spill] sm:$0xff] }
 0x16d   : > { %v5336_v4 = vor.u32 %v2826_v42, %v2823_v11  ;;  %v2009_v11 = vshll.u32 %v5276_v56, 16 }
 0x16e   : > { %2054 = vrot.lane.b32.xlu0 %v5232_v6, %s3973_s22  ;;  %2481 = vrot.lane.b32.xlu1 %v2450_v34, %s3980_s11  ;;  %v6092_v34 = vld [vmem:[#allocation24_spill] sm:$0xff]  ;;  %v1779_v28 = vshrl.u32 %v3754_v22, 16  ;;  %v1782_v47 = vshll.u32 %v3754_v22, 16 }
 0x16f   : > { %v2175_v17 = vpop.permute.xlu1 %2174  ;;  %v2828_v29 = vsel %vm1652_vm0, %v2819_v32, %v5336_v4  ;;  %v6091_v32 = vld [vmem:[#allocation16_spill] sm:$0xff]  ;;  %v1841_v25 = vmul.bf16 %v6092_v34, %v5128_v58 }
 0x170   : > { %3813 = vmatmul.mubr.msk.bf16.vlgmr.msra.gmra.mrb[0].mxu0 %vm2956_vm14, %v2828_v29  ;;  %v5354_v27 = vpop.permute.xlu0 %2217  ;;  %v1560_v7 = vrot.slane %v6091_v32, %v4148_v39  ;;  %v1859_v39 = vmul.bf16 %v5323_v40, %v5244_v37  ;;  %v1860_v29 = vmul.bf16 %v5333_v52, %v5276_v56 }
 0x172   : > { %2056 = vrot.lane.b32.xlu0 %v5316_v19, %s3973_s22  ;;  %2483 = vrot.lane.b32.xlu1 %v2452_v26, %s3980_s11  ;;  %v3755_v42 = vcombine.low %v1560_v7, %v1571_v1  ;;  %v6093_v26 = vld [vmem:[#allocation2_spill] sm:$0xff]  ;;  %v2011_v1 = vrot.slane %v2009_v11, 1  ;;  %v2283_v32 = vrot.slane %v1859_v39, 1  ;;  %v5397_v7 = vrot.slane %v1860_v29, 1 }
 0x173   : > { %v2216_v6 = vpop.permute.xlu1 %2215  ;;  %v1206_v43 = vmul.bf16 %v6094_v10, %v6093_v26 }
 0x174   : > { %v2302_v5 = vpop.permute.xlu0 %2301  ;;  %v1788_v9 = vshrl.u32 %v3755_v42, 16  ;;  %v1791_v53 = vshll.u32 %v3755_v42, 16 }
 0x175   : > { %v2509_v18 = vsel %vm2497_vm6, %v1206_v43, %v5263_v51 }
 0x176   : > { %2141 = vrot.lane.b32.xlu0 %v2110_v35, %s3974_s23  ;;  %2139 = vrot.lane.b32.xlu1 %v2108_v55, %s3974_s23  ;;  %v2557_v3 = vsel %vm2549_vm7, %v2509_v18, %v2124_v30  ;;  %v5395_v55 = vsel %vm1898_vm2, %v2007_v16, %v2011_v1  ;;  %v1781_v30 = vrot.slane %v1779_v28, 3  ;;  %v1784_v16 = vrot.slane %v1782_v47, 4 }
 0x177   : > { %v2300_v63 = vpop.permute.xlu1 %2299  ;;  %v2592_v11 = vsel %vm2584_vm8, %v2557_v3, %v2175_v17  ;;  %v1790_v39 = vrot.slane %v1788_v9, 3  ;;  %v1793_v28 = vrot.slane %v1791_v53, 4  ;;  %v2017_v18 = vshll.u32 %v5303_v60, 16 }
 0x178   : > { %v2353_v12 = vpop.permute.xlu0 %2352  ;;  %v2627_v22 = vsel %vm2619_vm9, %v2592_v11, %v2216_v6  ;;  %v2284_v6 = vsel %vm2083_vm3, %v5234_v57, %v2283_v32  ;;  %v2013_v57 = vshrl.u32 %v5276_v56, 16 }
 0x179   : > { %v2662_v29 = vsel %vm2654_vm10, %v2627_v22, %v2300_v63 }
 0x17a   : > { %2192 = vrot.lane.b32.xlu0 %v1842_v48, %s3975_s24  ;;  %2190 = vrot.lane.b32.xlu1 %v1841_v25, %s3975_s24  ;;  %v6095_v48 = vld [vmem:[#allocation5_spill] sm:$0xff]  ;;  %v6096_v25 = vld [vmem:[#allocation8_spill] sm:$0xff]  ;;  %v2015_v11 = vor.u32 %v2013_v57, %v2011_v1 }
 0x17b   : > { %v2351_v15 = vpop.permute.xlu1 %2350  ;;  %v1207_v26 = vmul.bf16 %v6096_v25, %v6095_v48  ;;  %v1876_v48 = vmul.bf16 %v5136_v2, %v5276_v56  ;;  %v1785_v25 = vor.u32 %v1784_v16, %v1781_v30  ;;  %v2019_v30 = vrot.slane %v2017_v18, 1 }
 0x17c   : > { %v2388_v35 = vpop.permute.xlu0 %2387  ;;  %v2697_v43 = vsel %vm2689_vm11, %v2662_v29, %v2351_v15 }
 0x17d   : > { %v2512_v42 = vsel %vm2497_vm6, %v1207_v26, %v5297_v38 }
 0x17e   : > { %2233 = vrot.lane.b32.xlu0 %v5395_v55, %s3976_s25  ;;  %2231 = vrot.lane.b32.xlu1 %v5316_v19, %s3976_s25  ;;  %v2559_v17 = vsel %vm2549_vm7, %v2512_v42, %v5313_v13  ;;  %v2286_v19 = vsel %vm2083_vm3, %v2283_v32, %v5397_v7  ;;  %v1875_v13 = vmul.bf16 %v6092_v34, %v5244_v37 }
 0x17f   : > { %v2386_v51 = vpop.permute.xlu1 %2385  ;;  %v2594_v47 = vsel %vm2584_vm8, %v2559_v17, %v5338_v41 }
 0x180   : > { %v5410_v10 = vpop.permute.xlu0 %2042  ;;  %v2732_v38 = vsel %vm2724_vm12, %v2697_v43, %v2386_v51  ;;  %v2629_v15 = vsel %vm2619_vm9, %v2594_v47, %v5354_v27  ;;  %v1893_v27 = vmul.bf16 %v5323_v40, %v5276_v56  ;;  %v5439_v51 = vor.u32 %v1793_v28, %v1790_v39 }
 0x181   : > { %v2664_v41 = vsel %vm2654_vm10, %v2629_v15, %v2302_v5  ;;  %v2020_v40 = vsel %vm1898_vm2, %v2015_v11, %v2019_v30 }
 0x182   : > { %2317 = vrot.lane.b32.xlu0 %v2286_v19, %s3977_s26  ;;  %2315 = vrot.lane.b32.xlu1 %v2284_v6, %s3977_s26  ;;  %v2699_v26 = vsel %vm2689_vm11, %v2664_v41, %v2353_v12  ;;  %v2453_v39 = vrot.slane %v1893_v27, 1  ;;  %v5452_v19 = vsel %vm1652_vm0, %v5228_v0, %v1785_v25  ;;  %v2021_v27 = vshrl.u32 %v5303_v60, 16 }
 0x183   : > { %v2470_v63 = vpop.permute.xlu1 %2469  ;;  %v2734_v22 = vsel %vm2724_vm12, %v2699_v26, %v2388_v35  ;;  %v1894_v35 = vmul.bf16 %v5333_v52, %v5303_v60 }
 0x184   : > { %v2767_v9 = vsel %vm2759_vm13, %v2732_v38, %v2470_v63  ;;  %v5432_v3 = vpop.permute.xlu0 %2044  ;;  %v5461_v63 = vsel %vm1652_vm0, %v1785_v25, %v5439_v51 }
 0x185   : > { %v2829_v32 = vshrl.u32 %v2767_v9, 16  ;;  %v2832_v53 = vshll.u32 %v2767_v9, 16  ;;  %v5468_v15 = vrot.slane %v1894_v35, 1  ;;  %v1827_v9 = vmul.bf16 %v5452_v19, %v5276_v56 }
 0x186   : > { %2368 = vrot.lane.b32.xlu0 %v1876_v48, %s3978_s29  ;;  %2366 = vrot.lane.b32.xlu1 %v1875_v13, %s3978_s29  ;;  %v2454_v13 = vsel %vm2083_vm3, %v5342_v45, %v2453_v39 }
 0x187   : > { %v2831_v42 = vrot.slane %v2829_v32, 3  ;;  %v2834_v5 = vrot.slane %v2832_v53, 4  ;;  %v2472_v29 = vpop.permute.xlu1 %2471  ;;  %v2456_v41 = vsel %vm2083_vm3, %v2453_v39, %v5468_v15  ;;  %v2111_v32 = vrot.slane %v1827_v9, 1 }
 0x188   : > { %v2769_v17 = vsel %vm2759_vm13, %v2734_v22, %v2472_v29  ;;  %v5445_v12 = vpop.permute.xlu0 %2129  ;;  %v2025_v22 = vshll.u32 %v5291_v33, 16  ;;  %v1843_v29 = vmul.bf16 %v5222_v31, %v5276_v56 }
 0x189   : > { %v2835_v16 = vor.u32 %v2834_v5, %v2831_v42  ;;  %v2837_v1 = vshrl.u32 %v2769_v17, 16  ;;  %v2840_v43 = vshll.u32 %v2769_v17, 16  ;;  %v2112_v26 = vsel %vm2083_vm3, %v5358_v54, %v2111_v32 }
 0x18a   : > { %2403 = vrot.lane.b32.xlu0 %v2020_v40, %s3979_s30  ;;  %2401 = vrot.lane.b32.xlu1 %v5395_v55, %s3979_s30  ;;  %v1844_v5 = vmul.bf16 %v5260_v49, %v5303_v60  ;;  %v2023_v17 = vor.u32 %v2021_v27, %v2019_v30  ;;  %v1861_v54 = vmul.bf16 %v5452_v19, %v5303_v60 }
 0x18b   : > { %v2839_v6 = vrot.slane %v2837_v1, 3  ;;  %v2842_v28 = vrot.slane %v2840_v43, 4  ;;  %v2128_v47 = vpop.permute.xlu1 %2127  ;;  %v2836_v38 = vsel %vm1652_vm0, %v5336_v4, %v2835_v16  ;;  %v1828_v4 = vmul.bf16 %v5461_v63, %v5303_v60  ;;  %v6097_v1 = vld [vmem:[#allocation6_spill] sm:$0xff]  ;;  %v6098_v43 = vld [vmem:[#allocation11_spill] sm:$0xff] }
 0x18c   : > { %3816 = vmatprep.mubr.msk.bf16.mxu0 %vm2956_vm14, %v2836_v38  ;;  %v2181_v0 = vpop.permute.xlu0 %2180  ;;  %v1208_v39 = vmul.bf16 %v6098_v43, %v6097_v1  ;;  %v2287_v9 = vrot.slane %v1861_v54, 1  ;;  %v2029_v54 = vshrl.u32 %v5291_v33, 16 }
 0x18d   : > { %v5464_v52 = vor.u32 %v2842_v28, %v2839_v6  ;;  %v5482_v53 = vrot.slane %v1828_v4, 1  ;;  %v2027_v6 = vrot.slane %v2025_v22, 1 }
 0x18e   : > { %2058 = vrot.lane.b32.xlu0 %v5395_v55, %s3973_s22  ;;  %2485 = vrot.lane.b32.xlu1 %v2454_v13, %s3980_s11  ;;  %v2515_v28 = vsel %vm2497_vm6, %v1208_v39, %v5410_v10  ;;  %v1878_v39 = vmul.bf16 %v5260_v49, %v5291_v33 }
 0x18f   : > { %v2179_v57 = vpop.permute.xlu1 %2178  ;;  %v2844_v18 = vsel %vm1652_vm0, %v2835_v16, %v5464_v52  ;;  %v2114_v25 = vsel %vm2083_vm3, %v2111_v32, %v5482_v53  ;;  %v1862_v16 = vmul.bf16 %v5461_v63, %v5291_v33  ;;  %v2561_v30 = vsel %vm2549_vm7, %v2515_v28, %v2128_v47 }
 0x190   : > { %3817 = vmatmul.mubr.msk.bf16.gmra.mrb[4].mxu0 %vm2956_vm14, %v2844_v18  ;;  %v2222_v45 = vpop.permute.xlu0 %2221  ;;  %v2028_v13 = vsel %vm1898_vm2, %v2023_v17, %v2027_v6  ;;  %v6099_v18 = vld [vmem:[#allocation7_spill] sm:$0xff]  ;;  %v2031_v28 = vor.u32 %v2029_v54, %v2027_v6 }
 0x191   : > { %v5510_v4 = vrot.slane %v1862_v16, 1 }
 0x192   : > { %2060 = vrot.lane.b32.xlu0 %v2020_v40, %s3973_s22  ;;  %2487 = vrot.lane.b32.xlu1 %v2456_v41, %s3980_s11  ;;  %v6100_v41 = vld [vmem:[#allocation13_spill] sm:$0xff] }
 0x193   : > { %v2220_v55 = vpop.permute.xlu1 %2219  ;;  %v1209_v32 = vmul.bf16 %v6100_v41, %v6099_v18 }
 0x194   : > { %v2306_v48 = vpop.permute.xlu0 %2305 }
 0x195   : > { %v2518_v47 = vsel %vm2497_vm6, %v1209_v32, %v5432_v3  ;;  %v2288_v3 = vsel %vm2083_vm3, %v5397_v7, %v2287_v9 }
 0x196   : > { %2145 = vrot.lane.b32.xlu0 %v2114_v25, %s3974_s23  ;;  %2143 = vrot.lane.b32.xlu1 %v2112_v26, %s3974_s23  ;;  %v2596_v25 = vsel %vm2584_vm8, %v2561_v30, %v2179_v57  ;;  %v2563_v57 = vsel %vm2549_vm7, %v2518_v47, %v5445_v12 }
 0x197   : > { %v2304_v11 = vpop.permute.xlu1 %2303  ;;  %v2631_v10 = vsel %vm2619_vm9, %v2596_v25, %v2220_v55  ;;  %v2290_v55 = vsel %vm2083_vm3, %v2287_v9, %v5510_v4 }
 0x198   : > { %v2357_v42 = vpop.permute.xlu0 %2356  ;;  %v2666_v27 = vsel %vm2654_vm10, %v2631_v10, %v2304_v11  ;;  %v2598_v11 = vsel %vm2584_vm8, %v2563_v57, %v2181_v0 }
 0x199   : > { %v2633_v12 = vsel %vm2619_vm9, %v2598_v11, %v2222_v45  ;;  %v1895_v45 = vmul.bf16 %v5452_v19, %v5291_v33 }
 0x19a   : > { %2196 = vrot.lane.b32.xlu0 %v1844_v5, %s3975_s24  ;;  %2194 = vrot.lane.b32.xlu1 %v1843_v29, %s3975_s24  ;;  %v5526_v5 = vsel %vm491_vm1, %v521_v44, 0  ;;  %v1877_v44 = vmul.bf16 %v5222_v31, %v5303_v60  ;;  %v2668_v0 = vsel %vm2654_vm10, %v2633_v12, %v2306_v48  ;;  %vm3982_vm1 = vmmov 1  }
 0x19b   : > { %v2355_v35 = vpop.permute.xlu1 %2354  ;;  %v2202_v7 = vshll.u32 %v5526_v5, 16  ;;  %v2457_v47 = vrot.slane %v1895_v45, 1  ;;  %v1896_v19 = vmul.bf16 %v5461_v63, %v5526_v5  ;;  %v1829_v63 = vmul.bf16 %v5439_v51, %v5291_v33 }
 0x19c   : > { %v2392_v38 = vpop.permute.xlu0 %2391 }
 0x19d   : > { %v2204_v32 = vrot.slane %v2202_v7, 1  ;;  %v2458_v11 = vsel %vm2083_vm3, %v5468_v15, %v2457_v47  ;;  %v2115_v15 = vrot.slane %v1829_v63, 1 }
 0x19e   : > { %2237 = vrot.lane.b32.xlu0 %v2028_v13, %s3976_s25  ;;  %2235 = vrot.lane.b32.xlu1 %v2020_v40, %s3976_s25  ;;  %v2701_v40 = vsel %vm2689_vm11, %v2666_v27, %v2355_v35  ;;  %v2703_v35 = vsel %vm2689_vm11, %v2668_v0, %v2357_v42 }
 0x19f   : > { %v2390_v26 = vpop.permute.xlu1 %2389  ;;  %v2738_v30 = vsel %vm2724_vm12, %v2703_v35, %v2392_v38  ;;  %v2205_v6 = vsel %vm1898_vm2, %v2031_v28, %v2204_v32  ;;  %v6101_v35 = vld [vmem:[#allocation10_spill] sm:$0xff] }
 0x1a0   : > { %v5521_v22 = vpop.permute.xlu0 %2046  ;;  %v2736_v29 = vsel %vm2724_vm12, %v2701_v40, %v2390_v26 }
 0x1a2   : > { %2321 = vrot.lane.b32.xlu0 %v2290_v55, %s3977_s26  ;;  %2319 = vrot.lane.b32.xlu1 %v2288_v3, %s3977_s26 }
 0x1a3   : > { %v2474_v8 = vpop.permute.xlu1 %2473 }
 0x1a4   : > { %v2771_v17 = vsel %vm2759_vm13, %v2736_v29, %v2474_v8  ;;  %v5546_v16 = vpop.permute.xlu0 %2048  ;;  %v5569_v29 = vrot.slane %v1896_v19, 1 }
 0x1a5   : > { %v2845_v1 = vshrl.u32 %v2771_v17, 16  ;;  %v2848_v43 = vshll.u32 %v2771_v17, 16 }
 0x1a6   : > { %2372 = vrot.lane.b32.xlu0 %v1878_v39, %s3978_s29  ;;  %2370 = vrot.lane.b32.xlu1 %v1877_v44, %s3978_s29  ;;  %v2460_v12 = vsel %vm2083_vm3, %v2457_v47, %v5569_v29  ;;  %v1863_v39 = vmul.bf16 %v5439_v51, %v5526_v5 }
 0x1a7   : > { %v2847_v9 = vrot.slane %v2845_v1, 3  ;;  %v2850_v18 = vrot.slane %v2848_v43, 4  ;;  %v2476_v48 = vpop.permute.xlu1 %2475  ;;  %v1846_v1 = vmul.bf16 %v5256_v36, %v5526_v5  ;;  %v1845_v43 = vmul.bf16 %v5295_v62, %v5291_v33 }
 0x1a8   : > { %v2773_v41 = vsel %vm2759_vm13, %v2738_v30, %v2476_v48  ;;  %v2134_v26 = vpop.permute.xlu0 %2133  ;;  %v2206_v30 = vshrl.u32 %v5526_v5, 16 }
 0x1a9   : > { %v2851_v25 = vor.u32 %v2850_v18, %v2847_v9  ;;  %v2853_v10 = vshrl.u32 %v2773_v41, 16  ;;  %v2856_v42 = vshll.u32 %v2773_v41, 16 }
 0x1aa   : > { %2407 = vrot.lane.b32.xlu0 %v2205_v6, %s3979_s30  ;;  %2405 = vrot.lane.b32.xlu1 %v2028_v13, %s3979_s30  ;;  %v2208_v48 = vor.u32 %v2206_v30, %v2204_v32 }
 0x1ab   : > { %v2855_v38 = vrot.slane %v2853_v10, 3  ;;  %v2858_v27 = vrot.slane %v2856_v42, 4  ;;  %v2132_v57 = vpop.permute.xlu1 %2131  ;;  %v2852_v40 = vsel %vm1652_vm0, %v5464_v52, %v2851_v25  ;;  %v6103_v10 = vld [vmem:[#allocation12_spill] sm:$0xff]  ;;  %v6104_v42 = vld [vmem:[#allocation18_spill] sm:$0xff] }
 0x1ac   : > { %3820 = vmatprep.mubr.msk.bf16.mxu0 %vm2956_vm14, %v2852_v40  ;;  %v2185_v3 = vpop.permute.xlu0 %2184  ;;  %v1211_v47 = vmul.bf16 %v6104_v42, %v6103_v10 }
 0x1ad   : > { %v5565_v55 = vor.u32 %v2858_v27, %v2855_v38 }
 0x1ae   : > { %2062 = vrot.lane.b32.xlu0 %v2028_v13, %s3973_s22  ;;  %2489 = vrot.lane.b32.xlu1 %v2458_v11, %s3980_s11  ;;  %v2116_v13 = vsel %vm2083_vm3, %v5482_v53, %v2115_v15 }
 0x1af   : > { %v2183_v8 = vpop.permute.xlu1 %2182  ;;  %v2860_v52 = vsel %vm1652_vm0, %v2851_v25, %v5565_v55  ;;  %v2291_v25 = vrot.slane %v1863_v39, 1 }
 0x1b0   : > { %3821 = vmatmul.mubr.msk.bf16.gmra.mrb[8].mxu0 %vm2956_vm14, %v2860_v52  ;;  %v2226_v44 = vpop.permute.xlu0 %2225 }
 0x1b1   : > { %v2292_v63 = vsel %vm2083_vm3, %v5510_v4, %v2291_v25 }
 0x1b2   : > { %2064 = vrot.lane.b32.xlu0 %v2031_v28, %s3973_s22  ;;  %2491 = vrot.lane.b32.xlu1 %v2460_v12, %s3980_s11  ;;  %v6102_v28 = vld [vmem:[#allocation19_spill] sm:$0xff] }
 0x1b3   : > { %v2224_v17 = vpop.permute.xlu1 %2223  ;;  %v1210_v45 = vmul.bf16 %v6102_v28, %v6101_v35 }
 0x1b4   : > { %v2310_v54 = vpop.permute.xlu0 %2309 }
 0x1b5   : > { %v2521_v9 = vsel %vm2497_vm6, %v1210_v45, %v5521_v22  ;;  %v2524_v22 = vsel %vm2497_vm6, %v1211_v47, %v5546_v16 }
 0x1b6   : > { %2149 = vrot.lane.b32.xlu0 %v2115_v15, %s3974_s23  ;;  %2147 = vrot.lane.b32.xlu1 %v2116_v13, %s3974_s23  ;;  %v2565_v41 = vsel %vm2549_vm7, %v2521_v9, %v2132_v57  ;;  %v2567_v57 = vsel %vm2549_vm7, %v2524_v22, %v2134_v26  ;;  %v1880_v26 = vmul.bf16 0, %v5256_v36 }
 0x1b7   : > { %v2308_v7 = vpop.permute.xlu1 %2307  ;;  %v2600_v19 = vsel %vm2584_vm8, %v2565_v41, %v2183_v8  ;;  %v2602_v8 = vsel %vm2584_vm8, %v2567_v57, %v2185_v3  ;;  %v1879_v3 = vmul.bf16 %v5295_v62, %v5526_v5  ;;  %v6105_v5 = vld [vmem:[#allocation3_spill] sm:$0xff] }
 0x1b8   : > { %v2361_v0 = vpop.permute.xlu0 %2360  ;;  %v2635_v27 = vsel %vm2619_vm9, %v2600_v19, %v2224_v17  ;;  %v2637_v16 = vsel %vm2619_vm9, %v2602_v8, %v2226_v44  ;;  %v6106_v57 = vld [vmem:[#allocation15_spill] sm:$0xff] }
 0x1b9   : > { %v2670_v32 = vsel %vm2654_vm10, %v2635_v27, %v2308_v7  ;;  %v2672_v15 = vsel %vm2654_vm10, %v2637_v16, %v2310_v54 }
 0x1ba   : > { %2200 = vrot.lane.b32.xlu0 %v1846_v1, %s3975_s24  ;;  %2198 = vrot.lane.b32.xlu1 %v1845_v43, %s3975_s24  ;;  %v2707_v7 = vsel %vm2689_vm11, %v2672_v15, %v2361_v0  ;;  %v1897_v1 = vmul.bf16 0, %v5439_v51  ;;  %v2378_v0 = vsel %vm1898_vm2, %v2208_v48, %v6105_v5  ;;  %vm3885_vm2 = vmpackc.low %vm3330_vm15, %vm3982_vm1 }
 0x1bb   : > { %v2359_v53 = vpop.permute.xlu1 %2358 }
 0x1bc   : > { %v2396_v18 = vpop.permute.xlu0 %2395  ;;  %v2705_v11 = vsel %vm2689_vm11, %v2670_v32, %v2359_v53  ;;  %v2461_v9 = vrot.slane %v1897_v1, 1 }
 0x1bd   : > { %v2742_v43 = vsel %vm2724_vm12, %v2707_v7, %v2396_v18 }
 0x1be   : > { %2241 = vrot.lane.b32.xlu0 %v2208_v48, %s3976_s25  ;;  %2239 = vrot.lane.b32.xlu1 %v2205_v6, %s3976_s25  ;;  %v2462_v47 = vsel %vm2083_vm3, %v5569_v29, %v2461_v9 }
 0x1bf   : > { %v2394_v38 = vpop.permute.xlu1 %2393 }
 0x1c0   : > { %v2051_v40 = vpop.permute.xlu0 %2050  ;;  %v2740_v6 = vsel %vm2724_vm12, %v2705_v11, %v2394_v38  ;;  %v1212_v11 = vmul.bf16 %v5070_v14, %v6106_v57 }
 0x1c2   : > { %2325 = vrot.lane.b32.xlu0 %v2291_v25, %s3977_s26  ;;  %2323 = vrot.lane.b32.xlu1 %v2292_v63, %s3977_s26  ;;  %v2527_v29 = vsel %vm2497_vm6, %v1212_v11, %v2051_v40  ;;  %s3916_s26 = smul.u32 56, %s6110_s28 }
 0x1c3   : > { %v2478_v52 = vpop.permute.xlu1 %2477 }
 0x1c4   : > { %v2775_v12 = vsel %vm2759_vm13, %v2740_v6, %v2478_v52  ;;  %v2053_v17 = vpop.permute.xlu0 %2052  ;;  %s305_s9 = scalar_lea.vmem %s6008_s8, %s3916_s26 }
 0x1c5   : > { %v2861_v13 = vshrl.u32 %v2775_v12, 16  ;;  %v2864_v4 = vshll.u32 %v2775_v12, 16 }
 0x1c6   : > { %2376 = vrot.lane.b32.xlu0 %v1880_v26, %s3978_s29  ;;  %2374 = vrot.lane.b32.xlu1 %v1879_v3, %s3978_s29  ;;  %v6107_v26 = vmul.bf16 %v5018_v24, %v4921_v21 }
 0x1c7   : > { %v2863_v39 = vrot.slane %v2861_v13, 3  ;;  %v2866_v44 = vrot.slane %v2864_v4, 4  ;;  %v2480_v35 = vpop.permute.xlu1 %2479 }
 0x1c8   : > { %v2777_v54 = vsel %vm2759_vm13, %v2742_v43, %v2480_v35  ;;  %v2138_v45 = vpop.permute.xlu0 %2137  ;;  %v2530_v15 = vsel %vm2497_vm6, %v6107_v26, %v2053_v17 }
 0x1c9   : > { %v2867_v28 = vor.u32 %v2866_v44, %v2863_v39  ;;  %v2869_v53 = vshrl.u32 %v2777_v54, 16  ;;  %v2872_v30 = vshll.u32 %v2777_v54, 16  ;;  %v2571_v14 = vsel %vm2549_vm7, %v2530_v15, %v2138_v45 }
 0x1ca   : > { %2411 = vrot.lane.b32.xlu0 %v6105_v5, %s3979_s30  ;;  %2409 = vrot.lane.b32.xlu1 %v2378_v0, %s3979_s30 }
 0x1cb   : > { %v2871_v51 = vrot.slane %v2869_v53, 3  ;;  %v2874_v41 = vrot.slane %v2872_v30, 4  ;;  %v2136_v18 = vpop.permute.xlu1 %2135  ;;  %v2868_v25 = vsel %vm1652_vm0, %v5565_v55, %v2867_v28 }
 0x1cc   : > { %3824 = vmatprep.mubr.msk.bf16.mxu0 %vm2956_vm14, %v2868_v25  ;;  %v2189_v42 = vpop.permute.xlu0 %2188  ;;  %v2569_v6 = vsel %vm2549_vm7, %v2527_v29, %v2136_v18 }
 0x1cd   : > { %v2875_v10 = vor.u32 %v2874_v41, %v2871_v51  ;;  %v2606_v3 = vsel %vm2584_vm8, %v2571_v14, %v2189_v42 }
 0x1ce   : > { %2495 = vrot.lane.b32.xlu0 %v2461_v9, %s3980_s11  ;;  %2493 = vrot.lane.b32.xlu1 %v2462_v47, %s3980_s11 }
 0x1cf   : > { %v2187_v48 = vpop.permute.xlu1 %2186  ;;  %v2876_v19 = vsel %vm1652_vm0, %v2867_v28, %v2875_v10 }
 0x1d0   : > { %3825 = vmatmul.mubr.msk.bf16.gmra.mrb[12].mxu0 %vm2956_vm14, %v2876_v19  ;;  %v2230_v38 = vpop.permute.xlu0 %2229  ;;  %v2604_v52 = vsel %vm2584_vm8, %v2569_v6, %v2187_v48 }
 0x1d1   : > { %v2641_v43 = vsel %vm2619_vm9, %v2606_v3, %v2230_v38 }
 0x1d3   : > { %v2228_v27 = vpop.permute.xlu1 %2227 }
 0x1d4   : > { %v2314_v22 = vpop.permute.xlu0 %2313  ;;  %v2639_v12 = vsel %vm2619_vm9, %v2604_v52, %v2228_v27  ;;  %v3981_v27 = vmov 0.0|0.0  }
 0x1d5   : > { %v2676_v21 = vsel %vm2654_vm10, %v2641_v43, %v2314_v22  ;;  %3844 = vmatprep.subr.bf16.mxu0 %v3981_v27  ;;  %3887 = vmatprep.subr.bf16.mxu1 %v3981_v27 }
 0x1d7   : > { %v2312_v55 = vpop.permute.xlu1 %2311 }
 0x1d8   : > { %v2365_v32 = vpop.permute.xlu0 %2364  ;;  %v2674_v13 = vsel %vm2654_vm10, %v2639_v12, %v2312_v55 }
 0x1d9   : > { %v2711_v35 = vsel %vm2689_vm11, %v2676_v21, %v2365_v32 }
 0x1db   : > { %v2363_v63 = vpop.permute.xlu1 %2362 }
 0x1dc   : > { %v2400_v8 = vpop.permute.xlu0 %2399  ;;  %v2709_v40 = vsel %vm2689_vm11, %v2674_v13, %v2363_v63  ;;  %v6108_v63 = vmul.bf16 %v6092_v34, %v4992_v23 }
 0x1dd   : > { %v2746_v54 = vsel %vm2724_vm12, %v2711_v35, %v2400_v8 }
 0x1df   : > { %v2398_v16 = vpop.permute.xlu1 %2397 }
 0x1e0   : > { %v2055_v4 = vpop.permute.xlu0 %2054  ;;  %v2744_v7 = vsel %vm2724_vm12, %v2709_v40, %v2398_v16 }
 0x1e1   : > { %v2533_v29 = vsel %vm2497_vm6, %v6108_v63, %v2055_v4 }
 0x1e3   : > { %v2482_v1 = vpop.permute.xlu1 %2481 }
 0x1e4   : > { %v2779_v39 = vsel %vm2759_vm13, %v2744_v7, %v2482_v1  ;;  %v2057_v24 = vpop.permute.xlu0 %2056 }
 0x1e5   : > { %v2877_v17 = vshrl.u32 %v2779_v39, 16  ;;  %v2880_v44 = vshll.u32 %v2779_v39, 16  ;;  %v2536_v26 = vsel %vm2497_vm6, %v1215_v61, %v2057_v24 }
 0x1e7   : > { %v2879_v28 = vrot.slane %v2877_v17, 3  ;;  %v2882_v45 = vrot.slane %v2880_v44, 4  ;;  %v2484_v53 = vpop.permute.xlu1 %2483 }
 0x1e8   : > { %v2781_v30 = vsel %vm2759_vm13, %v2746_v54, %v2484_v53  ;;  %v2142_v0 = vpop.permute.xlu0 %2141 }
 0x1e9   : > { %v2883_v5 = vor.u32 %v2882_v45, %v2879_v28  ;;  %v2885_v9 = vshrl.u32 %v2781_v30, 16  ;;  %v2888_v51 = vshll.u32 %v2781_v30, 16  ;;  %v2575_v23 = vsel %vm2549_vm7, %v2536_v26, %v2142_v0 }
 0x1eb   : > { %v2887_v41 = vrot.slane %v2885_v9, 3  ;;  %v2890_v18 = vrot.slane %v2888_v51, 4  ;;  %v2140_v25 = vpop.permute.xlu1 %2139  ;;  %v2884_v42 = vsel %vm1652_vm0, %v2875_v10, %v2883_v5 }
 0x1ec   : > { %3828 = vmatprep.mubr.msk.bf16.mxu0 %vm2956_vm14, %v2884_v42  ;;  %v2193_v48 = vpop.permute.xlu0 %2192  ;;  %v2573_v6 = vsel %vm2549_vm7, %v2533_v29, %v2140_v25 }
 0x1ed   : > { %v2891_v47 = vor.u32 %v2890_v18, %v2887_v41  ;;  %v2610_v4 = vsel %vm2584_vm8, %v2575_v23, %v2193_v48 }
 0x1ef   : > { %v2191_v19 = vpop.permute.xlu1 %2190  ;;  %v2892_v38 = vsel %vm1652_vm0, %v2883_v5, %v2891_v47 }
 0x1f0   : > { %3829 = vmatmul.mubr.msk.bf16.gmra.mrb[16].mxu0 %vm2956_vm14, %v2892_v38  ;;  %v2234_v22 = vpop.permute.xlu0 %2233  ;;  %v2608_v52 = vsel %vm2584_vm8, %v2573_v6, %v2191_v19 }
 0x1f1   : > { %v2645_v3 = vsel %vm2619_vm9, %v2610_v4, %v2234_v22 }
 0x1f3   : > { %v2232_v55 = vpop.permute.xlu1 %2231 }
 0x1f4   : > { %v2318_v32 = vpop.permute.xlu0 %2317  ;;  %v2643_v12 = vsel %vm2619_vm9, %v2608_v52, %v2232_v55 }
 0x1f5   : > { %v2680_v58 = vsel %vm2654_vm10, %v2645_v3, %v2318_v32 }
 0x1f7   : > { %v2316_v57 = vpop.permute.xlu1 %2315 }
 0x1f8   : > { %v2369_v11 = vpop.permute.xlu0 %2368  ;;  %v2678_v15 = vsel %vm2654_vm10, %v2643_v12, %v2316_v57 }
 0x1f9   : > { %v2715_v43 = vsel %vm2689_vm11, %v2680_v58, %v2369_v11 }
 0x1fb   : > { %v2367_v10 = vpop.permute.xlu1 %2366 }
 0x1fc   : > { %v2404_v8 = vpop.permute.xlu0 %2403  ;;  %v2713_v34 = vsel %vm2689_vm11, %v2678_v15, %v2367_v10 }
 0x1fd   : > { %v2750_v39 = vsel %vm2724_vm12, %v2715_v43, %v2404_v8 }
 0x1ff   : > { %v2402_v16 = vpop.permute.xlu1 %2401 }
 0x200   : > { %v2059_v13 = vpop.permute.xlu0 %2058  ;;  %v2748_v14 = vsel %vm2724_vm12, %v2713_v34, %v2402_v16 }
 0x203   : > { %v2486_v40 = vpop.permute.xlu1 %2485 }
 0x204   : > { %v2783_v7 = vsel %vm2759_vm13, %v2748_v14, %v2486_v40  ;;  %v2061_v2 = vpop.permute.xlu0 %2060 }
 0x205   : > { %v2893_v61 = vshrl.u32 %v2783_v7, 16  ;;  %v2896_v1 = vshll.u32 %v2783_v7, 16  ;;  %v2542_v63 = vsel %vm2497_vm6, %v1217_v46, %v2061_v2 }
 0x207   : > { %v2895_v21 = vrot.slane %v2893_v61, 3  ;;  %v2898_v24 = vrot.slane %v2896_v1, 4  ;;  %v2488_v17 = vpop.permute.xlu1 %2487 }
 0x208   : > { %v2785_v44 = vsel %vm2759_vm13, %v2750_v39, %v2488_v17  ;;  %v2146_v54 = vpop.permute.xlu0 %2145 }
 0x209   : > { %v2899_v35 = vor.u32 %v2898_v24, %v2895_v21  ;;  %v2901_v28 = vshrl.u32 %v2785_v44, 16  ;;  %v2904_v45 = vshll.u32 %v2785_v44, 16  ;;  %v2579_v31 = vsel %vm2549_vm7, %v2542_v63, %v2146_v54 }
 0x20b   : > { %v2903_v53 = vrot.slane %v2901_v28, 3  ;;  %v2906_v30 = vrot.slane %v2904_v45, 4  ;;  %v2144_v5 = vpop.permute.xlu1 %2143  ;;  %v2900_v0 = vsel %vm1652_vm0, %v2891_v47, %v2899_v35  ;;  %v2539_v47 = vsel %vm2497_vm6, %v1216_v50, %v2059_v13 }
 0x20c   : > { %3832 = vmatprep.mubr.msk.bf16.mxu0 %vm2956_vm14, %v2900_v0  ;;  %v2197_v51 = vpop.permute.xlu0 %2196  ;;  %v2577_v32 = vsel %vm2549_vm7, %v2539_v47, %v2144_v5 }
 0x20d   : > { %v2907_v9 = vor.u32 %v2906_v30, %v2903_v53  ;;  %v2614_v50 = vsel %vm2584_vm8, %v2579_v31, %v2197_v51 }
 0x20f   : > { %v2195_v41 = vpop.permute.xlu1 %2194  ;;  %v2908_v18 = vsel %vm1652_vm0, %v2899_v35, %v2907_v9 }
 0x210   : > { %3833 = vmatmul.mubr.msk.bf16.gmra.mrb[20].mxu0 %vm2956_vm14, %v2908_v18  ;;  %v2238_v25 = vpop.permute.xlu0 %2237  ;;  %v2612_v57 = vsel %vm2584_vm8, %v2577_v32, %v2195_v41 }
 0x211   : > { %v2649_v16 = vsel %vm2619_vm9, %v2614_v50, %v2238_v25 }
 0x213   : > { %v2236_v42 = vpop.permute.xlu1 %2235 }
 0x214   : > { %v2322_v48 = vpop.permute.xlu0 %2321  ;;  %v2647_v10 = vsel %vm2619_vm9, %v2612_v57, %v2236_v42 }
 0x215   : > { %v2684_v49 = vsel %vm2654_vm10, %v2649_v16, %v2322_v48  ;;  %v5746_v48 = vld [vmem:[%s6004_s4] ss:$0 sm:$0xff] }
 0x217   : > { %v2320_v19 = vpop.permute.xlu1 %2319 }
 0x218   : > { %v2373_v38 = vpop.permute.xlu0 %2372  ;;  %v2682_v29 = vsel %vm2654_vm10, %v2647_v10, %v2320_v19 }
 0x219   : > { %v2719_v15 = vsel %vm2689_vm11, %v2684_v49, %v2373_v38 }
 0x21b   : > { %v2371_v22 = vpop.permute.xlu1 %2370 }
 0x21c   : > { %v2408_v55 = vpop.permute.xlu0 %2407  ;;  %v2717_v37 = vsel %vm2689_vm11, %v2682_v29, %v2371_v22 }
 0x21d   : > { %v2754_v13 = vsel %vm2724_vm12, %v2719_v15, %v2408_v55 }
 0x21f   : > { %v2406_v11 = vpop.permute.xlu1 %2405 }
 0x220   : > { %v2063_v8 = vpop.permute.xlu0 %2062  ;;  %v2752_v6 = vsel %vm2724_vm12, %v2717_v37, %v2406_v11 }
 0x221   : > { %v2545_v0 = vsel %vm2497_vm6, %v1218_v59, %v2063_v8 }
 0x223   : > { %v2490_v52 = vpop.permute.xlu1 %2489 }
 0x224   : > { %v2787_v12 = vsel %vm2759_vm13, %v2752_v6, %v2490_v52  ;;  %v2065_v56 = vpop.permute.xlu0 %2064 }
 0x225   : > { %v2909_v46 = vshrl.u32 %v2787_v12, 16  ;;  %v2912_v26 = vshll.u32 %v2787_v12, 16  ;;  %v2548_v53 = vsel %vm2497_vm6, %v1219_v20, %v2065_v56 }
 0x227   : > { %v2911_v23 = vrot.slane %v2909_v46, 3  ;;  %v2914_v34 = vrot.slane %v2912_v26, 4  ;;  %v2492_v4 = vpop.permute.xlu1 %2491 }
 0x228   : > { %v2789_v14 = vsel %vm2759_vm13, %v2754_v13, %v2492_v4  ;;  %v2150_v3 = vpop.permute.xlu0 %2149 }
 0x229   : > { %v2915_v40 = vor.u32 %v2914_v34, %v2911_v23  ;;  %v2917_v7 = vshrl.u32 %v2789_v14, 16  ;;  %v2920_v58 = vshll.u32 %v2789_v14, 16  ;;  %v2583_v5 = vsel %vm2549_vm7, %v2548_v53, %v2150_v3 }
 0x22b   : > { %v2919_v2 = vrot.slane %v2917_v7, 3  ;;  %v2922_v61 = vrot.slane %v2920_v58, 4  ;;  %v2148_v1 = vpop.permute.xlu1 %2147  ;;  %v2916_v43 = vsel %vm1652_vm0, %v2907_v9, %v2915_v40 }
 0x22c   : > { %3836 = vmatprep.mubr.msk.bf16.mxu0 %vm2956_vm14, %v2916_v43  ;;  %v2201_v21 = vpop.permute.xlu0 %2200  ;;  %v2581_v41 = vsel %vm2549_vm7, %v2545_v0, %v2148_v1 }
 0x22d   : > { %v5720_v39 = vor.u32 %v2922_v61, %v2919_v2  ;;  %v2618_v9 = vsel %vm2584_vm8, %v2583_v5, %v2201_v21 }
 0x22f   : > { %v2199_v24 = vpop.permute.xlu1 %2198  ;;  %v2924_v17 = vsel %vm1652_vm0, %v2915_v40, %v5720_v39 }
 0x230   : > { %3837 = vmatmul.mubr.msk.bf16.gmra.mrb[24].mxu0 %vm2956_vm14, %v2924_v17  ;;  %v2242_v44 = vpop.permute.xlu0 %2241  ;;  %v2616_v25 = vsel %vm2584_vm8, %v2581_v41, %v2199_v24 }
 0x231   : > { %v2653_v18 = vsel %vm2619_vm9, %v2618_v9, %v2242_v44 }
 0x233   : > { %v2240_v35 = vpop.permute.xlu1 %2239 }
 0x234   : > { %v2326_v54 = vpop.permute.xlu0 %2325  ;;  %v2651_v20 = vsel %vm2619_vm9, %v2616_v25, %v2240_v35 }
 0x235   : > { %v2688_v36 = vsel %vm2654_vm10, %v2653_v18, %v2326_v54 }
 0x237   : > { %v2324_v28 = vpop.permute.xlu1 %2323 }
 0x238   : > { %v2377_v45 = vpop.permute.xlu0 %2376  ;;  %v2686_v62 = vsel %vm2654_vm10, %v2651_v20, %v2324_v28 }
 0x239   : > { %v2723_v42 = vsel %vm2689_vm11, %v2688_v36, %v2377_v45 }
 0x23b   : > { %v2375_v30 = vpop.permute.xlu1 %2374 }
 0x23c   : > { %v2412_v51 = vpop.permute.xlu0 %2411  ;;  %v2721_v19 = vsel %vm2689_vm11, %v2686_v62, %v2375_v30 }
 0x23d   : > { %v2758_v60 = vsel %vm2724_vm12, %v2723_v42, %v2412_v51 }
 0x23f   : > { %v2410_v33 = vpop.permute.xlu1 %2409 }
 0x240   : > { %v2496_v59 = vpop.permute.xlu0 %2495  ;;  %v2756_v55 = vsel %vm2724_vm12, %v2721_v19, %v2410_v33 }
 0x241   : > { %v2793_v38 = vsel %vm2759_vm13, %v2758_v60, %v2496_v59 }
 0x242   : > { %v2933_v22 = vshrl.u32 %v2793_v38, 16  ;;  %v2936_v47 = vshll.u32 %v2793_v38, 16 }
 0x243   : > { %v2494_v32 = vpop.permute.xlu1 %2493  ;;  %v3814_v57 = vpop.f32.mrb[0].mxu0 }
 0x244   : > { %v2791_v11 = vsel %vm2759_vm13, %v2756_v55, %v2494_v32  ;;  %v3052_v10 = vadd.f32 %v3814_v57, %v5746_v48  ;;  %v3043_v63 = vpop.f32.mrb[1].mxu0  ;;  %v2935_v37 = vrot.slane %v2933_v22, 3  ;;  %v2938_v50 = vrot.slane %v2936_v47, 4 }
 0x245   : > { %v2925_v29 = vshrl.u32 %v2791_v11, 16  ;;  %v2928_v8 = vshll.u32 %v2791_v11, 16  ;;  %v3815_v31 = vpop.f32.mrb[2].mxu0  ;;  %v3044_v6 = vadd.f32 %v5746_v48, %v3043_v63 }
 0x246   : > { %v3055_v52 = vadd.f32 %v3815_v31, %v5746_v48  ;;  %v3046_v16 = vpop.f32.mrb[3].mxu0  ;;  %v3206_v56 = vrot.slane %v3052_v10, 1  ;;  %v3334_v26 = vrot.slane %v3052_v10, 2  ;;  %v2939_v3 = vor.u32 %v2938_v50, %v2935_v37 }
 0x247   : > { %v2927_v12 = vrot.slane %v2925_v29, 3  ;;  %v2930_v49 = vrot.slane %v2928_v8, 4  ;;  %v3047_v46 = vadd.f32 %v5746_v48, %v3046_v16  ;;  %v3203_v15 = vrot.slane %v3044_v6, 1 }
 0x248   : > { %v3208_v13 = vrot.slane %v3055_v52, 1  ;;  %v3336_v23 = vrot.slane %v3055_v52, 2  ;;  %v3331_v4 = vrot.slane %v3044_v6, 2 }
 0x249   : > { %v2931_v34 = vor.u32 %v2930_v49, %v2927_v12  ;;  %v3204_v14 = vrot.slane %v3047_v46, 1  ;;  %v3332_v40 = vrot.slane %v3047_v46, 2 }
 0x24a   : > { %v3209_v7 = vsel %vm2083_vm3, %v3206_v56, %v3208_v13  ;;  %v3337_v58 = vsel %vm3330_vm15, %v3334_v26, %v3336_v23 }
 0x24b   : > { %v3300_v2 = vmax.f32 %v3052_v10, %v3209_v7  ;;  %v3205_v61 = vsel %vm2083_vm3, %v3203_v15, %v3204_v14  ;;  %v3207_v1 = vsel %vm2083_vm3, %v3204_v14, %v3206_v56  ;;  %v3333_v43 = vsel %vm3330_vm15, %v3331_v4, %v3332_v40 }
 0x24c   : > { %v3298_v21 = vmax.f32 %v3044_v6, %v3205_v61  ;;  %v3299_v24 = vmax.f32 %v3047_v46, %v3207_v1  ;;  %v3335_v17 = vsel %vm3330_vm15, %v3332_v40, %v3334_v26  ;;  %v2932_v44 = vsel %vm1652_vm0, %v5720_v39, %v2931_v34 }
 0x24d   : > { %v3428_v35 = vmax.f32 %v3300_v2, %v3337_v58  ;;  %3840 = vmatprep.mubr.msk.bf16.mxu0 %vm2956_vm14, %v2932_v44  ;;  %v2940_v54 = vsel %vm1652_vm0, %v2931_v34, %v2939_v3  ;;  %vm3528_vm0 = vcmask 769024  }
 0x24e   : > { %v3426_v28 = vmax.f32 %v3298_v21, %v3333_v43  ;;  %v3427_v45 = vmax.f32 %v3299_v24, %v3335_v17  ;;  %3841 = vmatmul.mubr.msk.bf16.gmra.mrb[28].mxu0 %vm2956_vm14, %v2940_v54 }
 0x250   : > { %v3458_v53 = vmax.f32 %v3426_v28, %v3428_v35 }
 0x263   : > { %v3818_v30 = vpop.f32.mrb[4].mxu0 }
 0x264   : > { %v3068_v5 = vadd.f32 %v3818_v30, %v5746_v48  ;;  %v3059_v0 = vpop.f32.mrb[5].mxu0 }
 0x265   : > { %v3060_v9 = vadd.f32 %v5746_v48, %v3059_v0  ;;  %v3819_v51 = vpop.f32.mrb[6].mxu0 }
 0x266   : > { %v5770_v41 = vadd.f32 %v3819_v51, %v5746_v48  ;;  %v3062_v39 = vpop.f32.mrb[7].mxu0  ;;  %v3214_v33 = vrot.slane %v3068_v5, 1  ;;  %v3342_v20 = vrot.slane %v3068_v5, 2 }
 0x267   : > { %v3210_v18 = vrot.slane %v3060_v9, 1  ;;  %v3338_v25 = vrot.slane %v3060_v9, 2  ;;  %v3063_v36 = vadd.f32 %v5746_v48, %v3062_v39 }
 0x268   : > { %v3216_v42 = vrot.slane %v5770_v41, 1  ;;  %v3344_v62 = vrot.slane %v5770_v41, 2 }
 0x269   : > { %v3211_v60 = vsel %vm2083_vm3, %v3208_v13, %v3210_v18  ;;  %v3339_v59 = vsel %vm3330_vm15, %v3336_v23, %v3338_v25  ;;  %v3212_v19 = vrot.slane %v3063_v36, 1  ;;  %v3340_v38 = vrot.slane %v3063_v36, 2 }
 0x26a   : > { %v3301_v22 = vmax.f32 %v3055_v52, %v3211_v60  ;;  %v3217_v47 = vsel %vm2083_vm3, %v3214_v33, %v3216_v42  ;;  %v3345_v55 = vsel %vm3330_vm15, %v3342_v20, %v3344_v62 }
 0x26b   : > { %v3304_v32 = vmax.f32 %v3068_v5, %v3217_v47  ;;  %v3213_v57 = vsel %vm2083_vm3, %v3210_v18, %v3212_v19  ;;  %v3215_v11 = vsel %vm2083_vm3, %v3212_v19, %v3214_v33  ;;  %v3341_v10 = vsel %vm3330_vm15, %v3338_v25, %v3340_v38 }
 0x26c   : > { %v3429_v63 = vmax.f32 %v3301_v22, %v3339_v59  ;;  %v3302_v29 = vmax.f32 %v3060_v9, %v3213_v57  ;;  %v3303_v8 = vmax.f32 %v3063_v36, %v3215_v11  ;;  %v3343_v31 = vsel %vm3330_vm15, %v3340_v38, %v3342_v20 }
 0x26d   : > { %v3432_v37 = vmax.f32 %v3304_v32, %v3345_v55 }
 0x26e   : > { %v3430_v50 = vmax.f32 %v3302_v29, %v3341_v10  ;;  %v3431_v6 = vmax.f32 %v3303_v8, %v3343_v31  ;;  %v3459_v52 = vmax.f32 %v3427_v45, %v3429_v63 }
 0x270   : > { %v3486_v16 = vmax.f32 %v3458_v53, %v3430_v50  ;;  %v3487_v12 = vmax.f32 %v3459_v52, %v3431_v6  ;;  %v3460_v49 = vmax.f32 %v3428_v35, %v3430_v50  ;;  %v3461_v56 = vmax.f32 %v3429_v63, %v3431_v6 }
 0x271   : > { %v3462_v46 = vmax.f32 %v3430_v50, %v3432_v37 }
 0x272   : > { %v3845_v26 = vpack.c.bf16 %v3487_v12, %v3486_v16  ;;  %v3488_v15 = vmax.f32 %v3460_v49, %v3432_v37 }
 0x274   : > { %3846 = vmatpush1.bf16.msra.mxu0 %v3845_v26  ;;  %3901 = vmatpush1.bf16.msra.mxu1 %v3845_v26 }
 0x275   : > { %3847 = vmatprep.subr.bf16.mxu0 %v3981_v27  ;;  %3888 = vmatprep.subr.bf16.mxu1 %v3981_v27 }
 0x283   : > { %v3822_v13 = vpop.f32.mrb[8].mxu0 }
 0x284   : > { %v3084_v23 = vadd.f32 %v3822_v13, %v5746_v48  ;;  %v3075_v34 = vpop.f32.mrb[9].mxu0 }
 0x285   : > { %v3076_v4 = vadd.f32 %v5746_v48, %v3075_v34  ;;  %v3823_v14 = vpop.f32.mrb[10].mxu0 }
 0x286   : > { %v5788_v40 = vadd.f32 %v3823_v14, %v5746_v48  ;;  %v3078_v3 = vpop.f32.mrb[11].mxu0  ;;  %v3222_v61 = vrot.slane %v3084_v23, 1  ;;  %v3350_v1 = vrot.slane %v3084_v23, 2 }
 0x287   : > { %v3218_v7 = vrot.slane %v3076_v4, 1  ;;  %v3346_v58 = vrot.slane %v3076_v4, 2  ;;  %v3079_v2 = vadd.f32 %v5746_v48, %v3078_v3 }
 0x288   : > { %v3224_v43 = vrot.slane %v5788_v40, 1  ;;  %v3352_v21 = vrot.slane %v5788_v40, 2 }
 0x289   : > { %v3219_v24 = vsel %vm2083_vm3, %v3216_v42, %v3218_v7  ;;  %v3347_v17 = vsel %vm3330_vm15, %v3344_v62, %v3346_v58  ;;  %v3220_v44 = vrot.slane %v3079_v2, 1  ;;  %v3348_v35 = vrot.slane %v3079_v2, 2 }
 0x28a   : > { %v3305_v54 = vmax.f32 %v5770_v41, %v3219_v24  ;;  %v3225_v28 = vsel %vm2083_vm3, %v3222_v61, %v3224_v43  ;;  %v3353_v45 = vsel %vm3330_vm15, %v3350_v1, %v3352_v21 }
 0x28b   : > { %v3308_v53 = vmax.f32 %v3084_v23, %v3225_v28  ;;  %v3221_v30 = vsel %vm2083_vm3, %v3218_v7, %v3220_v44  ;;  %v3223_v5 = vsel %vm2083_vm3, %v3220_v44, %v3222_v61  ;;  %v3349_v0 = vsel %vm3330_vm15, %v3346_v58, %v3348_v35 }
 0x28c   : > { %v3433_v9 = vmax.f32 %v3305_v54, %v3347_v17  ;;  %v3306_v51 = vmax.f32 %v3076_v4, %v3221_v30  ;;  %v3307_v39 = vmax.f32 %v3079_v2, %v3223_v5  ;;  %v3351_v18 = vsel %vm3330_vm15, %v3348_v35, %v3350_v1  ;;  %v3517_v30 = vld [vmem:[%s6006_s6 + $0x18] sm:$0xff] }
 0x28d   : > { %v5802_v25 = vmax.f32 %v3308_v53, %v3353_v45  ;;  %3778 = vmatprep.mubr.msk.f32.mxu1 %vm3528_vm0, %v3517_v30 }
 0x28e   : > { %v3434_v36 = vmax.f32 %v3306_v51, %v3349_v0  ;;  %v3435_v41 = vmax.f32 %v3307_v39, %v3351_v18  ;;  %v3489_v33 = vmax.f32 %v3461_v56, %v3433_v9  ;;  %v3463_v20 = vmax.f32 %v3431_v6, %v3433_v9 }
 0x290   : > { %v3848_v42 = vpack.c.bf16 %v3489_v33, %v3488_v15  ;;  %v3490_v62 = vmax.f32 %v3462_v46, %v3434_v36  ;;  %v3491_v60 = vmax.f32 %v3463_v20, %v3435_v41  ;;  %v3464_v59 = vmax.f32 %v3432_v37, %v3434_v36 }
 0x291   : > { %v3465_v19 = vmax.f32 %v3433_v9, %v3435_v41  ;;  %v3466_v38 = vmax.f32 %v3434_v36, %v5802_v25 }
 0x292   : > { %3849 = vmatpush1.bf16.msra.mxu0 %v3848_v42  ;;  %3902 = vmatpush1.bf16.msra.mxu1 %v3848_v42  ;;  %v3851_v22 = vpack.c.bf16 %v3491_v60, %v3490_v62  ;;  %v3492_v47 = vmax.f32 %v3464_v59, %v5802_v25 }
 0x293   : > { %3850 = vmatprep.subr.bf16.mxu0 %v3981_v27  ;;  %3889 = vmatprep.subr.bf16.mxu1 %v3981_v27 }
 0x296   : > { %3852 = vmatpush1.bf16.msra.mxu0 %v3851_v22  ;;  %3903 = vmatpush1.bf16.msra.mxu1 %v3851_v22 }
 0x297   : > { %3853 = vmatprep.subr.bf16.mxu0 %v3981_v27  ;;  %3890 = vmatprep.subr.bf16.mxu1 %v3981_v27 }
 0x2a3   : > { %v3826_v55 = vpop.f32.mrb[12].mxu0 }
 0x2a4   : > { %v3100_v32 = vadd.f32 %v3826_v55, %v5746_v48  ;;  %v3091_v57 = vpop.f32.mrb[13].mxu0 }
 0x2a5   : > { %v3092_v11 = vadd.f32 %v5746_v48, %v3091_v57  ;;  %v3827_v10 = vpop.f32.mrb[14].mxu0 }
 0x2a6   : > { %v5813_v63 = vadd.f32 %v3827_v10, %v5746_v48  ;;  %v3094_v29 = vpop.f32.mrb[15].mxu0  ;;  %v3230_v50 = vrot.slane %v3100_v32, 1  ;;  %v3358_v6 = vrot.slane %v3100_v32, 2 }
 0x2a7   : > { %v3226_v8 = vrot.slane %v3092_v11, 1  ;;  %v3354_v31 = vrot.slane %v3092_v11, 2  ;;  %v3095_v37 = vadd.f32 %v5746_v48, %v3094_v29 }
 0x2a8   : > { %v3232_v52 = vrot.slane %v5813_v63, 1  ;;  %v3360_v16 = vrot.slane %v5813_v63, 2 }
 0x2a9   : > { %v3227_v12 = vsel %vm2083_vm3, %v3224_v43, %v3226_v8  ;;  %v3355_v49 = vsel %vm3330_vm15, %v3352_v21, %v3354_v31  ;;  %v3228_v56 = vrot.slane %v3095_v37, 1  ;;  %v3356_v46 = vrot.slane %v3095_v37, 2 }
 0x2aa   : > { %v3309_v26 = vmax.f32 %v5788_v40, %v3227_v12  ;;  %v3233_v15 = vsel %vm2083_vm3, %v3230_v50, %v3232_v52  ;;  %v3361_v13 = vsel %vm3330_vm15, %v3358_v6, %v3360_v16 }
 0x2ab   : > { %v3312_v23 = vmax.f32 %v3100_v32, %v3233_v15  ;;  %v3229_v34 = vsel %vm2083_vm3, %v3226_v8, %v3228_v56  ;;  %v3231_v4 = vsel %vm2083_vm3, %v3228_v56, %v3230_v50  ;;  %v3357_v14 = vsel %vm3330_vm15, %v3354_v31, %v3356_v46  ;;  %v3515_v8 = vld [vmem:[%s6006_s6 + $0x8] sm:$0xff] }
 0x2ac   : > { %v5826_v3 = vmax.f32 %v3309_v26, %v3355_v49  ;;  %v3310_v7 = vmax.f32 %v3092_v11, %v3229_v34  ;;  %v3311_v58 = vmax.f32 %v3095_v37, %v3231_v4  ;;  %v3359_v2 = vsel %vm3330_vm15, %v3356_v46, %v3358_v6  ;;  %3777 = vmatprep.mubr.msk.f32.mxu0 %vm3528_vm0, %v3515_v8 }
 0x2ad   : > { %v5829_v61 = vmax.f32 %v3312_v23, %v3361_v13 }
 0x2ae   : > { %v3438_v40 = vmax.f32 %v3310_v7, %v3357_v14  ;;  %v3439_v1 = vmax.f32 %v3311_v58, %v3359_v2  ;;  %v3493_v43 = vmax.f32 %v3465_v19, %v5826_v3  ;;  %v3467_v21 = vmax.f32 %v3435_v41, %v5826_v3 }
 0x2b0   : > { %v3854_v24 = vpack.c.bf16 %v3493_v43, %v3492_v47  ;;  %v3494_v17 = vmax.f32 %v3466_v38, %v3438_v40  ;;  %v3495_v44 = vmax.f32 %v3467_v21, %v3439_v1  ;;  %v3468_v35 = vmax.f32 %v5802_v25, %v3438_v40 }
 0x2b1   : > { %v3469_v54 = vmax.f32 %v5826_v3, %v3439_v1  ;;  %v3470_v28 = vmax.f32 %v3438_v40, %v5829_v61 }
 0x2b2   : > { %3855 = vmatpush1.bf16.msra.mxu0 %v3854_v24  ;;  %3904 = vmatpush1.bf16.msra.mxu1 %v3854_v24  ;;  %v3857_v45 = vpack.c.bf16 %v3495_v44, %v3494_v17  ;;  %v3496_v53 = vmax.f32 %v3468_v35, %v5829_v61 }
 0x2b3   : > { %3856 = vmatprep.subr.bf16.mxu0 %v3981_v27  ;;  %3891 = vmatprep.subr.bf16.mxu1 %v3981_v27 }
 0x2b6   : > { %3858 = vmatpush1.bf16.msra.mxu0 %v3857_v45  ;;  %3905 = vmatpush1.bf16.msra.mxu1 %v3857_v45 }
 0x2b7   : > { %3859 = vmatprep.subr.bf16.mxu0 %v3981_v27  ;;  %3892 = vmatprep.subr.bf16.mxu1 %v3981_v27 }
 0x2c3   : > { %v3830_v5 = vpop.f32.mrb[16].mxu0 }
 0x2c4   : > { %v3116_v0 = vadd.f32 %v3830_v5, %v5746_v48  ;;  %v3107_v9 = vpop.f32.mrb[17].mxu0 }
 0x2c5   : > { %v3108_v51 = vadd.f32 %v5746_v48, %v3107_v9  ;;  %v3831_v39 = vpop.f32.mrb[18].mxu0 }
 0x2c6   : > { %v5848_v18 = vadd.f32 %v3831_v39, %v5746_v48  ;;  %v3110_v25 = vpop.f32.mrb[19].mxu0  ;;  %v3238_v20 = vrot.slane %v3116_v0, 1  ;;  %v3366_v42 = vrot.slane %v3116_v0, 2 }
 0x2c7   : > { %v3234_v36 = vrot.slane %v3108_v51, 1  ;;  %v3362_v41 = vrot.slane %v3108_v51, 2  ;;  %v3111_v33 = vadd.f32 %v5746_v48, %v3110_v25 }
 0x2c8   : > { %v3240_v62 = vrot.slane %v5848_v18, 1  ;;  %v3368_v60 = vrot.slane %v5848_v18, 2 }
 0x2c9   : > { %v3235_v59 = vsel %vm2083_vm3, %v3232_v52, %v3234_v36  ;;  %v3363_v19 = vsel %vm3330_vm15, %v3360_v16, %v3362_v41  ;;  %v3236_v38 = vrot.slane %v3111_v33, 1  ;;  %v3364_v22 = vrot.slane %v3111_v33, 2 }
 0x2ca   : > { %v3313_v47 = vmax.f32 %v5813_v63, %v3235_v59  ;;  %v3241_v55 = vsel %vm2083_vm3, %v3238_v20, %v3240_v62  ;;  %v3369_v32 = vsel %vm3330_vm15, %v3366_v42, %v3368_v60 }
 0x2cb   : > { %v3316_v57 = vmax.f32 %v3116_v0, %v3241_v55  ;;  %v3237_v11 = vsel %vm2083_vm3, %v3234_v36, %v3236_v38  ;;  %v3239_v10 = vsel %vm2083_vm3, %v3236_v38, %v3238_v20  ;;  %v3365_v29 = vsel %vm3330_vm15, %v3362_v41, %v3364_v22 }
 0x2cc   : > { %v3441_v31 = vmax.f32 %v3313_v47, %v3363_v19  ;;  %v3314_v37 = vmax.f32 %v3108_v51, %v3237_v11  ;;  %v3315_v50 = vmax.f32 %v3111_v33, %v3239_v10  ;;  %v3367_v63 = vsel %vm3330_vm15, %v3364_v22, %v3366_v42 }
 0x2cd   : > { %v5866_v6 = vmax.f32 %v3316_v57, %v3369_v32 }
 0x2ce   : > { %v3442_v52 = vmax.f32 %v3314_v37, %v3365_v29  ;;  %v3443_v16 = vmax.f32 %v3315_v50, %v3367_v63  ;;  %v3497_v12 = vmax.f32 %v3469_v54, %v3441_v31  ;;  %v3471_v49 = vmax.f32 %v3439_v1, %v3441_v31 }
 0x2d0   : > { %v3860_v56 = vpack.c.bf16 %v3497_v12, %v3496_v53  ;;  %v3498_v46 = vmax.f32 %v3470_v28, %v3442_v52  ;;  %v3499_v26 = vmax.f32 %v3471_v49, %v3443_v16  ;;  %v3472_v15 = vmax.f32 %v5829_v61, %v3442_v52 }
 0x2d1   : > { %v3473_v13 = vmax.f32 %v3441_v31, %v3443_v16  ;;  %v3474_v23 = vmax.f32 %v3442_v52, %v5866_v6 }
 0x2d2   : > { %3861 = vmatpush1.bf16.msra.mxu0 %v3860_v56  ;;  %3906 = vmatpush1.bf16.msra.mxu1 %v3860_v56  ;;  %v3863_v34 = vpack.c.bf16 %v3499_v26, %v3498_v46  ;;  %v3500_v4 = vmax.f32 %v3472_v15, %v5866_v6 }
 0x2d3   : > { %3862 = vmatprep.subr.bf16.mxu0 %v3981_v27  ;;  %3893 = vmatprep.subr.bf16.mxu1 %v3981_v27 }
 0x2d6   : > { %3864 = vmatpush1.bf16.msra.mxu0 %v3863_v34  ;;  %3907 = vmatpush1.bf16.msra.mxu1 %v3863_v34 }
 0x2d7   : > { %3865 = vmatprep.subr.bf16.mxu0 %v3981_v27  ;;  %3894 = vmatprep.subr.bf16.mxu1 %v3981_v27 }
 0x2e3   : > { %v3834_v14 = vpop.f32.mrb[20].mxu0 }
 0x2e4   : > { %v3132_v3 = vadd.f32 %v3834_v14, %v5746_v48  ;;  %v3123_v7 = vpop.f32.mrb[21].mxu0 }
 0x2e5   : > { %v3124_v58 = vadd.f32 %v5746_v48, %v3123_v7  ;;  %v3835_v2 = vpop.f32.mrb[22].mxu0 }
 0x2e6   : > { %v5878_v61 = vadd.f32 %v3835_v2, %v5746_v48  ;;  %v3126_v40 = vpop.f32.mrb[23].mxu0  ;;  %v3246_v24 = vrot.slane %v3132_v3, 1  ;;  %v3374_v17 = vrot.slane %v3132_v3, 2 }
 0x2e7   : > { %v3242_v1 = vrot.slane %v3124_v58, 1  ;;  %v3370_v43 = vrot.slane %v3124_v58, 2  ;;  %v3127_v21 = vadd.f32 %v5746_v48, %v3126_v40 }
 0x2e8   : > { %v3248_v44 = vrot.slane %v5878_v61, 1  ;;  %v3376_v35 = vrot.slane %v5878_v61, 2 }
 0x2e9   : > { %v3243_v54 = vsel %vm2083_vm3, %v3240_v62, %v3242_v1  ;;  %v3371_v28 = vsel %vm3330_vm15, %v3368_v60, %v3370_v43  ;;  %v3244_v45 = vrot.slane %v3127_v21, 1  ;;  %v3372_v53 = vrot.slane %v3127_v21, 2 }
 0x2ea   : > { %v3317_v30 = vmax.f32 %v5848_v18, %v3243_v54  ;;  %v3249_v5 = vsel %vm2083_vm3, %v3246_v24, %v3248_v44  ;;  %v3377_v0 = vsel %vm3330_vm15, %v3374_v17, %v3376_v35 }
 0x2eb   : > { %v3320_v9 = vmax.f32 %v3132_v3, %v3249_v5  ;;  %v3245_v51 = vsel %vm2083_vm3, %v3242_v1, %v3244_v45  ;;  %v3247_v39 = vsel %vm2083_vm3, %v3244_v45, %v3246_v24  ;;  %v3373_v25 = vsel %vm3330_vm15, %v3370_v43, %v3372_v53 }
 0x2ec   : > { %v3445_v36 = vmax.f32 %v3317_v30, %v3371_v28  ;;  %v3318_v41 = vmax.f32 %v3124_v58, %v3245_v51  ;;  %v3319_v33 = vmax.f32 %v3127_v21, %v3247_v39  ;;  %v3375_v20 = vsel %vm3330_vm15, %v3372_v53, %v3374_v17 }
 0x2ed   : > { %v5892_v42 = vmax.f32 %v3320_v9, %v3377_v0 }
 0x2ee   : > { %v3446_v62 = vmax.f32 %v3318_v41, %v3373_v25  ;;  %v3447_v18 = vmax.f32 %v3319_v33, %v3375_v20  ;;  %v3501_v60 = vmax.f32 %v3473_v13, %v3445_v36  ;;  %v3475_v59 = vmax.f32 %v3443_v16, %v3445_v36 }
 0x2f0   : > { %v3866_v19 = vpack.c.bf16 %v3501_v60, %v3500_v4  ;;  %v3502_v38 = vmax.f32 %v3474_v23, %v3446_v62  ;;  %v3503_v22 = vmax.f32 %v3475_v59, %v3447_v18  ;;  %v3476_v47 = vmax.f32 %v5866_v6, %v3446_v62 }
 0x2f1   : > { %v3477_v55 = vmax.f32 %v3445_v36, %v3447_v18  ;;  %v3478_v32 = vmax.f32 %v3446_v62, %v5892_v42 }
 0x2f2   : > { %3867 = vmatpush1.bf16.msra.mxu0 %v3866_v19  ;;  %3908 = vmatpush1.bf16.msra.mxu1 %v3866_v19  ;;  %v3869_v57 = vpack.c.bf16 %v3503_v22, %v3502_v38  ;;  %v3504_v11 = vmax.f32 %v3476_v47, %v5892_v42 }
 0x2f3   : > { %3868 = vmatprep.subr.bf16.mxu0 %v3981_v27  ;;  %3895 = vmatprep.subr.bf16.mxu1 %v3981_v27 }
 0x2f6   : > { %3870 = vmatpush1.bf16.msra.mxu0 %v3869_v57  ;;  %3909 = vmatpush1.bf16.msra.mxu1 %v3869_v57 }
 0x2f7   : > { %3871 = vmatprep.subr.bf16.mxu0 %v3981_v27  ;;  %3896 = vmatprep.subr.bf16.mxu1 %v3981_v27 }
 0x303   : > { %v3838_v10 = vpop.f32.mrb[24].mxu0 }
 0x304   : > { %v3148_v29 = vadd.f32 %v3838_v10, %v5746_v48  ;;  %v3139_v8 = vpop.f32.mrb[25].mxu0 }
 0x305   : > { %v3140_v31 = vadd.f32 %v5746_v48, %v3139_v8  ;;  %v3839_v37 = vpop.f32.mrb[26].mxu0 }
 0x306   : > { %v5904_v50 = vadd.f32 %v3839_v37, %v5746_v48  ;;  %v3142_v63 = vpop.f32.mrb[27].mxu0  ;;  %v3254_v12 = vrot.slane %v3148_v29, 1  ;;  %v3382_v49 = vrot.slane %v3148_v29, 2 }
 0x307   : > { %v3250_v6 = vrot.slane %v3140_v31, 1  ;;  %v3378_v52 = vrot.slane %v3140_v31, 2  ;;  %v3143_v16 = vadd.f32 %v5746_v48, %v3142_v63 }
 0x308   : > { %v3256_v56 = vrot.slane %v5904_v50, 1  ;;  %v3384_v46 = vrot.slane %v5904_v50, 2 }
 0x309   : > { %v3251_v26 = vsel %vm2083_vm3, %v3248_v44, %v3250_v6  ;;  %v3379_v15 = vsel %vm3330_vm15, %v3376_v35, %v3378_v52  ;;  %v3252_v13 = vrot.slane %v3143_v16, 1  ;;  %v3380_v23 = vrot.slane %v3143_v16, 2 }
 0x30a   : > { %v3321_v34 = vmax.f32 %v5878_v61, %v3251_v26  ;;  %v3257_v4 = vsel %vm2083_vm3, %v3254_v12, %v3256_v56  ;;  %v3385_v14 = vsel %vm3330_vm15, %v3382_v49, %v3384_v46 }
 0x30b   : > { %v3324_v3 = vmax.f32 %v3148_v29, %v3257_v4  ;;  %v3253_v7 = vsel %vm2083_vm3, %v3250_v6, %v3252_v13  ;;  %v3255_v58 = vsel %vm2083_vm3, %v3252_v13, %v3254_v12  ;;  %v3381_v2 = vsel %vm3330_vm15, %v3378_v52, %v3380_v23 }
 0x30c   : > { %v3449_v40 = vmax.f32 %v3321_v34, %v3379_v15  ;;  %v3322_v1 = vmax.f32 %v3140_v31, %v3253_v7  ;;  %v3323_v43 = vmax.f32 %v3143_v16, %v3255_v58  ;;  %v3383_v21 = vsel %vm3330_vm15, %v3380_v23, %v3382_v49 }
 0x30d   : > { %v5918_v24 = vmax.f32 %v3324_v3, %v3385_v14 }
 0x30e   : > { %v3450_v17 = vmax.f32 %v3322_v1, %v3381_v2  ;;  %v3451_v61 = vmax.f32 %v3323_v43, %v3383_v21  ;;  %v3505_v44 = vmax.f32 %v3477_v55, %v3449_v40  ;;  %v3479_v35 = vmax.f32 %v3447_v18, %v3449_v40  ;;  %v3516_v2 = vld [vmem:[%s6006_s6 + $0x10] sm:$0xff]  ;;  %v3519_v1 = vld [vmem:[%s6006_s6 + $0x28] sm:$0xff]  ;;  %v3521_v43 = vld [vmem:[%s6006_s6 + $0x38] sm:$0xff] }
 0x30f   : > { %v3520_v21 = vld [vmem:[%s6006_s6 + $0x30] sm:$0xff] }
 0x310   : > { %v3872_v54 = vpack.c.bf16 %v3505_v44, %v3504_v11  ;;  %v3506_v28 = vmax.f32 %v3478_v32, %v3450_v17  ;;  %v3507_v45 = vmax.f32 %v3479_v35, %v3451_v61  ;;  %v3480_v53 = vmax.f32 %v5892_v42, %v3450_v17  ;;  %v3524_v44 = vld [vmem:[%s6006_s6 + $0x50] sm:$0xff]  ;;  %v3527_v35 = vld [vmem:[%s6006_s6 + $0x68] sm:$0x1] }
 0x311   : > { %v3481_v30 = vmax.f32 %v3449_v40, %v3451_v61  ;;  %v3482_v5 = vmax.f32 %v3450_v17, %v5918_v24  ;;  %v3514_v40 = vld [vmem:[%s6006_s6] sm:$0xff] }
 0x312   : > { %3873 = vmatpush1.bf16.msra.mxu0 %v3872_v54  ;;  %3910 = vmatpush1.bf16.msra.mxu1 %v3872_v54  ;;  %v3875_v0 = vpack.c.bf16 %v3507_v45, %v3506_v28  ;;  %v3508_v9 = vmax.f32 %v3480_v53, %v5918_v24  ;;  %v3522_v17 = vld [vmem:[%s6006_s6 + $0x40] sm:$0xff] }
 0x313   : > { %3874 = vmatprep.subr.bf16.mxu0 %v3981_v27  ;;  %3897 = vmatprep.subr.bf16.mxu1 %v3981_v27  ;;  %v3526_v54 = vld [vmem:[%s6006_s6 + $0x60] sm:$0x1] }
 0x316   : > { %3876 = vmatpush1.bf16.msra.mxu0 %v3875_v0  ;;  %3911 = vmatpush1.bf16.msra.mxu1 %v3875_v0 }
 0x317   : > { %3877 = vmatprep.subr.bf16.mxu0 %v3981_v27  ;;  %3898 = vmatprep.subr.bf16.mxu1 %v3981_v27 }
 0x321   : > { %v3842_v51 = vpop.f32.mrb[28].mxu0 }
 0x322   : > { %v3164_v39 = vadd.f32 %v3842_v51, %v5746_v48  ;;  %v3155_v25 = vpop.f32.mrb[29].mxu0 }
 0x323   : > { %v3156_v36 = vadd.f32 %v5746_v48, %v3155_v25  ;;  %v3843_v41 = vpop.f32.mrb[30].mxu0 }
 0x324   : > { %v3167_v33 = vadd.f32 %v3843_v41, %v5746_v48  ;;  %v3158_v20 = vpop.f32.mrb[31].mxu0  ;;  %v3262_v60 = vrot.slane %v3164_v39, 1  ;;  %v3390_v59 = vrot.slane %v3164_v39, 2 }
 0x325   : > { %v3258_v42 = vrot.slane %v3156_v36, 1  ;;  %v3386_v62 = vrot.slane %v3156_v36, 2  ;;  %v3159_v18 = vadd.f32 %v5746_v48, %v3158_v20 }
 0x326   : > { %v3264_v19 = vrot.slane %v3167_v33, 1  ;;  %v3392_v38 = vrot.slane %v3167_v33, 2 }
 0x327   : > { %v3259_v22 = vsel %vm2083_vm3, %v3256_v56, %v3258_v42  ;;  %v3387_v47 = vsel %vm3330_vm15, %v3384_v46, %v3386_v62  ;;  %v3260_v55 = vrot.slane %v3159_v18, 1  ;;  %v3388_v32 = vrot.slane %v3159_v18, 2 }
 0x328   : > { %v3325_v57 = vmax.f32 %v5904_v50, %v3259_v22  ;;  %v3265_v11 = vsel %vm2083_vm3, %v3262_v60, %v3264_v19  ;;  %v3329_v10 = vmax.f32 %v3167_v33, %v3264_v19  ;;  %v3393_v29 = vsel %vm3330_vm15, %v3390_v59, %v3392_v38 }
 0x329   : > { %v3328_v8 = vmax.f32 %v3164_v39, %v3265_v11  ;;  %v3261_v48 = vsel %vm2083_vm3, %v3258_v42, %v3260_v55  ;;  %v3263_v31 = vsel %vm2083_vm3, %v3260_v55, %v3262_v60  ;;  %v3389_v37 = vsel %vm3330_vm15, %v3386_v62, %v3388_v32 }
 0x32a   : > { %v3453_v63 = vmax.f32 %v3325_v57, %v3387_v47  ;;  %v3326_v6 = vmax.f32 %v3156_v36, %v3261_v48  ;;  %v3327_v52 = vmax.f32 %v3159_v18, %v3263_v31  ;;  %v3391_v12 = vsel %vm3330_vm15, %v3388_v32, %v3390_v59 }
 0x32b   : > { %v3456_v16 = vmax.f32 %v3328_v8, %v3393_v29  ;;  %v3457_v26 = vmax.f32 %v3329_v10, %v3392_v38  ;;  %vm3659_vm3 = vcmask 253952  }
 0x32c   : > { %v3454_v49 = vmax.f32 %v3326_v6, %v3389_v37  ;;  %v3455_v50 = vmax.f32 %v3327_v52, %v3391_v12  ;;  %v3483_v56 = vmax.f32 %v3451_v61, %v3453_v63  ;;  %v3509_v46 = vmax.f32 %v3481_v30, %v3453_v63  ;;  %v3525_v61 = vld [vmem:[%s6006_s6 + $0x58] sm:$0xff] }
 0x32e   : > { %v3484_v15 = vmax.f32 %v5918_v24, %v3454_v49  ;;  %v3485_v13 = vmax.f32 %v3453_v63, %v3455_v50  ;;  %v3511_v23 = vmax.f32 %v3483_v56, %v3455_v50  ;;  %v3878_v34 = vpack.c.bf16 %v3509_v46, %v3508_v9  ;;  %v3523_v24 = vld [vmem:[%s6006_s6 + $0x48] sm:$0xff] }
 0x32f   : > { %v3510_v4 = vmax.f32 %v3482_v5, %v3454_v49 }
 0x330   : > { %v3513_v14 = vmax.f32 %v3485_v13, %v3457_v26  ;;  %3879 = vmatpush1.bf16.msra.mxu0 %v3878_v34  ;;  %3912 = vmatpush1.bf16.msra.mxu1 %v3878_v34  ;;  %v3512_v3 = vmax.f32 %v3484_v15, %v3456_v16 }
 0x331   : > { %3880 = vmatprep.subr.bf16.mxu0 %v3981_v27  ;;  %3899 = vmatprep.subr.bf16.mxu1 %v3981_v27  ;;  %v3881_v7 = vpack.c.bf16 %v3511_v23, %v3510_v4 }
 0x332   : > { %v3884_v58 = vpack.c.bf16 %v3513_v14, %v3512_v3 }
 0x334   : > { %3882 = vmatpush1.bf16.msra.mxu0 %v3881_v7  ;;  %3913 = vmatpush1.bf16.msra.mxu1 %v3881_v7 }
 0x335   : > { %3883 = vmatprep.subr.bf16.mxu0 %v3981_v27  ;;  %3900 = vmatprep.subr.bf16.mxu1 %v3981_v27  ;;  %v3518_v27 = vld [vmem:[%s6006_s6 + $0x20] sm:$0xff] }
 0x338   : > { %3886 = vmatpush1.bf16.msk.msra.mxu0 %vm3885_vm2, %v3884_v58  ;;  %3914 = vmatpush1.bf16.msk.msra.mxu1 %vm3885_vm2, %v3884_v58 }
 0x33b   : > { %3623 = vmatmul.mubr.f32.vlgmr.msra.gmra.mrb[0].mxu1 %v3516_v2  ;;  %3618 = vmatmul.mubr.f32.vlgmr.msra.gmra.mrb[32].mxu0 %v3514_v40 }
 0x33c   : > { %3779 = vmatprep.mubr.msk.f32.mxu1 %vm3528_vm0, %v3519_v1 }
 0x33f   : > { %3628 = vmatmul.mubr.f32.gmra.mrb[2].mxu1 %v3518_v27 }
 0x340   : > { %3780 = vmatprep.mubr.msk.f32.mxu1 %vm3528_vm0, %v3521_v43 }
 0x343   : > { %3633 = vmatmul.mubr.f32.gmra.mrb[4].mxu1 %v3520_v21 }
 0x344   : > { %3781 = vmatprep.mubr.msk.f32.mxu1 %vm3528_vm0, %v3523_v24 }
 0x347   : > { %3638 = vmatmul.mubr.f32.gmra.mrb[6].mxu1 %v3522_v17 }
 0x348   : > { %3782 = vmatprep.mubr.msk.f32.mxu1 %vm3528_vm0, %v3525_v61 }
 0x34b   : > { %3643 = vmatmul.mubr.f32.gmra.mrb[8].mxu1 %v3524_v44 }
 0x34c   : > { %3783 = vmatprep.mubr.msk.f32.mxu1 %vm3528_vm0, %v3527_v35 }
 0x34f   : > { %3648 = vmatmul.mubr.f32.gmra.mrb[10].mxu1 %v3526_v54 }
 0x40e   : > { %v3624_v28 = vpop.f32.mrb[0].mxu1  ;;  %v3619_v45 = vpop.f32.mrb[32].mxu0 }
 0x40f   : > { %3654 = vst.msk [vmem:[%s305_s9 + $0x8] sm:$0xff] %vm2759_vm13, %v3624_v28  ;;  %v3626_v53 = vpop.f32.mrb[1].mxu1  ;;  %3653 = vst.msk [vmem:[%s305_s9] sm:$0xff] %vm2759_vm13, %v3619_v45  ;;  %v3621_v30 = vpop.f32.mrb[33].mxu0 }
 0x412   : > { %v3629_v5 = vpop.f32.mrb[2].mxu1 }
 0x413   : > { %3655 = vst.msk [vmem:[%s305_s9 + $0x10] sm:$0xff] %vm2759_vm13, %v3629_v5  ;;  %v3631_v0 = vpop.f32.mrb[3].mxu1 }
 0x416   : > { %v3634_v9 = vpop.f32.mrb[4].mxu1 }
 0x417   : > { %3656 = vst.msk [vmem:[%s305_s9 + $0x18] sm:$0xff] %vm2759_vm13, %v3634_v9  ;;  %v3636_v51 = vpop.f32.mrb[5].mxu1 }
 0x41a   : > { %v3639_v39 = vpop.f32.mrb[6].mxu1 }
 0x41b   : > { %3657 = vst.msk [vmem:[%s305_s9 + $0x20] sm:$0xff] %vm2759_vm13, %v3639_v39  ;;  %v3641_v25 = vpop.f32.mrb[7].mxu1 }
 0x41e   : > { %v3644_v36 = vpop.f32.mrb[8].mxu1 }
 0x41f   : > { %3658 = vst.msk [vmem:[%s305_s9 + $0x28] sm:$0xff] %vm2759_vm13, %v3644_v36  ;;  %v3646_v41 = vpop.f32.mrb[9].mxu1 }
 0x422   : > { %v3649_v33 = vpop.f32.mrb[10].mxu1 }
 0x423   : > { %3660 = vst.msk [vmem:[%s305_s9 + $0x30] sm:$0x1] %vm3659_vm3, %v3649_v33  ;;  %v3651_v20 = vpop.f32.mrb[11].mxu1 }
 0x424 PF: > { %s18_s27 = sadd.s32 1, %s3967_s27  }
 0x425   : > { %p15_p4 = scmp.ge.s32.totalorder %s18_s27, 4  }
 0x427   :  { %17 = sbr.rel (!%p15_p4) target bundleno = 1 (0x1), region = 82 }

</bundles_post_ra>
